<compile_context>
chip_gen: v5e
topology: v5e:2x2
jax: 0.10.0
libtpu: 0.0.40
codegen_flags: <defaults>
</compile_context>

<pallas_src>
import functools

import jax
import jax.numpy as jnp
from jax.experimental import pallas as pl
from jax.experimental.pallas import tpu as pltpu

BN_EPS = 1e-5                 # nn.BatchNorm1d default
H_IN, H1, H2 = 1024, 256, 64


# ------------------------- Pallas kernel -------------------------

def _latent_classifier_kernel(x_ref, w1_ref, gb1_ref, w2_ref, gbw2_ref, b3_ref,
                              o_ref, h1_ref, stats_ref):
    # GradientReverseLayer is identity in the forward pass.
    i = pl.program_id(0)
    nsteps = pl.num_programs(0)
    tb = x_ref.shape[0]

    @pl.when(i == 0)
    def _init():
        stats_ref[...] = jnp.zeros_like(stats_ref)

    # ---- Layer 1 on this batch tile: Linear(1024, 256).
    # (Linear bias omitted: it cancels against the BN mean subtraction.)
    xt = x_ref[...].astype(jnp.bfloat16)            # no-op if x arrives as bf16
    h = jnp.dot(xt, w1_ref[...], preferred_element_type=jnp.float32)  # (tb, 256)

    # Park the tile in the resident h1 scratch and accumulate the BN1 column
    # sum / sum-of-squares in the same pass (h is still live in registers).
    start = pl.multiple_of(i * tb, tb)
    h1_ref[pl.ds(start, tb), :] = h
    stats_ref[0:1, :] += jnp.sum(h, axis=0, keepdims=True)
    stats_ref[1:2, :] += jnp.sum(h * h, axis=0, keepdims=True)

    # ---- After the last tile: BN1 + ReLU + layer2 + BN2 + ReLU + layer3.
    @pl.when(i == nsteps - 1)
    def _finalize():
        batch = h1_ref.shape[0]
        inv_b = 1.0 / batch

        # BatchNorm1d(256), training-mode batch statistics.
        m1 = stats_ref[0:1, :] * inv_b
        v1 = jnp.maximum(stats_ref[1:2, :] * inv_b - m1 * m1, 0.0)
        scale1 = jax.lax.rsqrt(v1 + BN_EPS) * gb1_ref[0:1, :]
        shift1 = gb1_ref[1:2, :] - m1 * scale1
        a1 = jnp.maximum(h1_ref[...] * scale1 + shift1, 0.0)          # (B, 256)

        # Linear(256, 64) (bias cancels in BN2) + BatchNorm1d(64) + ReLU.
        h2 = jnp.dot(a1.astype(jnp.bfloat16), w2_ref[...],
                     preferred_element_type=jnp.float32)              # (B, 64)
        m2 = jnp.mean(h2, axis=0, keepdims=True)
        v2 = jnp.maximum(jnp.mean(h2 * h2, axis=0, keepdims=True) - m2 * m2, 0.0)
        scale2 = jax.lax.rsqrt(v2 + BN_EPS) * gbw2_ref[0:1, :]
        shift2 = gbw2_ref[1:2, :] - m2 * scale2
        a2 = jnp.maximum(h2 * scale2 + shift2, 0.0)                   # (B, 64)

        # Linear(64, 1), bias kept.  w3 stored as a [1, 64] row -> broadcast
        # multiply + lane reduce instead of a degenerate N=1 MXU matmul.
        y = jnp.sum(a2 * gbw2_ref[2:3, :], axis=1, keepdims=True) + b3_ref[0, 0]
        o_ref[...] = y


# ------------------------- wrapper -------------------------

def _pick_batch_tile(batch):
    for tb in (512, 256, 128, 64, 32, 16, 8):
        if batch % tb == 0:
            return tb
    return batch                      # single full-array tile (always legal)


@functools.partial(jax.jit, static_argnames=("batch_tile",))
def xgan_latent_classifier(x, p, batch_tile=None):
    """Forward pass.  For best throughput call with B >= 128 (v5e) or
    B >= 256 (v6e/v7x); tiny batches are launch / weight-DMA bound."""
    batch, feat = x.shape
    assert feat == H_IN, feat
    tb = batch_tile if batch_tile is not None else _pick_batch_tile(batch)
    assert batch % tb == 0, (batch, tb)

    return pl.pallas_call(
        _latent_classifier_kernel,
        out_shape=jax.ShapeDtypeStruct((batch, 1), jnp.float32),
        grid=(batch // tb,),
        in_specs=[
            # x streamed one (tb, 1024) tile per grid step (auto double-buffered).
            pl.BlockSpec((tb, H_IN), lambda i: (i, 0)),
            # Constant block index -> weights / BN params fetched once, resident.
            pl.BlockSpec((H_IN, H1), lambda i: (0, 0)),      # w1 bf16
            pl.BlockSpec((2, H1), lambda i: (0, 0)),         # gamma1 || beta1
            pl.BlockSpec((H1, H2), lambda i: (0, 0)),        # w2 bf16
            pl.BlockSpec((3, H2), lambda i: (0, 0)),         # gamma2 || beta2 || w3
            pl.BlockSpec(memory_space=pltpu.MemorySpace.SMEM),  # b3 scalar
        ],
        out_specs=pl.BlockSpec((batch, 1), lambda i: (0, 0)),
        scratch_shapes=[
            pltpu.VMEM((batch, H1), jnp.float32),    # resident post-layer-1 act.
            pltpu.VMEM((2, H1), jnp.float32),        # BN1 sum / sum-of-squares
        ],
        compiler_params=pltpu.CompilerParams(
            dimension_semantics=("arbitrary",),      # h1/stats carry across tiles
            vmem_limit_bytes=48 * 1024 * 1024,       # > 16/32 MiB defaults, < v7x 64 MiB
        ),
    )(x, p["w1"], p["gb1"], p["w2"], p["gbw2"], p["b3"])


# ------------------------- params & references -------------------------

def init_params(key):
    k1, k2, k3, kb3 = jax.random.split(key, 4)

    def linear_w(k, fan_in, fan_out, dtype):
        bound = 1.0 / (fan_in ** 0.5)
        w = jax.random.uniform(k, (fan_in, fan_out), jnp.float32, -bound, bound)
        return w.astype(dtype)                         # pre-transposed [in, out]

    w3_row = linear_w(k3, H2, 1, jnp.float32).reshape(1, H2)
    return {
        "w1": linear_w(k1, H_IN, H1, jnp.bfloat16),
        "gb1": jnp.concatenate([jnp.ones((1, H1), jnp.float32),      # gamma1
                                jnp.zeros((1, H1), jnp.float32)], 0),  # beta1
        "w2": linear_w(k2, H1, H2, jnp.bfloat16),
        "gbw2": jnp.concatenate([jnp.ones((1, H2), jnp.float32),     # gamma2
                                 jnp.zeros((1, H2), jnp.float32),    # beta2
                                 w3_row], 0),                        # w3 row
        "b3": jax.random.uniform(kb3, (1, 1), jnp.float32, -0.125, 0.125),
    }


def reference_forward(x, p):
    """Pure-JAX mirror of the kernel math (bf16 matmuls, f32 batch stats)."""
    g1, b1 = p["gb1"][0:1], p["gb1"][1:2]
    g2, b2, w3 = p["gbw2"][0:1], p["gbw2"][1:2], p["gbw2"][2:3]

    h = jnp.dot(x.astype(jnp.bfloat16), p["w1"], preferred_element_type=jnp.float32)
    m = h.mean(0, keepdims=True)
    v = jnp.maximum((h * h).mean(0, keepdims=True) - m * m, 0.0)
    h = jnp.maximum((h - m) * jax.lax.rsqrt(v + BN_EPS) * g1 + b1, 0.0)

    h = jnp.dot(h.astype(jnp.bfloat16), p["w2"], preferred_element_type=jnp.float32)
    m = h.mean(0, keepdims=True)
    v = jnp.maximum((h * h).mean(0, keepdims=True) - m * m, 0.0)
    h = jnp.maximum((h - m) * jax.lax.rsqrt(v + BN_EPS) * g2 + b2, 0.0)

    return jnp.sum(h * w3, axis=1, keepdims=True) + p["b3"]


def reference_forward_f32(x, p):
    """Full-f32, two-pass-variance reference (closer to the PyTorch spec math)."""
    g1, b1 = p["gb1"][0:1], p["gb1"][1:2]
    g2, b2, w3 = p["gbw2"][0:1], p["gbw2"][1:2], p["gbw2"][2:3]

    h = jnp.dot(x, p["w1"].astype(jnp.float32))
    m = h.mean(0, keepdims=True)
    v = ((h - m) ** 2).mean(0, keepdims=True)
    h = jnp.maximum((h - m) * jax.lax.rsqrt(v + BN_EPS) * g1 + b1, 0.0)

    h = jnp.dot(h, p["w2"].astype(jnp.float32))
    m = h.mean(0, keepdims=True)
    v = ((h - m) ** 2).mean(0, keepdims=True)
    h = jnp.maximum((h - m) * jax.lax.rsqrt(v + BN_EPS) * g2 + b2, 0.0)

    return jnp.sum(h * w3, axis=1, keepdims=True) + p["b3"]


# TODO(synk): GradientReverseLayer only affects the backward pass (gradient
# negation); the forward is identity, so it has no kernel-side representation.
# TODO(synk): BatchNorm running_mean/running_var buffers are not updated
# (training-mode batch statistics drive the forward activation only).
# TODO(synk): v7x second TensorCore is left idle; a feature-split of layer 1
# across cores (with a CMEM/VMEM_SHARED exchange before layer 2) or a JAX-level
# batch shard would be needed to use both TCs.

if __name__ == "__main__":
    key = jax.random.PRNGKey(0)
    kx, kp = jax.random.split(key)

    B = 256                       # amortizes the ~0.55 MiB weight DMA
    x = jax.random.normal(kx, (B, H_IN), jnp.float32)
    params = init_params(kp)

    # batch_tile=128 -> grid=(2,): exercises the streamed-x / resident-h1 path.
    out = xgan_latent_classifier(x, params, batch_tile=128)
    out = jax.block_until_ready(out)

    assert out.shape == (B, 1), out.shape
    assert bool(jnp.all(jnp.isfinite(out)))

    # Tight check against the kernel-mirroring reference.
    ref = reference_forward(x, params)
    assert bool(jnp.allclose(out, ref, rtol=1e-3, atol=1e-3)), (out[:4], ref[:4])

    # Looser, non-circular check against full-f32 spec math (bf16 matmul error).
    ref32 = reference_forward_f32(x, params)
    assert bool(jnp.allclose(out, ref32, rtol=1e-1, atol=1e-1)), (out[:4], ref32[:4])

    print("KERNEL_OK")
</pallas_src>

<mosaic_0001>
module attributes {stable_mosaic.version = 11 : i64} {
  func.func @_latent_classifier_kernel(%arg0: i32, %arg1: memref<128x1024xf32, #tpu.memory_space<vmem>>, %arg2: memref<1024x256xbf16, #tpu.memory_space<vmem>>, %arg3: memref<2x256xf32, #tpu.memory_space<vmem>>, %arg4: memref<256x64xbf16, #tpu.memory_space<vmem>>, %arg5: memref<3x64xf32, #tpu.memory_space<vmem>>, %arg6: memref<1x1xf32, #tpu.memory_space<smem>>, %arg7: memref<256x1xf32, #tpu.memory_space<vmem>>, %arg8: memref<256x256xf32, #tpu.memory_space<vmem>>, %arg9: memref<2x256xf32, #tpu.memory_space<vmem>>) attributes {dimension_semantics = [#tpu.dimension_semantics<arbitrary>], iteration_bounds = array<i64: 2>, scalar_prefetch = 0 : i64, scratch_operands = 2 : i64, tpu.core_type = #tpu.core_type<tc>, window_params = [{transform_indices = @transform_0, window_bounds = array<i64: 128, 1024>}, {pipeline_mode = #tpu.pipeline_mode<synchronous>, transform_indices = @transform_1, window_bounds = array<i64: 1024, 256>}, {pipeline_mode = #tpu.pipeline_mode<synchronous>, transform_indices = @transform_2, window_bounds = array<i64: 2, 256>}, {pipeline_mode = #tpu.pipeline_mode<synchronous>, transform_indices = @transform_3, window_bounds = array<i64: 256, 64>}, {pipeline_mode = #tpu.pipeline_mode<synchronous>, transform_indices = @transform_4, window_bounds = array<i64: 3, 64>}, {transform_indices = @transform_5, window_bounds = array<i64: 1, 1>}, {pipeline_mode = #tpu.pipeline_mode<synchronous>, transform_indices = @transform_6, window_bounds = array<i64: 256, 1>}]} {
    %c0_i32 = arith.constant 0 : i32
    %0 = arith.cmpi eq, %arg0, %c0_i32 : i32
    %1 = arith.extui %0 : i1 to i32
    %c0_i32_0 = arith.constant 0 : i32
    %2 = arith.cmpi ne, %1, %c0_i32_0 : i32
    scf.if %2 {
      %cst_15 = arith.constant 0.000000e+00 : f32
      %25 = vector.broadcast %cst_15 : f32 to vector<2x256xf32>
      %c0_16 = arith.constant 0 : index
      %c0_17 = arith.constant 0 : index
      %26 = vector.load %arg9[%c0_16, %c0_17] : memref<2x256xf32, #tpu.memory_space<vmem>>, vector<2x256xf32>
      tpu.vector_store %arg9[%c0_16, %c0_17], %25 {strides = array<i32>} : memref<2x256xf32, #tpu.memory_space<vmem>>, vector<2x256xf32>,
    } else {
    }
    %c0 = arith.constant 0 : index
    %c0_1 = arith.constant 0 : index
    %3 = vector.load %arg1[%c0, %c0_1] : memref<128x1024xf32, #tpu.memory_space<vmem>>, vector<128x1024xf32>
    %4 = arith.truncf %3 : vector<128x1024xf32> to vector<128x1024xbf16>
    %c0_2 = arith.constant 0 : index
    %c0_3 = arith.constant 0 : index
    %5 = vector.load %arg2[%c0_2, %c0_3] : memref<1024x256xbf16, #tpu.memory_space<vmem>>, vector<1024x256xbf16>
    %cst = arith.constant dense<0.000000e+00> : vector<128x256xf32>
    %6 = tpu.matmul %4, %5, %cst {dimension_numbers = #tpu.dot_dimension_numbers<[1], [0], [0], [1], [0, 0, 1, 1], [], []>} : vector<128x1024xbf16>, vector<1024x256xbf16>, vector<128x256xf32> -> vector<128x256xf32>
    %c128_i32 = arith.constant 128 : i32
    %7 = arith.muli %arg0, %c128_i32 : i32
    %8 = tpu.assume_multiple %7, 128 : i32
    %9 = arith.index_cast %8 : i32 to index
    %c0_4 = arith.constant 0 : index
    %10 = vector.load %arg8[%9, %c0_4] : memref<256x256xf32, #tpu.memory_space<vmem>>, vector<128x256xf32>
    tpu.vector_store %arg8[%9, %c0_4], %6 {strides = array<i32>} : memref<256x256xf32, #tpu.memory_space<vmem>>, vector<128x256xf32>,
    %c0_5 = arith.constant 0 : index
    %c0_6 = arith.constant 0 : index
    %11 = vector.load %arg9[%c0_5, %c0_6] : memref<2x256xf32, #tpu.memory_space<vmem>>, vector<1x256xf32>
    %cst_7 = arith.constant dense<0.000000e+00> : vector<256xf32>
    %12 = vector.multi_reduction <add>, %6, %cst_7 [0] : vector<128x256xf32> to vector<256xf32>
    %13 = vector.shape_cast %12 : vector<256xf32> to vector<1x256xf32>
    %14 = arith.addf %11, %13 : vector<1x256xf32>
    %c0_8 = arith.constant 0 : index
    %c0_9 = arith.constant 0 : index
    %15 = vector.load %arg9[%c0_8, %c0_9] : memref<2x256xf32, #tpu.memory_space<vmem>>, vector<1x256xf32>
    tpu.vector_store %arg9[%c0_8, %c0_9], %14 {strides = array<i32>} : memref<2x256xf32, #tpu.memory_space<vmem>>, vector<1x256xf32>,
    %c1 = arith.constant 1 : index
    %c0_10 = arith.constant 0 : index
    %16 = vector.load %arg9[%c1, %c0_10] : memref<2x256xf32, #tpu.memory_space<vmem>>, vector<1x256xf32>
    %17 = arith.mulf %6, %6 : vector<128x256xf32>
    %cst_11 = arith.constant dense<0.000000e+00> : vector<256xf32>
    %18 = vector.multi_reduction <add>, %17, %cst_11 [0] : vector<128x256xf32> to vector<256xf32>
    %19 = vector.shape_cast %18 : vector<256xf32> to vector<1x256xf32>
    %20 = arith.addf %16, %19 : vector<1x256xf32>
    %c1_12 = arith.constant 1 : index
    %c0_13 = arith.constant 0 : index
    %21 = vector.load %arg9[%c1_12, %c0_13] : memref<2x256xf32, #tpu.memory_space<vmem>>, vector<1x256xf32>
    tpu.vector_store %arg9[%c1_12, %c0_13], %20 {strides = array<i32>} : memref<2x256xf32, #tpu.memory_space<vmem>>, vector<1x256xf32>,
    %c1_i32 = arith.constant 1 : i32
    %22 = arith.cmpi eq, %arg0, %c1_i32 : i32
    %23 = arith.extui %22 : i1 to i32
    %c0_i32_14 = arith.constant 0 : i32
    %24 = arith.cmpi ne, %23, %c0_i32_14 : i32
    scf.if %24 {
      %c0_15 = arith.constant 0 : index
      %c0_16 = arith.constant 0 : index
      %25 = vector.load %arg9[%c0_15, %c0_16] : memref<2x256xf32, #tpu.memory_space<vmem>>, vector<1x256xf32>
      %cst_17 = arith.constant 3.906250e-03 : f32
      %26 = vector.broadcast %cst_17 : f32 to vector<1x256xf32>
      %27 = arith.mulf %25, %26 : vector<1x256xf32>
      %c1_18 = arith.constant 1 : index
      %c0_19 = arith.constant 0 : index
      %28 = vector.load %arg9[%c1_18, %c0_19] : memref<2x256xf32, #tpu.memory_space<vmem>>, vector<1x256xf32>
      %cst_20 = arith.constant 3.906250e-03 : f32
      %29 = vector.broadcast %cst_20 : f32 to vector<1x256xf32>
      %30 = arith.mulf %28, %29 : vector<1x256xf32>
      %31 = arith.mulf %27, %27 : vector<1x256xf32>
      %32 = arith.subf %30, %31 : vector<1x256xf32>
      %cst_21 = arith.constant 0.000000e+00 : f32
      %33 = vector.broadcast %cst_21 : f32 to vector<1x256xf32>
      %34 = arith.maximumf %32, %33 : vector<1x256xf32>
      %cst_22 = arith.constant 9.99999974E-6 : f32
      %35 = vector.broadcast %cst_22 : f32 to vector<1x256xf32>
      %36 = arith.addf %34, %35 : vector<1x256xf32>
      %37 = math.rsqrt %36 : vector<1x256xf32>
      %c0_23 = arith.constant 0 : index
      %c0_24 = arith.constant 0 : index
      %38 = vector.load %arg3[%c0_23, %c0_24] : memref<2x256xf32, #tpu.memory_space<vmem>>, vector<1x256xf32>
      %39 = arith.mulf %37, %38 : vector<1x256xf32>
      %c1_25 = arith.constant 1 : index
      %c0_26 = arith.constant 0 : index
      %40 = vector.load %arg3[%c1_25, %c0_26] : memref<2x256xf32, #tpu.memory_space<vmem>>, vector<1x256xf32>
      %41 = arith.mulf %27, %39 : vector<1x256xf32>
      %42 = arith.subf %40, %41 : vector<1x256xf32>
      %c0_27 = arith.constant 0 : index
      %c0_28 = arith.constant 0 : index
      %43 = vector.load %arg8[%c0_27, %c0_28] : memref<256x256xf32, #tpu.memory_space<vmem>>, vector<256x256xf32>
      %44 = vector.broadcast %39 : vector<1x256xf32> to vector<256x256xf32>
      %45 = arith.mulf %43, %44 : vector<256x256xf32>
      %46 = vector.broadcast %42 : vector<1x256xf32> to vector<256x256xf32>
      %47 = arith.addf %45, %46 : vector<256x256xf32>
      %cst_29 = arith.constant 0.000000e+00 : f32
      %48 = vector.broadcast %cst_29 : f32 to vector<256x256xf32>
      %49 = arith.maximumf %47, %48 : vector<256x256xf32>
      %50 = arith.truncf %49 : vector<256x256xf32> to vector<256x256xbf16>
      %c0_30 = arith.constant 0 : index
      %c0_31 = arith.constant 0 : index
      %51 = vector.load %arg4[%c0_30, %c0_31] : memref<256x64xbf16, #tpu.memory_space<vmem>>, vector<256x64xbf16>
      %cst_32 = arith.constant dense<0.000000e+00> : vector<256x64xf32>
      %52 = tpu.matmul %50, %51, %cst_32 {dimension_numbers = #tpu.dot_dimension_numbers<[1], [0], [0], [1], [0, 0, 1, 1], [], []>} : vector<256x256xbf16>, vector<256x64xbf16>, vector<256x64xf32> -> vector<256x64xf32>
      %cst_33 = arith.constant dense<0.000000e+00> : vector<64xf32>
      %53 = vector.multi_reduction <add>, %52, %cst_33 [0] : vector<256x64xf32> to vector<64xf32>
      %54 = vector.shape_cast %53 : vector<64xf32> to vector<1x64xf32>
      %cst_34 = arith.constant 2.560000e+02 : f32
      %55 = vector.broadcast %cst_34 : f32 to vector<1x64xf32>
      %56 = arith.divf %54, %55 : vector<1x64xf32>
      %57 = arith.mulf %52, %52 : vector<256x64xf32>
      %cst_35 = arith.constant dense<0.000000e+00> : vector<64xf32>
      %58 = vector.multi_reduction <add>, %57, %cst_35 [0] : vector<256x64xf32> to vector<64xf32>
      %59 = vector.shape_cast %58 : vector<64xf32> to vector<1x64xf32>
      %cst_36 = arith.constant 2.560000e+02 : f32
      %60 = vector.broadcast %cst_36 : f32 to vector<1x64xf32>
      %61 = arith.divf %59, %60 : vector<1x64xf32>
      %62 = arith.mulf %56, %56 : vector<1x64xf32>
      %63 = arith.subf %61, %62 : vector<1x64xf32>
      %cst_37 = arith.constant 0.000000e+00 : f32
      %64 = vector.broadcast %cst_37 : f32 to vector<1x64xf32>
      %65 = arith.maximumf %63, %64 : vector<1x64xf32>
      %cst_38 = arith.constant 9.99999974E-6 : f32
      %66 = vector.broadcast %cst_38 : f32 to vector<1x64xf32>
      %67 = arith.addf %65, %66 : vector<1x64xf32>
      %68 = math.rsqrt %67 : vector<1x64xf32>
      %c0_39 = arith.constant 0 : index
      %c0_40 = arith.constant 0 : index
      %69 = vector.load %arg5[%c0_39, %c0_40] : memref<3x64xf32, #tpu.memory_space<vmem>>, vector<1x64xf32>
      %70 = arith.mulf %68, %69 : vector<1x64xf32>
      %c1_41 = arith.constant 1 : index
      %c0_42 = arith.constant 0 : index
      %71 = vector.load %arg5[%c1_41, %c0_42] : memref<3x64xf32, #tpu.memory_space<vmem>>, vector<1x64xf32>
      %72 = arith.mulf %56, %70 : vector<1x64xf32>
      %73 = arith.subf %71, %72 : vector<1x64xf32>
      %74 = vector.broadcast %70 : vector<1x64xf32> to vector<256x64xf32>
      %75 = arith.mulf %52, %74 : vector<256x64xf32>
      %76 = vector.broadcast %73 : vector<1x64xf32> to vector<256x64xf32>
      %77 = arith.addf %75, %76 : vector<256x64xf32>
      %cst_43 = arith.constant 0.000000e+00 : f32
      %78 = vector.broadcast %cst_43 : f32 to vector<256x64xf32>
      %79 = arith.maximumf %77, %78 : vector<256x64xf32>
      %c2 = arith.constant 2 : index
      %c0_44 = arith.constant 0 : index
      %80 = vector.load %arg5[%c2, %c0_44] : memref<3x64xf32, #tpu.memory_space<vmem>>, vector<1x64xf32>
      %81 = vector.broadcast %80 : vector<1x64xf32> to vector<256x64xf32>
      %82 = arith.mulf %79, %81 : vector<256x64xf32>
      %cst_45 = arith.constant dense<0.000000e+00> : vector<256xf32>
      %83 = vector.multi_reduction <add>, %82, %cst_45 [1] : vector<256x64xf32> to vector<256xf32>
      %84 = vector.shape_cast %83 : vector<256xf32> to vector<256x1xf32>
      %c0_46 = arith.constant 0 : index
      %c0_47 = arith.constant 0 : index
      %85 = memref.load %arg6[%c0_46, %c0_47] : memref<1x1xf32, #tpu.memory_space<smem>>
      %86 = vector.broadcast %85 : f32 to vector<256x1xf32>
      %87 = arith.addf %84, %86 : vector<256x1xf32>
      %c0_48 = arith.constant 0 : index
      %c0_49 = arith.constant 0 : index
      %88 = vector.load %arg7[%c0_48, %c0_49] : memref<256x1xf32, #tpu.memory_space<vmem>>, vector<256x1xf32>
      tpu.vector_store %arg7[%c0_48, %c0_49], %87 {strides = array<i32>} : memref<256x1xf32, #tpu.memory_space<vmem>>, vector<256x1xf32>,
    } else {
    }
    return
  }
  func.func @transform_0(%arg0: i32) -> (i32, i32) {
    %c0_i32 = arith.constant 0 : i32
    %c0_i32_0 = arith.constant 0 : i32
    return %arg0, %c0_i32 : i32, i32
  }
  func.func @transform_1(%arg0: i32) -> (i32, i32) {
    %c0_i32 = arith.constant 0 : i32
    %c0_i32_0 = arith.constant 0 : i32
    %c0_i32_1 = arith.constant 0 : i32
    return %c0_i32, %c0_i32_0 : i32, i32
  }
  func.func @transform_2(%arg0: i32) -> (i32, i32) {
    %c0_i32 = arith.constant 0 : i32
    %c0_i32_0 = arith.constant 0 : i32
    %c0_i32_1 = arith.constant 0 : i32
    return %c0_i32, %c0_i32_0 : i32, i32
  }
  func.func @transform_3(%arg0: i32) -> (i32, i32) {
    %c0_i32 = arith.constant 0 : i32
    %c0_i32_0 = arith.constant 0 : i32
    %c0_i32_1 = arith.constant 0 : i32
    return %c0_i32, %c0_i32_0 : i32, i32
  }
  func.func @transform_4(%arg0: i32) -> (i32, i32) {
    %c0_i32 = arith.constant 0 : i32
    %c0_i32_0 = arith.constant 0 : i32
    %c0_i32_1 = arith.constant 0 : i32
    return %c0_i32, %c0_i32_0 : i32, i32
  }
  func.func @transform_5(%arg0: i32) -> (i32, i32) {
    %c0_i32 = arith.constant 0 : i32
    %c0_i32_0 = arith.constant 0 : i32
    %c0_i32_1 = arith.constant 0 : i32
    return %c0_i32, %c0_i32_0 : i32, i32
  }
  func.func @transform_6(%arg0: i32) -> (i32, i32) {
    %c0_i32 = arith.constant 0 : i32
    %c0_i32_0 = arith.constant 0 : i32
    %c0_i32_1 = arith.constant 0 : i32
    return %c0_i32, %c0_i32_0 : i32, i32
  }
}

</mosaic_0001>

<bundles_post_ra>
// kernel: xgan_latent_classifier.1
= control target key start
LH: loop header
LB: loop body
LE: loop exit
PB: predicated region body
PF: predicated region fallthrough
CT: control target
= control target key end

     0   :  { %s5797_s0 = inlined_call_operand.hbm [shape: f32[256,1024], index: 0, kind: input, shape index: {}]   ;;  %s5798_s1 = inlined_call_operand.hbm [shape: bf16[1024,256], index: 1, kind: input, shape index: {}]   ;;  %s5799_s2 = inlined_call_operand.vmem [shape: f32[2,256], index: 2, kind: input, shape index: {}]   ;;  %s5800_s3 = inlined_call_operand.vmem [shape: bf16[256,64], index: 3, kind: input, shape index: {}]   ;;  %s5801_s4 = inlined_call_operand.vmem [shape: f32[3,64], index: 4, kind: input, shape index: {}]   ;;  %s5802_s5 = inlined_call_operand.<no memory space> [shape: f32[1,1], index: 5, kind: input, shape index: {}]   ;;  %s5803_s6 = inlined_call_operand.vmem [shape: f32[256,1], index: 6, kind: output, shape index: {}]  }
   0x1   :  { %11 = sst [smem:[#allocation4]] %s5802_s5 }
   0x2   :  { %12 = vsyncpa [#allocation6], 0 }
   0x3   :  { %14 = vsyncpa [#allocation6 + $0x1], 0 }
   0x4   :  { %15 = vsyncpa [#allocation8], 0  ;;  %s4347_s23 = smov 0   ;;  %s4349_s24 = smov 0  }
   0x5   :  { %s4351_s25 = smov 0   ;;  %s4353_s26 = smov 0  }
   0x6 LB: > { %s4366_s5 = sadd.s32 4294967295, %s4300_s26   ;;  %p41_p0 = scmp.ne.s32.totalorder %s4292_s24, %s4288_s23  ;;  %s4300_s26 = sphi %s4353_s26, %s5918_s26   ;;  %s4296_s25 = sphi %s4351_s25, %s5917_s25   ;;  %s4292_s24 = sphi %s4349_s24, %s5916_s24   ;;  %s4288_s23 = sphi %s4347_s23, %s5915_s23  }
   0x7   : > { %p42_p1 = scmp.eq.s32.totalorder %s4366_s5, 0  ;;  %p3382_p2 = scmp.ge.s32.totalorder %s4300_s26, 1 }
   0x8   : > { %p178_p3 = scmp.lt.s32.totalorder %s4300_s26, 3  ;;  %p3383_p4 = scmp.ne.s32.totalorder %s4366_s5, 0 }
   0x9   : > { %p4375_p5 = por %p42_p1, %p41_p0  ;;  %s189_s30 = sshll.u32 %s5798_s1, 4  ;;  %s190_s30 = int_to_ptr.hbm [resolvable:$true] %s189_s30 }
   0xa   : > { %p4382_p6 = pnand %p3382_p2, %p178_p3  ;;  %s4302_s8 = smov [#allocation7]  }
   0xb   : > { %s191_s9 = sshll.u32 %s4302_s8, 4  ;;  %s4391_s10 = sadd.s32 1, %s4300_s26   ;;  %s192_s9 = int_to_ptr.vmem [resolvable:$true] %s191_s9 }
   0xc   : > { %p4145_p7 = pneg %p4382_p6  ;;  %s4303_s11 = smov 128  }
   0xd   : > { %s4304_s12 = smov 8   ;;  %s25_s13 = ssub.s32 %s4300_s26, %s4391_s10 }
   0xe   : > { %p4146_p8 = pnand %p4145_p7, %p42_p1  ;;  %s28_s14 = sadd.s32 1, %s4296_s25 }
   0xf   : > { %p26_p9 = scmp.eq.s32.totalorder %s25_s13, 0  ;;  %p35_p10 = scmp.ne.s32.totalorder %s4296_s25, %s4292_s24 }
  0x10   : > { %4148 = dma.hbm_to_vmem [thread:$0]  (!%p4146_p8), %s190_s30, 16384, %s192_s9, [#allocation8], %s4303_s11, %s4303_s11, %s4304_s12  }
  0x11   : > { %p36_p11 = scmp.eq.s32.totalorder %s4300_s26, 0  ;;  %p4154_p12 = scmp.lt.s32.totalorder %s4300_s26, 2 }
  0x12   : > { %s4401_s15 = scalar_select %p26_p9, %s4296_s25, %s28_s14  }
  0x13   : > { %p37_p13 = por %p36_p11, %p35_p10  ;;  %s217_s16 = sand.u32 1, %s4296_s25  }
  0x14   : > { %s3385_s17 = sshll.u32 %s217_s16, 10  ;;  %s3977_s18 = sshll.u32 %s4300_s26, 10 }
  0x15   : > { %s227_s21 = scalar_lea.hbm %s5797_s0, %s3977_s18  ;;  %s221_s22 = scalar_lea.vmem [#allocation5], %s3385_s17 }
  0x16   : > { %s230_s23 = sshll.u32 %s221_s22, 4  ;;  %s228_s28 = sshll.u32 %s227_s21, 4  ;;  %s231_s23 = int_to_ptr.vmem [resolvable:$true] %s230_s23  ;;  %s229_s28 = int_to_ptr.hbm [resolvable:$true] %s228_s28 }
  0x17   : > { %p4408_p0 = pnand %p4154_p12, %p37_p13  ;;  %s218_s30 = scalar_lea.sflag [#allocation6], %s217_s16 }
  0x18   : > { %s4232_s8 = sshra.s32 %s229_s28, 4  ;;  %s4239_s12 = scalar_lea.hbm %s5797_s0, 2048  ;;  %s4233_s8 = int_to_ptr.hbm [resolvable:$true] %s4232_s8 }
  0x19   : > { %s4234_s9 = scalar_lea.hbm %s4233_s8, 1024  ;;  %p4236_p3 = pneg %p4408_p0 }
  0x1a   : > { %p4235_p2 = scmp.ne.s32.totalorder %s4233_s8, %s4234_s9  ;;  %p4240_p9 = scmp.lt.s32.totalorder %s4233_s8, %s5797_s0 }
  0x1b   : > { %p4241_p10 = scmp.lt.s32.totalorder %s4239_s12, %s4234_s9 }
  0x1c   : > { %p4237_p7 = pnand %p4236_p3, %p4235_p2 }
  0x1d   : > { %p4242_p11 = por %p4241_p10, %p4240_p9 }
  0x1e   : > { %p4238_p8 = pneg %p4237_p7 }
  0x20   : > { %p4243_p12 = pnand %p4242_p11, %p4238_p8 }
  0x22   : > { %4246 = shalt.err (!%p4243_p12)
}
  0x23   : > { %s4305_s16 = smov 1024   ;;  %s4306_s17 = smov 64  }
  0x24   : > { %4152 = dma.hbm_to_vmem [thread:$0]  (!%p4408_p0), %s229_s28, 16384, %s231_s23, %s218_s30, %s4305_s16, %s4305_s16, %s4306_s17  }
  0x25   : > { %242 = sbr.rel (%p4382_p6) target bundleno = 1338 (0x53a), region = 44 }
  0x2a   : > { %s244_s18 = sand.u32 1, %s4292_s24  }
  0x2b   : > { %s3390_s19 = sshll.u32 %s244_s18, 10  ;;  %s245_s20 = scalar_lea.sflag [#allocation6], %s244_s18 }
  0x2c   : > { %s4425_s21 = scalar_lea.vmem [#allocation5], %s3390_s19 }
  0x2d   : > { %4279 = dma.done.wait (%p4375_p5), %s245_s20, 16384  }
  0x2e   : > { %4281 = vsyncadd (%p4375_p5), %s245_s20, 4294950912 }
  0x2f   : > { %4283 = dma.done.wait (%p42_p1), [#allocation8], 16384  }
  0x30   : > { %4285 = vsyncadd (%p42_p1), [#allocation8], 4294950912  ;;  %282 = sbr.rel (%p3383_p4) target bundleno = 55 (0x37), region = 56 }
  0x35   : > { %v4307_v0 = vmov 0.0  }
  0x36   : > { %283 = vst [vmem:[#allocation3] sm:$0xf] %v4307_v0 }
  0x37 PF: > { %v3451_v1 = vld [vmem:[#allocation7 + $0x70] sm:$0xf]  ;;  %v3993_v2 = vld [vmem:[#allocation7 + $0x74] sm:$0xf0]  ;;  %v3443_v12 = vld [vmem:[#allocation7 + $0x60] sm:$0xf] }
  0x38   : > { %v3515_v3 = vld [vmem:[#allocation7 + $0xf0] sm:$0xf]  ;;  %v3452_v4 = vor.u32 %v3993_v2, %v3451_v1  ;;  %v4009_v5 = vld [vmem:[#allocation7 + $0xf4] sm:$0xf0]  ;;  %v3991_v14 = vld [vmem:[#allocation7 + $0x64] sm:$0xf0] }
  0x39   : > { %v3579_v6 = vld [vmem:[#allocation7 + $0x170] sm:$0xf]  ;;  %v4025_v7 = vld [vmem:[#allocation7 + $0x174] sm:$0xf0]  ;;  %v3516_v8 = vor.u32 %v4009_v5, %v3515_v3  ;;  %v3507_v15 = vld [vmem:[#allocation7 + $0xe0] sm:$0xf]  ;;  %v3444_v17 = vor.u32 %v3991_v14, %v3443_v12 }
  0x3a   : > { %v3580_v9 = vor.u32 %v4025_v7, %v3579_v6  ;;  %v3643_v10 = vld [vmem:[#allocation7 + $0x1f0] sm:$0xf]  ;;  %v4041_v11 = vld [vmem:[#allocation7 + $0x1f4] sm:$0xf0]  ;;  %1244 = vmatpush.bf16.msra.mxu0 %v3452_v4  ;;  %v4007_v16 = vld [vmem:[#allocation7 + $0xe4] sm:$0xf0] }
  0x3b   : > { %v3644_v13 = vor.u32 %v4041_v11, %v3643_v10  ;;  %1293 = vmatpush.bf16.msra.mxu1 %v3516_v8  ;;  %v3508_v18 = vor.u32 %v4007_v16, %v3507_v15  ;;  %v3571_v19 = vld [vmem:[#allocation7 + $0x160] sm:$0xf]  ;;  %v4023_v20 = vld [vmem:[#allocation7 + $0x164] sm:$0xf0]  ;;  %v3435_v24 = vld [vmem:[#allocation7 + $0x50] sm:$0xf] }
  0x3c   : > { %1342 = vmatpush.bf16.msra.mxu2 %v3580_v9  ;;  %v3635_v21 = vld [vmem:[#allocation7 + $0x1e0] sm:$0xf]  ;;  %v3572_v22 = vor.u32 %v4023_v20, %v3571_v19  ;;  %v4039_v23 = vld [vmem:[#allocation7 + $0x1e4] sm:$0xf0]  ;;  %v3989_v25 = vld [vmem:[#allocation7 + $0x54] sm:$0xf0] }
  0x3d   : > { %1391 = vmatpush.bf16.msra.mxu3 %v3644_v13  ;;  %v3636_v26 = vor.u32 %v4039_v23, %v3635_v21  ;;  %v3499_v27 = vld [vmem:[#allocation7 + $0xd0] sm:$0xf]  ;;  %v4005_v28 = vld [vmem:[#allocation7 + $0xd4] sm:$0xf0]  ;;  %v3436_v30 = vor.u32 %v3989_v25, %v3435_v24  ;;  %v3427_v36 = vld [vmem:[#allocation7 + $0x40] sm:$0xf] }
  0x3e   : > { %v3563_v29 = vld [vmem:[#allocation7 + $0x150] sm:$0xf]  ;;  %1245 = vmatpush.bf16.msra.mxu0 %v3444_v17  ;;  %v4021_v31 = vld [vmem:[#allocation7 + $0x154] sm:$0xf0]  ;;  %v3500_v34 = vor.u32 %v4005_v28, %v3499_v27  ;;  %v3987_v37 = vld [vmem:[#allocation7 + $0x44] sm:$0xf0] }
  0x3f   : > { %v3627_v32 = vld [vmem:[#allocation7 + $0x1d0] sm:$0xf]  ;;  %v4037_v33 = vld [vmem:[#allocation7 + $0x1d4] sm:$0xf0]  ;;  %1294 = vmatpush.bf16.msra.mxu1 %v3508_v18  ;;  %v3564_v35 = vor.u32 %v4021_v31, %v3563_v29  ;;  %v3491_v38 = vld [vmem:[#allocation7 + $0xc0] sm:$0xf]  ;;  %v3428_v45 = vor.u32 %v3987_v37, %v3427_v36 }
  0x40   : > { %1343 = vmatpush.bf16.msra.mxu2 %v3572_v22  ;;  %v3628_v39 = vor.u32 %v4037_v33, %v3627_v32  ;;  %v4003_v40 = vld [vmem:[#allocation7 + $0xc4] sm:$0xf0]  ;;  %v3555_v41 = vld [vmem:[#allocation7 + $0x140] sm:$0xf]  ;;  %v3419_v48 = vld [vmem:[#allocation7 + $0x30] sm:$0xf] }
  0x41   : > { %1392 = vmatpush.bf16.msra.mxu3 %v3636_v26  ;;  %v4019_v42 = vld [vmem:[#allocation7 + $0x144] sm:$0xf0]  ;;  %v3619_v43 = vld [vmem:[#allocation7 + $0x1c0] sm:$0xf]  ;;  %v3492_v46 = vor.u32 %v4003_v40, %v3491_v38  ;;  %v3985_v49 = vld [vmem:[#allocation7 + $0x34] sm:$0xf0] }
  0x42   : > { %v4035_v44 = vld [vmem:[#allocation7 + $0x1c4] sm:$0xf0]  ;;  %1246 = vmatpush.bf16.msra.mxu0 %v3436_v30  ;;  %v3556_v47 = vor.u32 %v4019_v42, %v3555_v41  ;;  %v3483_v50 = vld [vmem:[#allocation7 + $0xb0] sm:$0xf]  ;;  %v4001_v52 = vld [vmem:[#allocation7 + $0xb4] sm:$0xf0]  ;;  %v3420_v57 = vor.u32 %v3985_v49, %v3419_v48 }
  0x43   : > { %1295 = vmatpush.bf16.msra.mxu1 %v3500_v34  ;;  %v3620_v51 = vor.u32 %v4035_v44, %v3619_v43  ;;  %v3547_v53 = vld [vmem:[#allocation7 + $0x130] sm:$0xf]  ;;  %v4017_v54 = vld [vmem:[#allocation7 + $0x134] sm:$0xf0]  ;;  %v3484_v58 = vor.u32 %v4001_v52, %v3483_v50  ;;  %v3411_v60 = vld [vmem:[#allocation7 + $0x20] sm:$0xf] }
  0x44   : > { %1344 = vmatpush.bf16.msra.mxu2 %v3564_v35  ;;  %v3611_v55 = vld [vmem:[#allocation7 + $0x1b0] sm:$0xf]  ;;  %v4033_v56 = vld [vmem:[#allocation7 + $0x1b4] sm:$0xf0]  ;;  %v3548_v59 = vor.u32 %v4017_v54, %v3547_v53  ;;  %v3983_v61 = vld [vmem:[#allocation7 + $0x24] sm:$0xf0] }
  0x45   : > { %1393 = vmatpush.bf16.msra.mxu3 %v3628_v39  ;;  %v3475_v62 = vld [vmem:[#allocation7 + $0xa0] sm:$0xf]  ;;  %v3612_v63 = vor.u32 %v4033_v56, %v3611_v55  ;;  %v3999_v0 = vld [vmem:[#allocation7 + $0xa4] sm:$0xf0]  ;;  %v3412_v5 = vor.u32 %v3983_v61, %v3411_v60  ;;  %v3403_v8 = vld [vmem:[#allocation7 + $0x10] sm:$0xf] }
  0x46   : > { %1247 = vmatpush.bf16.msra.mxu0 %v3428_v45  ;;  %v3539_v1 = vld [vmem:[#allocation7 + $0x120] sm:$0xf]  ;;  %v4015_v2 = vld [vmem:[#allocation7 + $0x124] sm:$0xf0]  ;;  %v3476_v6 = vor.u32 %v3999_v0, %v3475_v62  ;;  %v3981_v9 = vld [vmem:[#allocation7 + $0x14] sm:$0xf0] }
  0x47   : > { %1296 = vmatpush.bf16.msra.mxu1 %v3492_v46  ;;  %v3603_v3 = vld [vmem:[#allocation7 + $0x1a0] sm:$0xf]  ;;  %v4031_v4 = vld [vmem:[#allocation7 + $0x1a4] sm:$0xf0]  ;;  %v3540_v7 = vor.u32 %v4015_v2, %v3539_v1  ;;  %v3467_v10 = vld [vmem:[#allocation7 + $0x90] sm:$0xf]  ;;  %v3404_v18 = vor.u32 %v3981_v9, %v3403_v8 }
  0x48   : > { %1345 = vmatpush.bf16.msra.mxu2 %v3556_v47  ;;  %v3604_v11 = vor.u32 %v4031_v4, %v3603_v3  ;;  %v3997_v12 = vld [vmem:[#allocation7 + $0x94] sm:$0xf0]  ;;  %v3531_v13 = vld [vmem:[#allocation7 + $0x110] sm:$0xf]  ;;  %v3395_v17 = vld [vmem:[#allocation7] sm:$0xf] }
  0x49   : > { %1394 = vmatpush.bf16.msra.mxu3 %v3620_v51  ;;  %v4013_v14 = vld [vmem:[#allocation7 + $0x114] sm:$0xf0]  ;;  %v3595_v15 = vld [vmem:[#allocation7 + $0x190] sm:$0xf]  ;;  %v3979_v19 = vld [vmem:[#allocation7 + $0x4] sm:$0xf0]  ;;  %v3468_v22 = vor.u32 %v3997_v12, %v3467_v10 }
  0x4a   : > { %1248 = vmatpush.bf16.msra.mxu0 %v3420_v57  ;;  %v4029_v16 = vld [vmem:[#allocation7 + $0x194] sm:$0xf0]  ;;  %v3459_v20 = vld [vmem:[#allocation7 + $0x80] sm:$0xf]  ;;  %v3995_v21 = vld [vmem:[#allocation7 + $0x84] sm:$0xf0]  ;;  %v3532_v23 = vor.u32 %v4013_v14, %v3531_v13  ;;  %v3396_v35 = vor.u32 %v3979_v19, %v3395_v17 }
  0x4b   : > { %1297 = vmatpush.bf16.msra.mxu1 %v3484_v58  ;;  %v3523_v24 = vld [vmem:[#allocation7 + $0x100] sm:$0xf]  ;;  %v4011_v25 = vld [vmem:[#allocation7 + $0x104] sm:$0xf0]  ;;  %v3596_v27 = vor.u32 %v4029_v16, %v3595_v15  ;;  %v3835_v33 = vld [vmem:[#allocation7 + $0x370] sm:$0xf]  ;;  %v3460_v39 = vor.u32 %v3995_v21, %v3459_v20 }
  0x4c   : > { %1346 = vmatpush.bf16.msra.mxu2 %v3548_v59  ;;  %v3587_v26 = vld [vmem:[#allocation7 + $0x180] sm:$0xf]  ;;  %v4027_v28 = vld [vmem:[#allocation7 + $0x184] sm:$0xf0]  ;;  %v4089_v34 = vld [vmem:[#allocation7 + $0x374] sm:$0xf0]  ;;  %v3524_v40 = vor.u32 %v4011_v25, %v3523_v24 }
  0x4d   : > { %1395 = vmatpush.bf16.msra.mxu3 %v3612_v63  ;;  %v284_v29 = vld [vmem:[%s4425_s21] sm:$0xff]  ;;  %v285_v31 = vld [vmem:[%s4425_s21 + $0x8] sm:$0xff]  ;;  %v286_v36 = vld [vmem:[%s4425_s21 + $0x10] sm:$0xff]  ;;  %v3588_v44 = vor.u32 %v4027_v28, %v3587_v26  ;;  %v3836_v45 = vor.u32 %v4089_v34, %v3835_v33  ;;  %s3905_s27 = sshll.u32 %s4366_s5, 7  ;;  %vm2112_vm0 = vcmask 1040384   ;;  %p3908_p1 = scmp.ne.s32.totalorder %s4366_s5, 1 }
  0x4e   : > { %1249 = vmatpush.bf16.msra.mxu0 %v3412_v5  ;;  %v292_v30 = vld [vmem:[%s4425_s21 + $0x40] sm:$0xff]  ;;  %v293_v32 = vld [vmem:[%s4425_s21 + $0x48] sm:$0xff]  ;;  %v3899_v37 = vld [vmem:[#allocation7 + $0x3f0] sm:$0xf]  ;;  %s2029_s7 = sshra.s32 %s3905_s27, 3  ;;  %s3263_s28 = sld [smem:[#allocation4]] (!%p3908_p1) }
  0x4f   : > { %1298 = vmatpush.bf16.msra.mxu1 %v3476_v6  ;;  %v4105_v38 = vld [vmem:[#allocation7 + $0x3f4] sm:$0xf0]  ;;  %v294_v41 = vld [vmem:[%s4425_s21 + $0x50] sm:$0xff]  ;;  %v4445_v49 = vpack.c.bf16 %v292_v30, %v284_v29  ;;  %v3827_v52 = vld [vmem:[#allocation7 + $0x360] sm:$0xf]  ;;  %v4447_v54 = vpack.c.bf16 %v293_v32, %v285_v31  ;;  %s4106_s22 = sshll.u32 %s2029_s7, 4 }
  0x50   : > { %1347 = vmatpush.bf16.msra.mxu2 %v3540_v7  ;;  %v287_v42 = vld [vmem:[%s4425_s21 + $0x18] sm:$0xff]  ;;  %v3707_v46 = vld [vmem:[#allocation7 + $0x270] sm:$0xf]  ;;  %v3900_v50 = vor.u32 %v4105_v38, %v3899_v37  ;;  %v4087_v53 = vld [vmem:[#allocation7 + $0x364] sm:$0xf0]  ;;  %v4449_v55 = vpack.c.bf16 %v294_v41, %v286_v36  ;;  %s4796_s23 = scalar_lea.vmem [#allocation2], %s4106_s22 }
  0x51   : > { %1396 = vmatpush.bf16.msra.mxu3 %v3604_v11  ;;  %v295_v43 = vld [vmem:[%s4425_s21 + $0x58] sm:$0xff]  ;;  %v3771_v48 = vld [vmem:[#allocation7 + $0x2f0] sm:$0xf]  ;;  %v3891_v56 = vld [vmem:[#allocation7 + $0x3e0] sm:$0xf]  ;;  %v3828_v61 = vor.u32 %v4087_v53, %v3827_v52 }
  0x52   : > { %1250 = vmatpush.bf16.msra.mxu0 %v3404_v18  ;;  %v4057_v47 = vld [vmem:[#allocation7 + $0x274] sm:$0xf0]  ;;  %v4103_v57 = vld [vmem:[#allocation7 + $0x3e4] sm:$0xf0]  ;;  %v4451_v58 = vpack.c.bf16 %v295_v43, %v287_v42  ;;  %v3699_v62 = vld [vmem:[#allocation7 + $0x260] sm:$0xf] }
  0x53   : > { %1299 = vmatpush.bf16.msra.mxu1 %v3468_v22  ;;  %v4073_v51 = vld [vmem:[#allocation7 + $0x2f4] sm:$0xf0]  ;;  %v3708_v59 = vor.u32 %v4057_v47, %v3707_v46  ;;  %v4055_v63 = vld [vmem:[#allocation7 + $0x264] sm:$0xf0]  ;;  %v3892_v0 = vor.u32 %v4103_v57, %v3891_v56  ;;  %v3763_v1 = vld [vmem:[#allocation7 + $0x2e0] sm:$0xf] }
  0x54   : > { %1348 = vmatpush.bf16.msra.mxu2 %v3532_v23  ;;  %v3772_v60 = vor.u32 %v4073_v51, %v3771_v48  ;;  %v4071_v2 = vld [vmem:[#allocation7 + $0x2e4] sm:$0xf0]  ;;  %v3700_v3 = vor.u32 %v4055_v63, %v3699_v62  ;;  %v3819_v4 = vld [vmem:[#allocation7 + $0x350] sm:$0xf]  ;;  %v4085_v5 = vld [vmem:[#allocation7 + $0x354] sm:$0xf0] }
  0x55   : > { %1397 = vmatpush.bf16.msra.mxu3 %v3596_v27  ;;  %v3691_v6 = vld [vmem:[#allocation7 + $0x250] sm:$0xf]  ;;  %v3764_v7 = vor.u32 %v4071_v2, %v3763_v1  ;;  %v3820_v8 = vor.u32 %v4085_v5, %v3819_v4  ;;  %v4053_v9 = vld [vmem:[#allocation7 + $0x254] sm:$0xf0]  ;;  %v300_v17 = vld [vmem:[%s4425_s21 + $0x80] sm:$0xff] }
  0x56   : > { %1251 = vmatpush.bf16.msra.mxu0 %v3396_v35  ;;  %v3883_v10 = vld [vmem:[#allocation7 + $0x3d0] sm:$0xf]  ;;  %v4101_v11 = vld [vmem:[#allocation7 + $0x3d4] sm:$0xf0]  ;;  %v3692_v15 = vor.u32 %v4053_v9, %v3691_v6  ;;  %v308_v18 = vld [vmem:[%s4425_s21 + $0xc0] sm:$0xff] }
  0x57   : > { %1300 = vmatpush.bf16.msra.mxu1 %v3460_v39  ;;  %v3884_v12 = vor.u32 %v4101_v11, %v3883_v10  ;;  %v3755_v13 = vld [vmem:[#allocation7 + $0x2d0] sm:$0xf]  ;;  %v4069_v14 = vld [vmem:[#allocation7 + $0x2d4] sm:$0xf0]  ;;  %v301_v19 = vld [vmem:[%s4425_s21 + $0x88] sm:$0xff]  ;;  %v4465_v25 = vpack.c.bf16 %v308_v18, %v300_v17 }
  0x58   : > { %1349 = vmatpush.bf16.msra.mxu2 %v3524_v40  ;;  %v3756_v16 = vor.u32 %v4069_v14, %v3755_v13  ;;  %v309_v20 = vld [vmem:[%s4425_s21 + $0xc8] sm:$0xff]  ;;  %v302_v21 = vld [vmem:[%s4425_s21 + $0x90] sm:$0xff]  ;;  %v303_v23 = vld [vmem:[%s4425_s21 + $0x98] sm:$0xff] }
  0x59   : > { %1398 = vmatpush.bf16.msra.mxu3 %v3588_v44  ;;  %1252 = vmatmul.bf16.vlgmr.msra.gmra.mxu0 %v4445_v49  ;;  %v310_v22 = vld [vmem:[%s4425_s21 + $0xd0] sm:$0xff]  ;;  %v311_v24 = vld [vmem:[%s4425_s21 + $0xd8] sm:$0xff]  ;;  %v4467_v26 = vpack.c.bf16 %v309_v20, %v301_v19  ;;  %v3811_v29 = vld [vmem:[#allocation7 + $0x340] sm:$0xf] }
  0x5a   : > { %1301 = vmatmul.bf16.vlgmr.msra.gmra.mxu1 %v4447_v54  ;;  %1440 = vmatpush.bf16.msrb.mxu0 %v3708_v59  ;;  %v4469_v27 = vpack.c.bf16 %v310_v22, %v302_v21  ;;  %v4471_v28 = vpack.c.bf16 %v311_v24, %v303_v23  ;;  %v4083_v30 = vld [vmem:[#allocation7 + $0x344] sm:$0xf0]  ;;  %v3683_v31 = vld [vmem:[#allocation7 + $0x240] sm:$0xf]  ;;  %v326_v46 = vld [vmem:[%s4425_s21 + $0x150] sm:$0xff] }
  0x5b   : > { %1350 = vmatmul.bf16.vlgmr.msra.gmra.mxu2 %v4449_v55  ;;  %1489 = vmatpush.bf16.msrb.mxu1 %v3772_v60  ;;  %v3812_v32 = vor.u32 %v4083_v30, %v3811_v29  ;;  %v4051_v33 = vld [vmem:[#allocation7 + $0x244] sm:$0xf0]  ;;  %v3875_v34 = vld [vmem:[#allocation7 + $0x3c0] sm:$0xf]  ;;  %v319_v47 = vld [vmem:[%s4425_s21 + $0x118] sm:$0xff] }
  0x5c   : > { %1538 = vmatpush.bf16.msrb.mxu2 %v3836_v45  ;;  %1399 = vmatmul.bf16.vlgmr.msra.gmra.mxu3 %v4451_v58  ;;  %v4099_v35 = vld [vmem:[#allocation7 + $0x3c4] sm:$0xf0]  ;;  %v3684_v36 = vor.u32 %v4051_v33, %v3683_v31  ;;  %v3747_v38 = vld [vmem:[#allocation7 + $0x2c0] sm:$0xf]  ;;  %v318_v45 = vld [vmem:[%s4425_s21 + $0x110] sm:$0xff] }
  0x5d   : > { %1587 = vmatpush.bf16.msrb.mxu3 %v3900_v50  ;;  %v3876_v37 = vor.u32 %v4099_v35, %v3875_v34  ;;  %v4067_v39 = vld [vmem:[#allocation7 + $0x2c4] sm:$0xf0]  ;;  %v316_v41 = vld [vmem:[%s4425_s21 + $0x100] sm:$0xff]  ;;  %v327_v48 = vld [vmem:[%s4425_s21 + $0x158] sm:$0xff]  ;;  %v4489_v52 = vpack.c.bf16 %v326_v46, %v318_v45 }
  0x5e   : > { %1441 = vmatpush.bf16.msrb.mxu0 %v3700_v3  ;;  %v3748_v40 = vor.u32 %v4067_v39, %v3747_v38  ;;  %v324_v42 = vld [vmem:[%s4425_s21 + $0x140] sm:$0xff]  ;;  %v317_v43 = vld [vmem:[%s4425_s21 + $0x108] sm:$0xff]  ;;  %v4491_v53 = vpack.c.bf16 %v327_v48, %v319_v47  ;;  %v3803_v56 = vld [vmem:[#allocation7 + $0x330] sm:$0xf] }
  0x5f   : > { %1490 = vmatpush.bf16.msrb.mxu1 %v3764_v7  ;;  %v325_v44 = vld [vmem:[%s4425_s21 + $0x148] sm:$0xff]  ;;  %v4485_v50 = vpack.c.bf16 %v324_v42, %v316_v41  ;;  %v4081_v57 = vld [vmem:[#allocation7 + $0x334] sm:$0xf0]  ;;  %v3675_v59 = vld [vmem:[#allocation7 + $0x230] sm:$0xf] }
  0x60   : > { %1539 = vmatpush.bf16.msrb.mxu2 %v3828_v61  ;;  %v4487_v51 = vpack.c.bf16 %v325_v44, %v317_v43  ;;  %v3804_v60 = vor.u32 %v4081_v57, %v3803_v56  ;;  %v4049_v61 = vld [vmem:[#allocation7 + $0x234] sm:$0xf0]  ;;  %v3867_v62 = vld [vmem:[#allocation7 + $0x3b0] sm:$0xf]  ;;  %v332_v5 = vld [vmem:[%s4425_s21 + $0x180] sm:$0xff] }
  0x61   : > { %1588 = vmatpush.bf16.msrb.mxu3 %v3892_v0  ;;  %v4097_v63 = vld [vmem:[#allocation7 + $0x3b4] sm:$0xf0]  ;;  %v3676_v0 = vor.u32 %v4049_v61, %v3675_v59  ;;  %v3739_v2 = vld [vmem:[#allocation7 + $0x2b0] sm:$0xf]  ;;  %v340_v6 = vld [vmem:[%s4425_s21 + $0x1c0] sm:$0xff] }
  0x62   : > { %1442 = vmatpush.bf16.msrb.mxu0 %v3692_v15  ;;  %v3868_v1 = vor.u32 %v4097_v63, %v3867_v62  ;;  %v4065_v3 = vld [vmem:[#allocation7 + $0x2b4] sm:$0xf0]  ;;  %v333_v7 = vld [vmem:[%s4425_s21 + $0x188] sm:$0xff]  ;;  %v334_v9 = vld [vmem:[%s4425_s21 + $0x190] sm:$0xff]  ;;  %v4505_v13 = vpack.c.bf16 %v340_v6, %v332_v5 }
  0x63   : > { %1491 = vmatpush.bf16.msrb.mxu1 %v3756_v16  ;;  %v3740_v4 = vor.u32 %v4065_v3, %v3739_v2  ;;  %v342_v10 = vld [vmem:[%s4425_s21 + $0x1d0] sm:$0xff]  ;;  %v335_v11 = vld [vmem:[%s4425_s21 + $0x198] sm:$0xff]  ;;  %v3795_v17 = vld [vmem:[#allocation7 + $0x320] sm:$0xf] }
  0x64   : > { %1540 = vmatpush.bf16.msrb.mxu2 %v3820_v8  ;;  %v341_v8 = vld [vmem:[%s4425_s21 + $0x1c8] sm:$0xff]  ;;  %v4509_v15 = vpack.c.bf16 %v342_v10, %v334_v9  ;;  %v3667_v19 = vld [vmem:[#allocation7 + $0x220] sm:$0xf]  ;;  %v358_v38 = vld [vmem:[%s4425_s21 + $0x250] sm:$0xff] }
  0x65   : > { %1589 = vmatpush.bf16.msrb.mxu3 %v3884_v12  ;;  %v343_v12 = vld [vmem:[%s4425_s21 + $0x1d8] sm:$0xff]  ;;  %v4507_v14 = vpack.c.bf16 %v341_v8, %v333_v7  ;;  %v4079_v18 = vld [vmem:[#allocation7 + $0x324] sm:$0xf0]  ;;  %v3859_v22 = vld [vmem:[#allocation7 + $0x3a0] sm:$0xf] }
  0x66   : > { %1443 = vmatpush.bf16.msrb.mxu0 %v3684_v36  ;;  %v4511_v16 = vpack.c.bf16 %v343_v12, %v335_v11  ;;  %v3796_v20 = vor.u32 %v4079_v18, %v3795_v17  ;;  %v4047_v21 = vld [vmem:[#allocation7 + $0x224] sm:$0xf0]  ;;  %v3731_v30 = vld [vmem:[#allocation7 + $0x2a0] sm:$0xf]  ;;  %v351_v39 = vld [vmem:[%s4425_s21 + $0x218] sm:$0xff] }
  0x67   : > { %1492 = vmatpush.bf16.msrb.mxu1 %v3748_v40  ;;  %v4095_v23 = vld [vmem:[#allocation7 + $0x3a4] sm:$0xf0]  ;;  %v3668_v24 = vor.u32 %v4047_v21, %v3667_v19  ;;  %v348_v33 = vld [vmem:[%s4425_s21 + $0x200] sm:$0xff]  ;;  %v359_v40 = vld [vmem:[%s4425_s21 + $0x258] sm:$0xff] }
  0x68   : > { %1541 = vmatpush.bf16.msrb.mxu2 %v3812_v32  ;;  %v3860_v29 = vor.u32 %v4095_v23, %v3859_v22  ;;  %v4063_v31 = vld [vmem:[#allocation7 + $0x2a4] sm:$0xf0]  ;;  %v356_v34 = vld [vmem:[%s4425_s21 + $0x240] sm:$0xff]  ;;  %v4531_v44 = vpack.c.bf16 %v359_v40, %v351_v39  ;;  %v3787_v45 = vld [vmem:[#allocation7 + $0x310] sm:$0xf] }
  0x69   : > { %1257 = vmatmul.bf16.gmra.mxu0 %v4465_v25  ;;  %1590 = vmatpush.bf16.msrb.mxu3 %v3876_v37  ;;  %v3732_v32 = vor.u32 %v4063_v31, %v3731_v30  ;;  %v349_v35 = vld [vmem:[%s4425_s21 + $0x208] sm:$0xff]  ;;  %v350_v37 = vld [vmem:[%s4425_s21 + $0x210] sm:$0xff]  ;;  %v4525_v41 = vpack.c.bf16 %v356_v34, %v348_v33  ;;  %v4077_v46 = vld [vmem:[#allocation7 + $0x314] sm:$0xf0] }
  0x6a   : > { %1306 = vmatmul.bf16.gmra.mxu1 %v4467_v26  ;;  %1444 = vmatpush.bf16.msrb.mxu0 %v3676_v0  ;;  %v357_v36 = vld [vmem:[%s4425_s21 + $0x248] sm:$0xff]  ;;  %v4529_v43 = vpack.c.bf16 %v358_v38, %v350_v37  ;;  %v3659_v47 = vld [vmem:[#allocation7 + $0x210] sm:$0xf]  ;;  %v3788_v48 = vor.u32 %v4077_v46, %v3787_v45  ;;  %v4045_v56 = vld [vmem:[#allocation7 + $0x214] sm:$0xf0] }
  0x6b   : > { %1355 = vmatmul.bf16.gmra.mxu2 %v4469_v27  ;;  %1493 = vmatpush.bf16.msrb.mxu1 %v3740_v4  ;;  %v4527_v42 = vpack.c.bf16 %v357_v36, %v349_v35  ;;  %v3851_v57 = vld [vmem:[#allocation7 + $0x390] sm:$0xf]  ;;  %v4093_v59 = vld [vmem:[#allocation7 + $0x394] sm:$0xf0]  ;;  %v372_v2 = vld [vmem:[%s4425_s21 + $0x2c0] sm:$0xff] }
  0x6c   : > { %1404 = vmatmul.bf16.gmra.mxu3 %v4471_v28  ;;  %1542 = vmatpush.bf16.msrb.mxu2 %v3804_v60  ;;  %v3660_v60 = vor.u32 %v4045_v56, %v3659_v47  ;;  %v3852_v61 = vor.u32 %v4093_v59, %v3851_v57  ;;  %v3723_v62 = vld [vmem:[#allocation7 + $0x290] sm:$0xf]  ;;  %v4061_v63 = vld [vmem:[#allocation7 + $0x294] sm:$0xf0]  ;;  %v365_v3 = vld [vmem:[%s4425_s21 + $0x288] sm:$0xff] }
  0x6d   : > { %1591 = vmatpush.bf16.msrb.mxu3 %v3868_v1  ;;  %v3724_v0 = vor.u32 %v4061_v63, %v3723_v62  ;;  %v364_v1 = vld [vmem:[%s4425_s21 + $0x280] sm:$0xff]  ;;  %v373_v4 = vld [vmem:[%s4425_s21 + $0x2c8] sm:$0xff]  ;;  %v366_v5 = vld [vmem:[%s4425_s21 + $0x290] sm:$0xff] }
  0x6e   : > { %1445 = vmatpush.bf16.msrb.mxu0 %v3668_v24  ;;  %v374_v6 = vld [vmem:[%s4425_s21 + $0x2d0] sm:$0xff]  ;;  %v367_v7 = vld [vmem:[%s4425_s21 + $0x298] sm:$0xff]  ;;  %v4545_v9 = vpack.c.bf16 %v372_v2, %v364_v1  ;;  %v4547_v10 = vpack.c.bf16 %v373_v4, %v365_v3  ;;  %v3779_v17 = vld [vmem:[#allocation7 + $0x300] sm:$0xf] }
  0x6f   : > { %1494 = vmatpush.bf16.msrb.mxu1 %v3732_v32  ;;  %v375_v8 = vld [vmem:[%s4425_s21 + $0x2d8] sm:$0xff]  ;;  %v4549_v11 = vpack.c.bf16 %v374_v6, %v366_v5  ;;  %v4075_v18 = vld [vmem:[#allocation7 + $0x304] sm:$0xf0]  ;;  %v3651_v19 = vld [vmem:[#allocation7 + $0x200] sm:$0xf] }
  0x70   : > { %1543 = vmatpush.bf16.msrb.mxu2 %v3796_v20  ;;  %v4551_v12 = vpack.c.bf16 %v375_v8, %v367_v7  ;;  %v3780_v20 = vor.u32 %v4075_v18, %v3779_v17  ;;  %v4043_v21 = vld [vmem:[#allocation7 + $0x204] sm:$0xf0]  ;;  %v3843_v22 = vld [vmem:[#allocation7 + $0x380] sm:$0xf]  ;;  %v382_v37 = vld [vmem:[%s4425_s21 + $0x310] sm:$0xff] }
  0x71   : > { %1592 = vmatpush.bf16.msrb.mxu3 %v3860_v29  ;;  %v4091_v23 = vld [vmem:[#allocation7 + $0x384] sm:$0xf0]  ;;  %v3652_v24 = vor.u32 %v4043_v21, %v3651_v19  ;;  %v3715_v30 = vld [vmem:[#allocation7 + $0x280] sm:$0xf]  ;;  %v390_v38 = vld [vmem:[%s4425_s21 + $0x350] sm:$0xff] }
  0x72   : > { %1446 = vmatpush.bf16.msrb.mxu0 %v3660_v60  ;;  %v3844_v29 = vor.u32 %v4091_v23, %v3843_v22  ;;  %v4059_v31 = vld [vmem:[#allocation7 + $0x284] sm:$0xf0]  ;;  %v380_v33 = vld [vmem:[%s4425_s21 + $0x300] sm:$0xff]  ;;  %v383_v39 = vld [vmem:[%s4425_s21 + $0x318] sm:$0xff]  ;;  %v4569_v47 = vpack.c.bf16 %v390_v38, %v382_v37 }
  0x73   : > { %1495 = vmatpush.bf16.msrb.mxu1 %v3724_v0  ;;  %v3716_v32 = vor.u32 %v4059_v31, %v3715_v30  ;;  %v388_v34 = vld [vmem:[%s4425_s21 + $0x340] sm:$0xff]  ;;  %v381_v35 = vld [vmem:[%s4425_s21 + $0x308] sm:$0xff]  ;;  %v391_v40 = vld [vmem:[%s4425_s21 + $0x358] sm:$0xff] }
  0x74   : > { %1544 = vmatpush.bf16.msrb.mxu2 %v3788_v48  ;;  %v389_v36 = vld [vmem:[%s4425_s21 + $0x348] sm:$0xff]  ;;  %v4565_v45 = vpack.c.bf16 %v388_v34, %v380_v33  ;;  %v4571_v48 = vpack.c.bf16 %v391_v40, %v383_v39  ;;  %v4024_v56 = vld [vmem:[#allocation7 + $0x174] sm:$0xf]  ;;  %v3581_v57 = vld [vmem:[#allocation7 + $0x178] sm:$0xf0] }
  0x75   : > { %1593 = vmatpush.bf16.msrb.mxu3 %v3852_v61  ;;  %v4567_v46 = vpack.c.bf16 %v389_v36, %v381_v35  ;;  %v3992_v59 = vld [vmem:[#allocation7 + $0x74] sm:$0xf]  ;;  %v3584_v60 = vor.u32 %v4024_v56, %v3581_v57  ;;  %v3453_v61 = vld [vmem:[#allocation7 + $0x78] sm:$0xf0]  ;;  %v396_v5 = vld [vmem:[%s4425_s21 + $0x380] sm:$0xff] }
  0x76   : > { %1447 = vmatpush.bf16.msrb.mxu0 %v3652_v24  ;;  %v4040_v62 = vld [vmem:[#allocation7 + $0x1f4] sm:$0xf]  ;;  %v3645_v63 = vld [vmem:[#allocation7 + $0x1f8] sm:$0xf0]  ;;  %v3456_v0 = vor.u32 %v3992_v59, %v3453_v61  ;;  %v404_v6 = vld [vmem:[%s4425_s21 + $0x3c0] sm:$0xff] }
  0x77   : > { %1496 = vmatpush.bf16.msrb.mxu1 %v3716_v32  ;;  %v3648_v1 = vor.u32 %v4040_v62, %v3645_v63  ;;  %v4008_v2 = vld [vmem:[#allocation7 + $0xf4] sm:$0xf]  ;;  %v3517_v3 = vld [vmem:[#allocation7 + $0xf8] sm:$0xf0]  ;;  %v397_v7 = vld [vmem:[%s4425_s21 + $0x388] sm:$0xff]  ;;  %v4585_v21 = vpack.c.bf16 %v404_v6, %v396_v5 }
  0x78   : > { %1545 = vmatpush.bf16.msrb.mxu2 %v3780_v20  ;;  %v3520_v4 = vor.u32 %v4008_v2, %v3517_v3  ;;  %v405_v8 = vld [vmem:[%s4425_s21 + $0x3c8] sm:$0xff]  ;;  %v398_v17 = vld [vmem:[%s4425_s21 + $0x390] sm:$0xff]  ;;  %v399_v19 = vld [vmem:[%s4425_s21 + $0x398] sm:$0xff] }
  0x79   : > { %1262 = vmatmul.bf16.gmra.mxu0 %v4485_v50  ;;  %1594 = vmatpush.bf16.msrb.mxu3 %v3844_v29  ;;  %v406_v18 = vld [vmem:[%s4425_s21 + $0x3d0] sm:$0xff]  ;;  %v407_v20 = vld [vmem:[%s4425_s21 + $0x3d8] sm:$0xff]  ;;  %5843 = vst [vmem:[#allocation11_spill] sm:$0xff] %v4585_v21  ;;  %v4587_v22 = vpack.c.bf16 %v405_v8, %v397_v7  ;;  %v4022_v29 = vld [vmem:[#allocation7 + $0x164] sm:$0xf] }
  0x7a   : > { %1311 = vmatmul.bf16.gmra.mxu1 %v4487_v51  ;;  %1636 = vmatpush.bf16.msra.mxu0 %v3456_v0  ;;  %v4589_v23 = vpack.c.bf16 %v406_v18, %v398_v17  ;;  %v4591_v24 = vpack.c.bf16 %v407_v20, %v399_v19  ;;  %v3573_v30 = vld [vmem:[#allocation7 + $0x168] sm:$0xf0]  ;;  %v3990_v31 = vld [vmem:[#allocation7 + $0x64] sm:$0xf]  ;;  %v290_v61 = vld [vmem:[%s4425_s21 + $0x30] sm:$0xff] }
  0x7b   : > { %1360 = vmatmul.bf16.gmra.mxu2 %v4489_v52  ;;  %1685 = vmatpush.bf16.msra.mxu1 %v3520_v4  ;;  %5844 = vst [vmem:[#allocation12_spill] sm:$0xff] %v4587_v22  ;;  %v3576_v32 = vor.u32 %v4022_v29, %v3573_v30  ;;  %v3445_v33 = vld [vmem:[#allocation7 + $0x68] sm:$0xf0]  ;;  %v4038_v34 = vld [vmem:[#allocation7 + $0x1e4] sm:$0xf]  ;;  %v298_v62 = vld [vmem:[%s4425_s21 + $0x70] sm:$0xff] }
  0x7c   : > { %1409 = vmatmul.bf16.gmra.mxu3 %v4491_v53  ;;  %1734 = vmatpush.bf16.msra.mxu2 %v3584_v60  ;;  %5845 = vst [vmem:[#allocation13_spill] sm:$0xff] %v4589_v23  ;;  %v3637_v35 = vld [vmem:[#allocation7 + $0x1e8] sm:$0xf0]  ;;  %v3448_v36 = vor.u32 %v3990_v31, %v3445_v33  ;;  %v4006_v38 = vld [vmem:[#allocation7 + $0xe4] sm:$0xf]  ;;  %v291_v63 = vld [vmem:[%s4425_s21 + $0x38] sm:$0xff]  ;;  %v4609_v4 = vpack.c.bf16 %v298_v62, %v290_v61 }
  0x7d   : > { %1783 = vmatpush.bf16.msra.mxu3 %v3648_v1  ;;  %5846 = vst [vmem:[#allocation14_spill] sm:$0xff] %v4591_v24  ;;  %v3640_v37 = vor.u32 %v4038_v34, %v3637_v35  ;;  %v3509_v39 = vld [vmem:[#allocation7 + $0xe8] sm:$0xf0]  ;;  %v288_v56 = vld [vmem:[%s4425_s21 + $0x20] sm:$0xff]  ;;  %v299_v0 = vld [vmem:[%s4425_s21 + $0x78] sm:$0xff] }
  0x7e   : > { %1637 = vmatpush.bf16.msra.mxu0 %v3448_v36  ;;  %v3512_v40 = vor.u32 %v4006_v38, %v3509_v39  ;;  %v296_v57 = vld [vmem:[%s4425_s21 + $0x60] sm:$0xff]  ;;  %v289_v59 = vld [vmem:[%s4425_s21 + $0x28] sm:$0xff]  ;;  %5849 = vst [vmem:[#allocation17_spill] sm:$0xff] %v4609_v4  ;;  %v4611_v6 = vpack.c.bf16 %v299_v0, %v291_v63  ;;  %v4020_v8 = vld [vmem:[#allocation7 + $0x154] sm:$0xf] }
  0x7f   : > { %v297_v60 = vld [vmem:[%s4425_s21 + $0x68] sm:$0xff]  ;;  %v4605_v1 = vpack.c.bf16 %v296_v57, %v288_v56  ;;  %v3565_v17 = vld [vmem:[#allocation7 + $0x158] sm:$0xf0]  ;;  %v3988_v18 = vld [vmem:[#allocation7 + $0x54] sm:$0xf] }
  0x80   : > { %1735 = vmatpush.bf16.msra.mxu2 %v3576_v32  ;;  %1686 = vmatpush.bf16.msra.mxu1 %v3512_v40  ;;  %v4607_v3 = vpack.c.bf16 %v297_v60, %v289_v59  ;;  %5850 = vst [vmem:[#allocation18_spill] sm:$0xff] %v4611_v6  ;;  %v3568_v19 = vor.u32 %v4020_v8, %v3565_v17  ;;  %v3437_v20 = vld [vmem:[#allocation7 + $0x58] sm:$0xf0]  ;;  %v4036_v29 = vld [vmem:[#allocation7 + $0x1d4] sm:$0xf]  ;;  %v304_v59 = vld [vmem:[%s4425_s21 + $0xa0] sm:$0xff] }
  0x81   : > { %1784 = vmatpush.bf16.msra.mxu3 %v3640_v37  ;;  %5847 = vst [vmem:[#allocation15_spill] sm:$0xff] %v4605_v1  ;;  %v3629_v30 = vld [vmem:[#allocation7 + $0x1d8] sm:$0xf0]  ;;  %v3440_v32 = vor.u32 %v3988_v18, %v3437_v20  ;;  %v4004_v40 = vld [vmem:[#allocation7 + $0xd4] sm:$0xf]  ;;  %v312_v60 = vld [vmem:[%s4425_s21 + $0xe0] sm:$0xff] }
  0x82   : > { %5848 = vst [vmem:[#allocation16_spill] sm:$0xff] %v4607_v3  ;;  %v3632_v33 = vor.u32 %v4036_v29, %v3629_v30  ;;  %v3501_v56 = vld [vmem:[#allocation7 + $0xd8] sm:$0xf0]  ;;  %v305_v61 = vld [vmem:[%s4425_s21 + $0xa8] sm:$0xff]  ;;  %v306_v63 = vld [vmem:[%s4425_s21 + $0xb0] sm:$0xff]  ;;  %v4627_v8 = vpack.c.bf16 %v312_v60, %v304_v59 }
  0x83   : > { %1638 = vmatpush.bf16.msra.mxu0 %v3440_v32  ;;  %v3504_v57 = vor.u32 %v4004_v40, %v3501_v56  ;;  %v313_v62 = vld [vmem:[%s4425_s21 + $0xe8] sm:$0xff]  ;;  %v314_v0 = vld [vmem:[%s4425_s21 + $0xf0] sm:$0xff]  ;;  %v4034_v40 = vld [vmem:[#allocation7 + $0x1c4] sm:$0xf] }
  0x84   : > { %1736 = vmatpush.bf16.msra.mxu2 %v3568_v19  ;;  %5851 = vst [vmem:[#allocation19_spill] sm:$0xff] %v4627_v8  ;;  %v4629_v20 = vpack.c.bf16 %v313_v62, %v305_v61  ;;  %v4631_v29 = vpack.c.bf16 %v314_v0, %v306_v63  ;;  %v3621_v56 = vld [vmem:[#allocation7 + $0x1c8] sm:$0xf0] }
  0x85   : > { %1785 = vmatpush.bf16.msra.mxu3 %v3632_v33  ;;  %1687 = vmatpush.bf16.msra.mxu1 %v3504_v57  ;;  %v3624_v60 = vor.u32 %v4034_v40, %v3621_v56 }
  0x86   : > { %5852 = vst [vmem:[#allocation20_spill] sm:$0xff] %v4629_v20 }
  0x87   : > { %5853 = vst [vmem:[#allocation21_spill] sm:$0xff] %v4631_v29 }
  0x89   : > { %1267 = vmatmul.bf16.gmra.mxu0 %v4505_v13  ;;  %1786 = vmatpush.bf16.msra.mxu3 %v3624_v60 }
  0x8a   : > { %1316 = vmatmul.bf16.gmra.mxu1 %v4507_v14 }
  0x8b   : > { %1365 = vmatmul.bf16.gmra.mxu2 %v4509_v15 }
  0x8c   : > { %1414 = vmatmul.bf16.gmra.mxu3 %v4511_v16 }
  0x99   : > { %1272 = vmatmul.bf16.gmra.mxu0 %v4525_v41 }
  0x9a   : > { %1321 = vmatmul.bf16.gmra.mxu1 %v4527_v42 }
  0x9b   : > { %1370 = vmatmul.bf16.gmra.mxu2 %v4529_v43 }
  0x9c   : > { %1419 = vmatmul.bf16.gmra.mxu3 %v4531_v44 }
  0xa9   : > { %1277 = vmatmul.bf16.gmra.mxu0 %v4545_v9 }
  0xaa   : > { %1326 = vmatmul.bf16.gmra.mxu1 %v4547_v10 }
  0xab   : > { %1375 = vmatmul.bf16.gmra.mxu2 %v4549_v11 }
  0xac   : > { %1424 = vmatmul.bf16.gmra.mxu3 %v4551_v12 }
  0xb9   : > { %1282 = vmatmul.bf16.gmra.mxu0 %v4565_v45 }
  0xba   : > { %1331 = vmatmul.bf16.gmra.mxu1 %v4567_v46 }
  0xbb   : > { %1380 = vmatmul.bf16.gmra.mxu2 %v4569_v47 }
  0xbc   : > { %1429 = vmatmul.bf16.gmra.mxu3 %v4571_v48 }
  0xc9   : > { %1287 = vmatmul.bf16.gmra.mxu0 %v4585_v21 }
  0xca   : > { %1336 = vmatmul.bf16.gmra.mxu1 %v4587_v22 }
  0xcb   : > { %1385 = vmatmul.bf16.gmra.mxu2 %v4589_v23 }
  0xcc   : > { %1434 = vmatmul.bf16.gmra.mxu3 %v4591_v24 }
  0xd6   : > { %v1253_v2 = vpop.f32.mrf.mxu0 }
  0xd7   : > { %v1302_v5 = vpop.f32.mrf.mxu1 }
  0xd8   : > { %v1303_v7 = vadd.f32 %v1302_v5, %v1253_v2  ;;  %v307_v2 = vld [vmem:[%s4425_s21 + $0xb8] sm:$0xff] }
  0xd9   : > { %1448 = vmatmul.bf16.vlgmr.msrb.gmra.mxu0 %v4605_v1  ;;  %v315_v5 = vld [vmem:[%s4425_s21 + $0xf8] sm:$0xff] }
  0xda   : > { %1497 = vmatmul.bf16.vlgmr.msrb.gmra.mxu1 %v4607_v3 }
  0xdb   : > { %1546 = vmatmul.bf16.vlgmr.msrb.gmra.mxu2 %v4609_v4 }
  0xdc   : > { %1595 = vmatmul.bf16.vlgmr.msrb.gmra.mxu3 %v4611_v6 }
  0xde   : > { %v1351_v31 = vpop.f32.mrf.mxu2  ;;  %v1255_v36 = vpop.f32.mrf.mxu0 }
  0xdf   : > { %v1352_v34 = vadd.f32 %v1351_v31, %v1303_v7  ;;  %v1400_v35 = vpop.f32.mrf.mxu3  ;;  %v1304_v37 = vpop.f32.mrf.mxu1  ;;  %v4633_v31 = vpack.c.bf16 %v315_v5, %v307_v2 }
  0xe0   : > { %v1305_v39 = vadd.f32 %v1304_v37, %v1255_v36  ;;  %v3986_v36 = vld [vmem:[#allocation7 + $0x44] sm:$0xf] }
  0xe1   : > { %v4617_v38 = vadd.f32 %v1400_v35, %v1352_v34  ;;  %5854 = vst [vmem:[#allocation22_spill] sm:$0xff] %v4633_v31  ;;  %v4018_v34 = vld [vmem:[#allocation7 + $0x144] sm:$0xf]  ;;  %v3557_v35 = vld [vmem:[#allocation7 + $0x148] sm:$0xf0] }
  0xe2   : > { %v3560_v37 = vor.u32 %v4018_v34, %v3557_v35  ;;  %v321_v34 = vld [vmem:[%s4425_s21 + $0x128] sm:$0xff]  ;;  %v322_v35 = vld [vmem:[%s4425_s21 + $0x130] sm:$0xff] }
  0xe4   : > { %1737 = vmatpush.bf16.msra.mxu2 %v3560_v37  ;;  %v331_v37 = vld [vmem:[%s4425_s21 + $0x178] sm:$0xff] }
  0xe6   : > { %v1353_v7 = vpop.f32.mrf.mxu2  ;;  %v1258_v19 = vpop.f32.mrf.mxu0 }
  0xe7   : > { %v1354_v17 = vadd.f32 %v1353_v7, %v1305_v39  ;;  %v1402_v18 = vpop.f32.mrf.mxu3  ;;  %v1307_v30 = vpop.f32.mrf.mxu1  ;;  %v3429_v39 = vld [vmem:[#allocation7 + $0x48] sm:$0xf0]  ;;  %v4002_v7 = vld [vmem:[#allocation7 + $0xc4] sm:$0xf] }
  0xe8   : > { %v1308_v33 = vadd.f32 %v1307_v30, %v1258_v19  ;;  %v3432_v59 = vor.u32 %v3986_v36, %v3429_v39  ;;  %v320_v19 = vld [vmem:[%s4425_s21 + $0x120] sm:$0xff]  ;;  %v330_v36 = vld [vmem:[%s4425_s21 + $0x170] sm:$0xff]  ;;  %v323_v39 = vld [vmem:[%s4425_s21 + $0x138] sm:$0xff] }
  0xe9   : > { %v4635_v32 = vadd.f32 %v1402_v18, %v1354_v17  ;;  %1453 = vmatmul.bf16.gmra.mxu0 %v4627_v8  ;;  %v3493_v17 = vld [vmem:[#allocation7 + $0xc8] sm:$0xf0]  ;;  %v328_v30 = vld [vmem:[%s4425_s21 + $0x160] sm:$0xff] }
  0xea   : > { %1502 = vmatmul.bf16.gmra.mxu1 %v4629_v20  ;;  %1639 = vmatpush.bf16.msra.mxu0 %v3432_v59  ;;  %v3496_v18 = vor.u32 %v4002_v7, %v3493_v17  ;;  %v4651_v56 = vpack.c.bf16 %v328_v30, %v320_v19  ;;  %v3984_v19 = vld [vmem:[#allocation7 + $0x34] sm:$0xf] }
  0xeb   : > { %1551 = vmatmul.bf16.gmra.mxu2 %v4631_v29 }
  0xec   : > { %1600 = vmatmul.bf16.gmra.mxu3 %v4633_v31  ;;  %1688 = vmatpush.bf16.msra.mxu1 %v3496_v18  ;;  %5855 = vst [vmem:[#allocation23_spill] sm:$0xff] %v4651_v56  ;;  %v3549_v18 = vld [vmem:[#allocation7 + $0x138] sm:$0xf0] }
  0xee   : > { %v1356_v57 = vpop.f32.mrf.mxu2  ;;  %v1260_v63 = vpop.f32.mrf.mxu0 }
  0xef   : > { %v1357_v61 = vadd.f32 %v1356_v57, %v1308_v33  ;;  %v1405_v62 = vpop.f32.mrf.mxu3  ;;  %v1309_v0 = vpop.f32.mrf.mxu1  ;;  %v329_v33 = vld [vmem:[%s4425_s21 + $0x168] sm:$0xff] }
  0xf0   : > { %v1310_v5 = vadd.f32 %v1309_v0, %v1260_v63  ;;  %v4657_v0 = vpack.c.bf16 %v331_v37, %v323_v39 }
  0xf1   : > { %v4641_v2 = vadd.f32 %v1405_v62, %v1357_v61  ;;  %v4653_v61 = vpack.c.bf16 %v329_v33, %v321_v34  ;;  %v4655_v62 = vpack.c.bf16 %v330_v36, %v322_v35  ;;  %v3421_v34 = vld [vmem:[#allocation7 + $0x38] sm:$0xf0]  ;;  %v4032_v33 = vld [vmem:[#allocation7 + $0x1b4] sm:$0xf] }
  0xf2   : > { %5858 = vst [vmem:[#allocation26_spill] sm:$0xff] %v4657_v0  ;;  %v3613_v35 = vld [vmem:[#allocation7 + $0x1b8] sm:$0xf0]  ;;  %v3424_v39 = vor.u32 %v3984_v19, %v3421_v34  ;;  %v336_v34 = vld [vmem:[%s4425_s21 + $0x1a0] sm:$0xff] }
  0xf3   : > { %5856 = vst [vmem:[#allocation24_spill] sm:$0xff] %v4653_v61  ;;  %v3616_v37 = vor.u32 %v4032_v33, %v3613_v35  ;;  %v344_v33 = vld [vmem:[%s4425_s21 + $0x1e0] sm:$0xff]  ;;  %v337_v35 = vld [vmem:[%s4425_s21 + $0x1a8] sm:$0xff] }
  0xf4   : > { %5857 = vst [vmem:[#allocation25_spill] sm:$0xff] %v4655_v62  ;;  %1640 = vmatpush.bf16.msra.mxu0 %v3424_v39  ;;  %v4675_v31 = vpack.c.bf16 %v344_v33, %v336_v34  ;;  %v4030_v33 = vld [vmem:[#allocation7 + $0x1a4] sm:$0xf] }
  0xf5   : > { %1787 = vmatpush.bf16.msra.mxu3 %v3616_v37 }
  0xf6   : > { %v1358_v40 = vpop.f32.mrf.mxu2  ;;  %v1263_v60 = vpop.f32.mrf.mxu0  ;;  %5859 = vst [vmem:[#allocation27_spill] sm:$0xff] %v4675_v31 }
  0xf7   : > { %v1359_v57 = vadd.f32 %v1358_v40, %v1310_v5  ;;  %v1407_v59 = vpop.f32.mrf.mxu3  ;;  %v1312_v63 = vpop.f32.mrf.mxu1  ;;  %v4016_v5 = vld [vmem:[#allocation7 + $0x134] sm:$0xf] }
  0xf8   : > { %v1313_v17 = vadd.f32 %v1312_v63, %v1263_v60  ;;  %v3552_v30 = vor.u32 %v4016_v5, %v3549_v18  ;;  %v4000_v18 = vld [vmem:[#allocation7 + $0xb4] sm:$0xf] }
  0xf9   : > { %v4659_v7 = vadd.f32 %v1407_v59, %v1359_v57  ;;  %1458 = vmatmul.bf16.gmra.mxu0 %v4651_v56 }
  0xfa   : > { %1507 = vmatmul.bf16.gmra.mxu1 %v4653_v61  ;;  %1738 = vmatpush.bf16.msra.mxu2 %v3552_v30  ;;  %v339_v61 = vld [vmem:[%s4425_s21 + $0x1b8] sm:$0xff] }
  0xfb   : > { %1556 = vmatmul.bf16.gmra.mxu2 %v4655_v62  ;;  %v346_v62 = vld [vmem:[%s4425_s21 + $0x1f0] sm:$0xff]  ;;  %v347_v30 = vld [vmem:[%s4425_s21 + $0x1f8] sm:$0xff] }
  0xfc   : > { %1605 = vmatmul.bf16.gmra.mxu3 %v4657_v0  ;;  %v3485_v0 = vld [vmem:[#allocation7 + $0xb8] sm:$0xf0] }
  0xfd   : > { %v3488_v19 = vor.u32 %v4000_v18, %v3485_v0 }
  0xfe   : > { %v1361_v36 = vpop.f32.mrf.mxu2  ;;  %v1265_v59 = vpop.f32.mrf.mxu0 }
  0xff   : > { %v1362_v40 = vadd.f32 %v1361_v36, %v1313_v17  ;;  %v1410_v57 = vpop.f32.mrf.mxu3  ;;  %v1314_v60 = vpop.f32.mrf.mxu1  ;;  %v345_v17 = vld [vmem:[%s4425_s21 + $0x1e8] sm:$0xff]  ;;  %v338_v36 = vld [vmem:[%s4425_s21 + $0x1b0] sm:$0xff]  ;;  %1689 = vmatpush.bf16.msra.mxu1 %v3488_v19  ;;  %v3982_v19 = vld [vmem:[#allocation7 + $0x24] sm:$0xf] }
 0x100   : > { %v1315_v5 = vadd.f32 %v1314_v60, %v1265_v59  ;;  %v4679_v59 = vpack.c.bf16 %v346_v62, %v338_v36  ;;  %v4681_v60 = vpack.c.bf16 %v347_v30, %v339_v61  ;;  %v3413_v62 = vld [vmem:[#allocation7 + $0x28] sm:$0xf0] }
 0x101   : > { %v4665_v63 = vadd.f32 %v1410_v57, %v1362_v40  ;;  %v4677_v57 = vpack.c.bf16 %v345_v17, %v337_v35  ;;  %v3605_v35 = vld [vmem:[#allocation7 + $0x1a8] sm:$0xf0]  ;;  %v3416_v17 = vor.u32 %v3982_v19, %v3413_v62  ;;  %v352_v62 = vld [vmem:[%s4425_s21 + $0x220] sm:$0xff] }
 0x102   : > { %5861 = vst [vmem:[#allocation29_spill] sm:$0xff] %v4679_v59  ;;  %v3608_v36 = vor.u32 %v4030_v33, %v3605_v35  ;;  %v360_v33 = vld [vmem:[%s4425_s21 + $0x260] sm:$0xff]  ;;  %v353_v35 = vld [vmem:[%s4425_s21 + $0x228] sm:$0xff] }
 0x103   : > { %5860 = vst [vmem:[#allocation28_spill] sm:$0xff] %v4677_v57  ;;  %1641 = vmatpush.bf16.msra.mxu0 %v3416_v17  ;;  %v4699_v20 = vpack.c.bf16 %v360_v33, %v352_v62  ;;  %v4028_v33 = vld [vmem:[#allocation7 + $0x194] sm:$0xf] }
 0x104   : > { %5862 = vst [vmem:[#allocation30_spill] sm:$0xff] %v4681_v60  ;;  %1788 = vmatpush.bf16.msra.mxu3 %v3608_v36 }
 0x105   : > { %5863 = vst [vmem:[#allocation31_spill] sm:$0xff] %v4699_v20 }
 0x106   : > { %v1363_v56 = vpop.f32.mrf.mxu2  ;;  %v1268_v40 = vpop.f32.mrf.mxu0 }
 0x107   : > { %v1364_v39 = vadd.f32 %v1363_v56, %v1315_v5  ;;  %v1412_v37 = vpop.f32.mrf.mxu3  ;;  %v1317_v0 = vpop.f32.mrf.mxu1  ;;  %v4014_v56 = vld [vmem:[#allocation7 + $0x124] sm:$0xf]  ;;  %v3541_v5 = vld [vmem:[#allocation7 + $0x128] sm:$0xf0] }
 0x108   : > { %v1318_v29 = vadd.f32 %v1317_v0, %v1268_v40  ;;  %v3544_v34 = vor.u32 %v4014_v56, %v3541_v5  ;;  %v3998_v5 = vld [vmem:[#allocation7 + $0xa4] sm:$0xf] }
 0x109   : > { %v4683_v18 = vadd.f32 %v1412_v37, %v1364_v39  ;;  %1463 = vmatmul.bf16.gmra.mxu0 %v4675_v31 }
 0x10a   : > { %1512 = vmatmul.bf16.gmra.mxu1 %v4677_v57  ;;  %1739 = vmatpush.bf16.msra.mxu2 %v3544_v34  ;;  %v355_v57 = vld [vmem:[%s4425_s21 + $0x238] sm:$0xff] }
 0x10b   : > { %1561 = vmatmul.bf16.gmra.mxu2 %v4679_v59  ;;  %v362_v59 = vld [vmem:[%s4425_s21 + $0x270] sm:$0xff]  ;;  %v363_v34 = vld [vmem:[%s4425_s21 + $0x278] sm:$0xff] }
 0x10c   : > { %1610 = vmatmul.bf16.gmra.mxu3 %v4681_v60  ;;  %v3477_v60 = vld [vmem:[#allocation7 + $0xa8] sm:$0xf0] }
 0x10d   : > { %v3480_v19 = vor.u32 %v3998_v5, %v3477_v60 }
 0x10e   : > { %v1366_v61 = vpop.f32.mrf.mxu2  ;;  %v1270_v37 = vpop.f32.mrf.mxu0 }
 0x10f   : > { %v1367_v30 = vadd.f32 %v1366_v61, %v1318_v29  ;;  %v1415_v39 = vpop.f32.mrf.mxu3  ;;  %v1319_v40 = vpop.f32.mrf.mxu1  ;;  %v361_v29 = vld [vmem:[%s4425_s21 + $0x268] sm:$0xff]  ;;  %v354_v61 = vld [vmem:[%s4425_s21 + $0x230] sm:$0xff]  ;;  %1690 = vmatpush.bf16.msra.mxu1 %v3480_v19 }
 0x110   : > { %v1320_v56 = vadd.f32 %v1319_v40, %v1270_v37  ;;  %v4703_v37 = vpack.c.bf16 %v362_v59, %v354_v61  ;;  %v4705_v40 = vpack.c.bf16 %v363_v34, %v355_v57  ;;  %v3980_v19 = vld [vmem:[#allocation7 + $0x14] sm:$0xf]  ;;  %v3405_v59 = vld [vmem:[#allocation7 + $0x18] sm:$0xf0] }
 0x111   : > { %v4689_v0 = vadd.f32 %v1415_v39, %v1367_v30  ;;  %v4701_v39 = vpack.c.bf16 %v361_v29, %v353_v35  ;;  %v3597_v35 = vld [vmem:[#allocation7 + $0x198] sm:$0xf0]  ;;  %v3408_v29 = vor.u32 %v3980_v19, %v3405_v59  ;;  %v368_v59 = vld [vmem:[%s4425_s21 + $0x2a0] sm:$0xff] }
 0x112   : > { %5865 = vst [vmem:[#allocation33_spill] sm:$0xff] %v4703_v37  ;;  %v3600_v61 = vor.u32 %v4028_v33, %v3597_v35  ;;  %v376_v33 = vld [vmem:[%s4425_s21 + $0x2e0] sm:$0xff]  ;;  %v369_v35 = vld [vmem:[%s4425_s21 + $0x2a8] sm:$0xff] }
 0x113   : > { %5864 = vst [vmem:[#allocation32_spill] sm:$0xff] %v4701_v39  ;;  %1642 = vmatpush.bf16.msra.mxu0 %v3408_v29  ;;  %v4723_v6 = vpack.c.bf16 %v376_v33, %v368_v59  ;;  %v4026_v33 = vld [vmem:[#allocation7 + $0x184] sm:$0xf] }
 0x114   : > { %5866 = vst [vmem:[#allocation34_spill] sm:$0xff] %v4705_v40  ;;  %1789 = vmatpush.bf16.msra.mxu3 %v3600_v61 }
 0x115   : > { %5867 = vst [vmem:[#allocation35_spill] sm:$0xff] %v4723_v6 }
 0x116   : > { %v1368_v31 = vpop.f32.mrf.mxu2  ;;  %v1273_v30 = vpop.f32.mrf.mxu0 }
 0x117   : > { %v1369_v17 = vadd.f32 %v1368_v31, %v1320_v56  ;;  %v1417_v36 = vpop.f32.mrf.mxu3  ;;  %v1322_v60 = vpop.f32.mrf.mxu1  ;;  %v4012_v31 = vld [vmem:[#allocation7 + $0x114] sm:$0xf]  ;;  %v3533_v56 = vld [vmem:[#allocation7 + $0x118] sm:$0xf0] }
 0x118   : > { %v1323_v8 = vadd.f32 %v1322_v60, %v1273_v30  ;;  %v3536_v62 = vor.u32 %v4012_v31, %v3533_v56  ;;  %v3996_v56 = vld [vmem:[#allocation7 + $0x94] sm:$0xf] }
 0x119   : > { %v4707_v5 = vadd.f32 %v1417_v36, %v1369_v17  ;;  %1468 = vmatmul.bf16.gmra.mxu0 %v4699_v20 }
 0x11a   : > { %1517 = vmatmul.bf16.gmra.mxu1 %v4701_v39  ;;  %1740 = vmatpush.bf16.msra.mxu2 %v3536_v62  ;;  %v371_v39 = vld [vmem:[%s4425_s21 + $0x2b8] sm:$0xff] }
 0x11b   : > { %1566 = vmatmul.bf16.gmra.mxu2 %v4703_v37  ;;  %v378_v37 = vld [vmem:[%s4425_s21 + $0x2f0] sm:$0xff]  ;;  %v379_v62 = vld [vmem:[%s4425_s21 + $0x2f8] sm:$0xff] }
 0x11c   : > { %1615 = vmatmul.bf16.gmra.mxu3 %v4705_v40  ;;  %v3469_v40 = vld [vmem:[#allocation7 + $0x98] sm:$0xf0] }
 0x11d   : > { %v3472_v19 = vor.u32 %v3996_v56, %v3469_v40 }
 0x11e   : > { %v1371_v57 = vpop.f32.mrf.mxu2  ;;  %v1275_v36 = vpop.f32.mrf.mxu0 }
 0x11f   : > { %v1372_v34 = vadd.f32 %v1371_v57, %v1323_v8  ;;  %v1420_v17 = vpop.f32.mrf.mxu3  ;;  %v1324_v30 = vpop.f32.mrf.mxu1  ;;  %v377_v8 = vld [vmem:[%s4425_s21 + $0x2e8] sm:$0xff]  ;;  %v370_v57 = vld [vmem:[%s4425_s21 + $0x2b0] sm:$0xff]  ;;  %1691 = vmatpush.bf16.msra.mxu1 %v3472_v19  ;;  %v3978_v19 = vld [vmem:[#allocation7 + $0x4] sm:$0xf] }
 0x120   : > { %v1325_v31 = vadd.f32 %v1324_v30, %v1275_v36  ;;  %v4727_v36 = vpack.c.bf16 %v378_v37, %v370_v57  ;;  %v4729_v30 = vpack.c.bf16 %v379_v62, %v371_v39  ;;  %v3397_v37 = vld [vmem:[#allocation7 + $0x8] sm:$0xf0] }
 0x121   : > { %v4713_v60 = vadd.f32 %v1420_v17, %v1372_v34  ;;  %v4725_v17 = vpack.c.bf16 %v377_v8, %v369_v35  ;;  %v3589_v35 = vld [vmem:[#allocation7 + $0x188] sm:$0xf0]  ;;  %v3400_v8 = vor.u32 %v3978_v19, %v3397_v37  ;;  %v384_v37 = vld [vmem:[%s4425_s21 + $0x320] sm:$0xff] }
 0x122   : > { %5869 = vst [vmem:[#allocation37_spill] sm:$0xff] %v4727_v36  ;;  %v3592_v57 = vor.u32 %v4026_v33, %v3589_v35  ;;  %v392_v33 = vld [vmem:[%s4425_s21 + $0x360] sm:$0xff]  ;;  %v385_v35 = vld [vmem:[%s4425_s21 + $0x328] sm:$0xff] }
 0x123   : > { %5868 = vst [vmem:[#allocation36_spill] sm:$0xff] %v4725_v17  ;;  %1643 = vmatpush.bf16.msra.mxu0 %v3400_v8  ;;  %v4747_v3 = vpack.c.bf16 %v392_v33, %v384_v37  ;;  %v3901_v33 = vld [vmem:[#allocation7 + $0x3f8] sm:$0xf0] }
 0x124   : > { %5870 = vst [vmem:[#allocation38_spill] sm:$0xff] %v4729_v30  ;;  %1790 = vmatpush.bf16.msra.mxu3 %v3592_v57 }
 0x125   : > { %5871 = vst [vmem:[#allocation39_spill] sm:$0xff] %v4747_v3 }
 0x126   : > { %v1373_v20 = vpop.f32.mrf.mxu2  ;;  %v1278_v34 = vpop.f32.mrf.mxu0 }
 0x127   : > { %v1374_v29 = vadd.f32 %v1373_v20, %v1325_v31  ;;  %v1422_v61 = vpop.f32.mrf.mxu3  ;;  %v1327_v40 = vpop.f32.mrf.mxu1  ;;  %v4010_v20 = vld [vmem:[#allocation7 + $0x104] sm:$0xf]  ;;  %v3525_v31 = vld [vmem:[#allocation7 + $0x108] sm:$0xf0] }
 0x128   : > { %v1328_v4 = vadd.f32 %v1327_v40, %v1278_v34  ;;  %v3528_v59 = vor.u32 %v4010_v20, %v3525_v31  ;;  %v3994_v31 = vld [vmem:[#allocation7 + $0x84] sm:$0xf] }
 0x129   : > { %v4731_v56 = vadd.f32 %v1422_v61, %v1374_v29  ;;  %1473 = vmatmul.bf16.gmra.mxu0 %v4723_v6 }
 0x12a   : > { %1522 = vmatmul.bf16.gmra.mxu1 %v4725_v17  ;;  %1741 = vmatpush.bf16.msra.mxu2 %v3528_v59  ;;  %v387_v17 = vld [vmem:[%s4425_s21 + $0x338] sm:$0xff] }
 0x12b   : > { %1571 = vmatmul.bf16.gmra.mxu2 %v4727_v36  ;;  %v394_v36 = vld [vmem:[%s4425_s21 + $0x370] sm:$0xff]  ;;  %v395_v59 = vld [vmem:[%s4425_s21 + $0x378] sm:$0xff] }
 0x12c   : > { %1620 = vmatmul.bf16.gmra.mxu3 %v4729_v30  ;;  %v3461_v30 = vld [vmem:[#allocation7 + $0x88] sm:$0xf0] }
 0x12d   : > { %v3464_v19 = vor.u32 %v3994_v31, %v3461_v30 }
 0x12e   : > { %v1376_v39 = vpop.f32.mrf.mxu2  ;;  %v1280_v61 = vpop.f32.mrf.mxu0 }
 0x12f   : > { %v1377_v62 = vadd.f32 %v1376_v39, %v1328_v4  ;;  %v1425_v29 = vpop.f32.mrf.mxu3  ;;  %v1329_v34 = vpop.f32.mrf.mxu1  ;;  %v393_v4 = vld [vmem:[%s4425_s21 + $0x368] sm:$0xff]  ;;  %v386_v39 = vld [vmem:[%s4425_s21 + $0x330] sm:$0xff]  ;;  %1692 = vmatpush.bf16.msra.mxu1 %v3464_v19 }
 0x130   : > { %v1330_v20 = vadd.f32 %v1329_v34, %v1280_v61  ;;  %v4751_v61 = vpack.c.bf16 %v394_v36, %v386_v39  ;;  %v4753_v34 = vpack.c.bf16 %v395_v59, %v387_v17  ;;  %v4056_v19 = vld [vmem:[#allocation7 + $0x274] sm:$0xf]  ;;  %v3709_v36 = vld [vmem:[#allocation7 + $0x278] sm:$0xf0] }
 0x131   : > { %v4737_v40 = vadd.f32 %v1425_v29, %v1377_v62  ;;  %v4749_v29 = vpack.c.bf16 %v393_v4, %v385_v35  ;;  %v4104_v17 = vld [vmem:[#allocation7 + $0x3f4] sm:$0xf]  ;;  %v3712_v4 = vor.u32 %v4056_v19, %v3709_v36  ;;  %v3773_v36 = vld [vmem:[#allocation7 + $0x2f8] sm:$0xf0] }
 0x132   : > { %5873 = vst [vmem:[#allocation41_spill] sm:$0xff] %v4751_v61  ;;  %v3904_v39 = vor.u32 %v4104_v17, %v3901_v33  ;;  %v4072_v19 = vld [vmem:[#allocation7 + $0x2f4] sm:$0xf]  ;;  %v409_v17 = vld [vmem:[%s4425_s21 + $0x3e8] sm:$0xff] }
 0x133   : > { %5872 = vst [vmem:[#allocation40_spill] sm:$0xff] %v4749_v29  ;;  %1832 = vmatpush.bf16.msrb.mxu0 %v3712_v4  ;;  %v402_v33 = vld [vmem:[%s4425_s21 + $0x3b0] sm:$0xff] }
 0x134   : > { %5874 = vst [vmem:[#allocation42_spill] sm:$0xff] %v4753_v34  ;;  %1979 = vmatpush.bf16.msrb.mxu3 %v3904_v39 }
 0x136   : > { %v1378_v6 = vpop.f32.mrf.mxu2  ;;  %v1283_v62 = vpop.f32.mrf.mxu0 }
 0x137   : > { %v1379_v8 = vadd.f32 %v1378_v6, %v1330_v20  ;;  %v1427_v57 = vpop.f32.mrf.mxu3  ;;  %v1332_v30 = vpop.f32.mrf.mxu1  ;;  %v4088_v6 = vld [vmem:[#allocation7 + $0x374] sm:$0xf]  ;;  %v3837_v20 = vld [vmem:[#allocation7 + $0x378] sm:$0xf0] }
 0x138   : > { %v1333_v1 = vadd.f32 %v1332_v30, %v1283_v62  ;;  %v3840_v37 = vor.u32 %v4088_v6, %v3837_v20  ;;  %v400_v20 = vld [vmem:[%s4425_s21 + $0x3a0] sm:$0xff] }
 0x139   : > { %v4755_v31 = vadd.f32 %v1427_v57, %v1379_v8  ;;  %1478 = vmatmul.bf16.gmra.mxu0 %v4747_v3  ;;  %v411_v3 = vld [vmem:[%s4425_s21 + $0x3f8] sm:$0xff] }
 0x13a   : > { %1527 = vmatmul.bf16.gmra.mxu1 %v4749_v29  ;;  %1930 = vmatpush.bf16.msrb.mxu2 %v3840_v37  ;;  %v403_v29 = vld [vmem:[%s4425_s21 + $0x3b8] sm:$0xff] }
 0x13b   : > { %1576 = vmatmul.bf16.gmra.mxu2 %v4751_v61  ;;  %v401_v61 = vld [vmem:[%s4425_s21 + $0x3a8] sm:$0xff]  ;;  %v4777_v23 = vpack.c.bf16 %v411_v3, %v403_v29 }
 0x13c   : > { %1625 = vmatmul.bf16.gmra.mxu3 %v4753_v34  ;;  %v408_v34 = vld [vmem:[%s4425_s21 + $0x3e0] sm:$0xff]  ;;  %v3893_v3 = vld [vmem:[#allocation7 + $0x3e8] sm:$0xf0] }
 0x13d   : > { %v4771_v37 = vpack.c.bf16 %v408_v34, %v400_v20  ;;  %5878 = vst [vmem:[#allocation46_spill] sm:$0xff] %v4777_v23  ;;  %v3829_v34 = vld [vmem:[#allocation7 + $0x368] sm:$0xf0] }
 0x13e   : > { %v1381_v35 = vpop.f32.mrf.mxu2  ;;  %v1285_v57 = vpop.f32.mrf.mxu0 }
 0x13f   : > { %v1382_v59 = vadd.f32 %v1381_v35, %v1333_v1  ;;  %v1430_v8 = vpop.f32.mrf.mxu3  ;;  %v1334_v62 = vpop.f32.mrf.mxu1  ;;  %v410_v1 = vld [vmem:[%s4425_s21 + $0x3f0] sm:$0xff]  ;;  %v3776_v35 = vor.u32 %v4072_v19, %v3773_v36  ;;  %5875 = vst [vmem:[#allocation43_spill] sm:$0xff] %v4771_v37  ;;  %v3701_v19 = vld [vmem:[#allocation7 + $0x268] sm:$0xf0]  ;;  %v4102_v36 = vld [vmem:[#allocation7 + $0x3e4] sm:$0xf] }
 0x140   : > { %v1335_v6 = vadd.f32 %v1334_v62, %v1285_v57  ;;  %v4775_v57 = vpack.c.bf16 %v410_v1, %v402_v33 }
 0x141   : > { %v4761_v30 = vadd.f32 %v1430_v8, %v1382_v59  ;;  %1881 = vmatpush.bf16.msrb.mxu1 %v3776_v35  ;;  %v4773_v8 = vpack.c.bf16 %v409_v17, %v401_v61  ;;  %v4054_v61 = vld [vmem:[#allocation7 + $0x264] sm:$0xf]  ;;  %v3896_v35 = vor.u32 %v4102_v36, %v3893_v3 }
 0x142   : > { %5877 = vst [vmem:[#allocation45_spill] sm:$0xff] %v4775_v57  ;;  %v3704_v1 = vor.u32 %v4054_v61, %v3701_v19  ;;  %v4052_v19 = vld [vmem:[#allocation7 + $0x254] sm:$0xf] }
 0x143   : > { %5876 = vst [vmem:[#allocation44_spill] sm:$0xff] %v4773_v8  ;;  %1980 = vmatpush.bf16.msrb.mxu3 %v3896_v35 }
 0x144   : > { %1833 = vmatpush.bf16.msrb.mxu0 %v3704_v1 }
 0x146   : > { %v1383_v24 = vpop.f32.mrf.mxu2  ;;  %v1288_v59 = vpop.f32.mrf.mxu0 }
 0x147   : > { %v1384_v4 = vadd.f32 %v1383_v24, %v1335_v6  ;;  %v1432_v39 = vpop.f32.mrf.mxu3  ;;  %v1337_v62 = vpop.f32.mrf.mxu1  ;;  %v4086_v24 = vld [vmem:[#allocation7 + $0x364] sm:$0xf] }
 0x148   : > { %v1338_v21 = vadd.f32 %v1337_v62, %v1288_v59  ;;  %v3832_v20 = vor.u32 %v4086_v24, %v3829_v34  ;;  %v4070_v62 = vld [vmem:[#allocation7 + $0x2e4] sm:$0xf] }
 0x149   : > { %v4779_v22 = vadd.f32 %v1432_v39, %v1384_v4  ;;  %1483 = vmatmul.bf16.gmra.mxu0 %v4771_v37 }
 0x14a   : > { %1532 = vmatmul.bf16.gmra.mxu1 %v4773_v8  ;;  %1931 = vmatpush.bf16.msrb.mxu2 %v3832_v20  ;;  %v3821_v20 = vld [vmem:[#allocation7 + $0x358] sm:$0xf0] }
 0x14b   : > { %1581 = vmatmul.bf16.gmra.mxu2 %v4775_v57 }
 0x14c   : > { %1630 = vmatmul.bf16.gmra.mxu3 %v4777_v23  ;;  %v3765_v23 = vld [vmem:[#allocation7 + $0x2e8] sm:$0xf0] }
 0x14d   : > { %v3768_v24 = vor.u32 %v4070_v62, %v3765_v23 }
 0x14e   : > { %v1386_v6 = vpop.f32.mrf.mxu2  ;;  %v1290_v33 = vpop.f32.mrf.mxu0 }
 0x14f   : > { %v1387_v29 = vadd.f32 %v1386_v6, %v1338_v21  ;;  %v1435_v17 = vpop.f32.mrf.mxu3  ;;  %v1339_v4 = vpop.f32.mrf.mxu1  ;;  %1882 = vmatpush.bf16.msrb.mxu1 %v3768_v24 }
 0x150   : > { %v1340_v59 = vadd.f32 %v1339_v4, %v1290_v33  ;;  %v4068_v4 = vld [vmem:[#allocation7 + $0x2d4] sm:$0xf] }
 0x151   : > { %v4785_v39 = vadd.f32 %v1435_v17, %v1387_v29  ;;  %v4100_v29 = vld [vmem:[#allocation7 + $0x3d4] sm:$0xf]  ;;  %v3885_v17 = vld [vmem:[#allocation7 + $0x3d8] sm:$0xf0] }
 0x152   : > { %v3888_v1 = vor.u32 %v4100_v29, %v3885_v17  ;;  %v4082_v29 = vld [vmem:[#allocation7 + $0x344] sm:$0xf]  ;;  %v3813_v17 = vld [vmem:[#allocation7 + $0x348] sm:$0xf0] }
 0x154   : > { %1981 = vmatpush.bf16.msrb.mxu3 %v3888_v1 }
 0x156   : > { %v1388_v57 = vpop.f32.mrf.mxu2  ;;  %v1449_v37 = vpop.f32.mrf.mxu0 }
 0x157   : > { %v1389_v34 = vadd.f32 %v1388_v57, %v1340_v59  ;;  %v1437_v8 = vpop.f32.mrf.mxu3  ;;  %v1498_v21 = vpop.f32.mrf.mxu1  ;;  %v1450_v61 = vadd.f32 %v1449_v37, %v4617_v38  ;;  %v4084_v57 = vld [vmem:[#allocation7 + $0x354] sm:$0xf]  ;;  %v3757_v59 = vld [vmem:[#allocation7 + $0x2d8] sm:$0xf0] }
 0x158   : > { %v3824_v3 = vor.u32 %v4084_v57, %v3821_v20  ;;  %v3760_v24 = vor.u32 %v4068_v4, %v3757_v59 }
 0x159   : > { %v4788_v6 = vadd.f32 %v1437_v8, %v1389_v34  ;;  %1644 = vmatmul.bf16.vlgmr.msra.gmra.mxu0 %v4445_v49  ;;  %v1499_v23 = vadd.f32 %v1498_v21, %v1450_v61  ;;  %v3693_v8 = vld [vmem:[#allocation7 + $0x258] sm:$0xf0] }
 0x15a   : > { %1693 = vmatmul.bf16.vlgmr.msra.gmra.mxu1 %v4447_v54  ;;  %v3696_v49 = vor.u32 %v4052_v19, %v3693_v8  ;;  %1932 = vmatpush.bf16.msrb.mxu2 %v3824_v3 }
 0x15b   : > { %1742 = vmatmul.bf16.vlgmr.msra.gmra.mxu2 %v4449_v55  ;;  %1883 = vmatpush.bf16.msrb.mxu1 %v3760_v24 }
 0x15c   : > { %1791 = vmatmul.bf16.vlgmr.msra.gmra.mxu3 %v4451_v58  ;;  %1834 = vmatpush.bf16.msrb.mxu0 %v3696_v49  ;;  %v3877_v49 = vld [vmem:[#allocation7 + $0x3c8] sm:$0xf0] }
 0x15e   : > { %v1547_v36 = vpop.f32.mrf.mxu2  ;;  %v1451_v33 = vpop.f32.mrf.mxu0 }
 0x15f   : > { %v1548_v38 = vadd.f32 %v1547_v36, %v1499_v23  ;;  %v1596_v37 = vpop.f32.mrf.mxu3  ;;  %v1500_v54 = vpop.f32.mrf.mxu1  ;;  %v1452_v58 = vadd.f32 %v1451_v33, %v4635_v32  ;;  %v3685_v33 = vld [vmem:[#allocation7 + $0x248] sm:$0xf0] }
 0x161   : > { %v1597_v55 = vadd.f32 %v1596_v37, %v1548_v38  ;;  %v1501_v35 = vadd.f32 %v1500_v54, %v1452_v58  ;;  %v4050_v38 = vld [vmem:[#allocation7 + $0x244] sm:$0xf] }
 0x162   : > { %v3688_v58 = vor.u32 %v4050_v38, %v3685_v33  ;;  %v4080_v38 = vld [vmem:[#allocation7 + $0x334] sm:$0xf] }
 0x163   : > { %2034 = vst [vmem:[%s4796_s23] sm:$0xff] %v1597_v55  ;;  %v2123_v20 = vmul.f32 %v1597_v55, %v1597_v55 }
 0x164   : > { %1835 = vmatpush.bf16.msrb.mxu0 %v3688_v58 }
 0x166   : > { %v1549_v62 = vpop.f32.mrf.mxu2  ;;  %v1454_v61 = vpop.f32.mrf.mxu0 }
 0x167   : > { %v1550_v34 = vadd.f32 %v1549_v62, %v1501_v35  ;;  %v1598_v21 = vpop.f32.mrf.mxu3  ;;  %v1503_v23 = vpop.f32.mrf.mxu1  ;;  %v1455_v32 = vadd.f32 %v1454_v61, %v4641_v2  ;;  %v3816_v2 = vor.u32 %v4082_v29, %v3813_v17 }
 0x169   : > { %v1599_v57 = vadd.f32 %v1598_v21, %v1550_v34  ;;  %1649 = vmatmul.bf16.gmra.mxu0 %v4465_v25  ;;  %v1504_v8 = vadd.f32 %v1503_v23, %v1455_v32  ;;  %v4098_v25 = vld [vmem:[#allocation7 + $0x3c4] sm:$0xf]  ;;  %1933 = vmatpush.bf16.msrb.mxu2 %v3816_v2  ;;  %v3749_v21 = vld [vmem:[#allocation7 + $0x2c8] sm:$0xf0]  ;;  %v4048_v2 = vld [vmem:[#allocation7 + $0x234] sm:$0xf] }
 0x16a   : > { %1698 = vmatmul.bf16.gmra.mxu1 %v4467_v26  ;;  %v3880_v26 = vor.u32 %v4098_v25, %v3877_v49  ;;  %v4066_v34 = vld [vmem:[#allocation7 + $0x2c4] sm:$0xf]  ;;  %v4096_v49 = vld [vmem:[#allocation7 + $0x3b4] sm:$0xf] }
 0x16b   : > { %2036 = vst [vmem:[%s4796_s23 + $0x10] sm:$0xff] %v1599_v57  ;;  %v2067_v19 = vadd.f32 %v1599_v57, %v1597_v55  ;;  %v2125_v36 = vmul.f32 %v1599_v57, %v1599_v57  ;;  %1747 = vmatmul.bf16.gmra.mxu2 %v4469_v27  ;;  %v3752_v23 = vor.u32 %v4066_v34, %v3749_v21 }
 0x16c   : > { %1796 = vmatmul.bf16.gmra.mxu3 %v4471_v28 }
 0x16d   : > { %v2155_v3 = vadd.f32 %v2125_v36, %v2123_v20  ;;  %1982 = vmatpush.bf16.msrb.mxu3 %v3880_v26  ;;  %1884 = vmatpush.bf16.msrb.mxu1 %v3752_v23 }
 0x16e   : > { %v1552_v37 = vpop.f32.mrf.mxu2  ;;  %v1456_v55 = vpop.f32.mrf.mxu0 }
 0x16f   : > { %v1553_v1 = vadd.f32 %v1552_v37, %v1504_v8  ;;  %v1601_v54 = vpop.f32.mrf.mxu3  ;;  %v1505_v35 = vpop.f32.mrf.mxu1  ;;  %v1457_v28 = vadd.f32 %v1456_v55, %v4659_v7  ;;  %v3805_v37 = vld [vmem:[#allocation7 + $0x338] sm:$0xf0] }
 0x170   : > { %v3808_v25 = vor.u32 %v4080_v38, %v3805_v37  ;;  %v4094_v37 = vld [vmem:[#allocation7 + $0x3a4] sm:$0xf] }
 0x171   : > { %v1602_v27 = vadd.f32 %v1601_v54, %v1553_v1  ;;  %v1506_v24 = vadd.f32 %v1505_v35, %v1457_v28 }
 0x172   : > { %1934 = vmatpush.bf16.msrb.mxu2 %v3808_v25 }
 0x173   : > { %2038 = vst [vmem:[%s4796_s23 + $0x20] sm:$0xff] %v1602_v27  ;;  %v2068_v4 = vadd.f32 %v2067_v19, %v1602_v27  ;;  %v2127_v59 = vmul.f32 %v1602_v27, %v1602_v27 }
 0x175   : > { %v2156_v62 = vadd.f32 %v2155_v3, %v2127_v59  ;;  %v4064_v59 = vld [vmem:[#allocation7 + $0x2b4] sm:$0xf] }
 0x176   : > { %v1554_v61 = vpop.f32.mrf.mxu2  ;;  %v1459_v20 = vpop.f32.mrf.mxu0 }
 0x177   : > { %v1555_v57 = vadd.f32 %v1554_v61, %v1506_v24  ;;  %v1603_v32 = vpop.f32.mrf.mxu3  ;;  %v1508_v36 = vpop.f32.mrf.mxu1  ;;  %v1460_v7 = vadd.f32 %v1459_v20, %v4665_v63  ;;  %v3677_v63 = vld [vmem:[#allocation7 + $0x238] sm:$0xf0] }
 0x178   : > { %v3680_v58 = vor.u32 %v4048_v2, %v3677_v63 }
 0x179   : > { %v1604_v8 = vadd.f32 %v1603_v32, %v1555_v57  ;;  %1654 = vmatmul.bf16.gmra.mxu0 %v4485_v50  ;;  %v1509_v17 = vadd.f32 %v1508_v36, %v1460_v7  ;;  %v3869_v50 = vld [vmem:[#allocation7 + $0x3b8] sm:$0xf0] }
 0x17a   : > { %1703 = vmatmul.bf16.gmra.mxu1 %v4487_v51  ;;  %v3872_v51 = vor.u32 %v4096_v49, %v3869_v50  ;;  %1836 = vmatpush.bf16.msrb.mxu0 %v3680_v58  ;;  %v4062_v58 = vld [vmem:[#allocation7 + $0x2a4] sm:$0xf] }
 0x17b   : > { %2040 = vst [vmem:[%s4796_s23 + $0x30] sm:$0xff] %v1604_v8  ;;  %v2069_v19 = vadd.f32 %v2068_v4, %v1604_v8  ;;  %v2129_v29 = vmul.f32 %v1604_v8, %v1604_v8  ;;  %1752 = vmatmul.bf16.gmra.mxu2 %v4489_v52 }
 0x17c   : > { %1801 = vmatmul.bf16.gmra.mxu3 %v4491_v53 }
 0x17d   : > { %v2157_v3 = vadd.f32 %v2156_v62, %v2129_v29  ;;  %1983 = vmatpush.bf16.msrb.mxu3 %v3872_v51  ;;  %v3741_v62 = vld [vmem:[#allocation7 + $0x2b8] sm:$0xf0]  ;;  %v3797_v29 = vld [vmem:[#allocation7 + $0x328] sm:$0xf0] }
 0x17e   : > { %v1557_v33 = vpop.f32.mrf.mxu2  ;;  %v1461_v55 = vpop.f32.mrf.mxu0  ;;  %v3744_v34 = vor.u32 %v4064_v59, %v3741_v62  ;;  %v3733_v51 = vld [vmem:[#allocation7 + $0x2a8] sm:$0xf0] }
 0x17f   : > { %v1558_v1 = vadd.f32 %v1557_v33, %v1509_v17  ;;  %v1606_v54 = vpop.f32.mrf.mxu3  ;;  %v1510_v26 = vpop.f32.mrf.mxu1  ;;  %v1462_v53 = vadd.f32 %v1461_v55, %v4683_v18 }
 0x180   : > { %1885 = vmatpush.bf16.msrb.mxu1 %v3744_v34 }
 0x181   : > { %v1607_v52 = vadd.f32 %v1606_v54, %v1558_v1  ;;  %v1511_v4 = vadd.f32 %v1510_v26, %v1462_v53 }
 0x183   : > { %2042 = vst [vmem:[%s4796_s23 + $0x40] sm:$0xff] %v1607_v52  ;;  %v2070_v35 = vadd.f32 %v2069_v19, %v1607_v52  ;;  %v2131_v27 = vmul.f32 %v1607_v52, %v1607_v52  ;;  %v4078_v19 = vld [vmem:[#allocation7 + $0x324] sm:$0xf]  ;;  %v3736_v52 = vor.u32 %v4062_v58, %v3733_v51 }
 0x184   : > { %v3800_v38 = vor.u32 %v4078_v19, %v3797_v29  ;;  %v4042_v58 = vld [vmem:[#allocation7 + $0x204] sm:$0xf] }
 0x185   : > { %v2158_v28 = vadd.f32 %v2157_v3, %v2131_v27  ;;  %v4046_v3 = vld [vmem:[#allocation7 + $0x224] sm:$0xf]  ;;  %1886 = vmatpush.bf16.msrb.mxu1 %v3736_v52 }
 0x186   : > { %v1559_v24 = vpop.f32.mrf.mxu2  ;;  %v1464_v23 = vpop.f32.mrf.mxu0  ;;  %1935 = vmatpush.bf16.msrb.mxu2 %v3800_v38  ;;  %v4090_v52 = vld [vmem:[#allocation7 + $0x384] sm:$0xf] }
 0x187   : > { %v1560_v21 = vadd.f32 %v1559_v24, %v1511_v4  ;;  %v1608_v61 = vpop.f32.mrf.mxu3  ;;  %v1513_v57 = vpop.f32.mrf.mxu1  ;;  %v1465_v18 = vadd.f32 %v1464_v23, %v4689_v0  ;;  %v3669_v0 = vld [vmem:[#allocation7 + $0x228] sm:$0xf0]  ;;  %v4044_v23 = vld [vmem:[#allocation7 + $0x214] sm:$0xf] }
 0x188   : > { %v3672_v63 = vor.u32 %v4046_v3, %v3669_v0  ;;  %v4060_v0 = vld [vmem:[#allocation7 + $0x294] sm:$0xf] }
 0x189   : > { %v1609_v32 = vadd.f32 %v1608_v61, %v1560_v21  ;;  %1659 = vmatmul.bf16.gmra.mxu0 %v4505_v13  ;;  %v1514_v7 = vadd.f32 %v1513_v57, %v1465_v18  ;;  %v3861_v13 = vld [vmem:[#allocation7 + $0x3a8] sm:$0xf0]  ;;  %v4076_v21 = vld [vmem:[#allocation7 + $0x314] sm:$0xf]  ;;  %v3789_v61 = vld [vmem:[#allocation7 + $0x318] sm:$0xf0] }
 0x18a   : > { %1708 = vmatmul.bf16.gmra.mxu1 %v4507_v14  ;;  %v3864_v14 = vor.u32 %v4094_v37, %v3861_v13  ;;  %1837 = vmatpush.bf16.msrb.mxu0 %v3672_v63  ;;  %v4092_v18 = vld [vmem:[#allocation7 + $0x394] sm:$0xf]  ;;  %v3725_v37 = vld [vmem:[#allocation7 + $0x298] sm:$0xf0] }
 0x18b   : > { %2044 = vst [vmem:[%s4796_s23 + $0x50] sm:$0xff] %v1609_v32  ;;  %v2071_v20 = vadd.f32 %v2070_v35, %v1609_v32  ;;  %v2133_v36 = vmul.f32 %v1609_v32, %v1609_v32  ;;  %1757 = vmatmul.bf16.gmra.mxu2 %v4509_v15  ;;  %v3792_v32 = vor.u32 %v4076_v21, %v3789_v61  ;;  %v3717_v21 = vld [vmem:[#allocation7 + $0x288] sm:$0xf0] }
 0x18c   : > { %1806 = vmatmul.bf16.gmra.mxu3 %v4511_v16 }
 0x18d   : > { %v2159_v8 = vadd.f32 %v2158_v28, %v2133_v36  ;;  %1984 = vmatpush.bf16.msrb.mxu3 %v3864_v14  ;;  %1936 = vmatpush.bf16.msrb.mxu2 %v3792_v32 }
 0x18e   : > { %v1562_v17 = vpop.f32.mrf.mxu2  ;;  %v1466_v25 = vpop.f32.mrf.mxu0 }
 0x18f   : > { %v1563_v2 = vadd.f32 %v1562_v17, %v1514_v7  ;;  %v1611_v33 = vpop.f32.mrf.mxu3  ;;  %v1515_v49 = vpop.f32.mrf.mxu1  ;;  %v1467_v16 = vadd.f32 %v1466_v25, %v4707_v5 }
 0x191   : > { %v1612_v15 = vadd.f32 %v1611_v33, %v1563_v2  ;;  %v1516_v55 = vadd.f32 %v1515_v49, %v1467_v16  ;;  %v3728_v2 = vor.u32 %v4060_v0, %v3725_v37 }
 0x193   : > { %2046 = vst [vmem:[%s4796_s23 + $0x60] sm:$0xff] %v1612_v15  ;;  %v2072_v50 = vadd.f32 %v2071_v20, %v1612_v15  ;;  %v2135_v1 = vmul.f32 %v1612_v15, %v1612_v15  ;;  %1887 = vmatpush.bf16.msrb.mxu1 %v3728_v2 }
 0x195   : > { %v2160_v54 = vadd.f32 %v2159_v8, %v2135_v1 }
 0x196   : > { %v1564_v26 = vpop.f32.mrf.mxu2  ;;  %v1469_v27 = vpop.f32.mrf.mxu0 }
 0x197   : > { %v1565_v53 = vadd.f32 %v1564_v26, %v1516_v55  ;;  %v1613_v35 = vpop.f32.mrf.mxu3  ;;  %v1518_v28 = vpop.f32.mrf.mxu1  ;;  %v1470_v5 = vadd.f32 %v1469_v27, %v4713_v60  ;;  %v3661_v60 = vld [vmem:[#allocation7 + $0x218] sm:$0xf0]  ;;  %v3781_v55 = vld [vmem:[#allocation7 + $0x308] sm:$0xf0] }
 0x198   : > { %v3664_v7 = vor.u32 %v4044_v23, %v3661_v60 }
 0x199   : > { %v1614_v4 = vadd.f32 %v1613_v35, %v1565_v53  ;;  %1664 = vmatmul.bf16.gmra.mxu0 %v4525_v41  ;;  %v1519_v34 = vadd.f32 %v1518_v28, %v1470_v5  ;;  %v3853_v41 = vld [vmem:[#allocation7 + $0x398] sm:$0xf0] }
 0x19a   : > { %1713 = vmatmul.bf16.gmra.mxu1 %v4527_v42  ;;  %v3856_v42 = vor.u32 %v4092_v18, %v3853_v41  ;;  %1838 = vmatpush.bf16.msrb.mxu0 %v3664_v7 }
 0x19b   : > { %2048 = vst [vmem:[%s4796_s23 + $0x70] sm:$0xff] %v1614_v4  ;;  %v2073_v59 = vadd.f32 %v2072_v50, %v1614_v4  ;;  %v2137_v62 = vmul.f32 %v1614_v4, %v1614_v4  ;;  %1762 = vmatmul.bf16.gmra.mxu2 %v4529_v43 }
 0x19c   : > { %1811 = vmatmul.bf16.gmra.mxu3 %v4531_v44 }
 0x19d   : > { %v2161_v24 = vadd.f32 %v2160_v54, %v2137_v62  ;;  %1985 = vmatpush.bf16.msrb.mxu3 %v3856_v42  ;;  %v4074_v54 = vld [vmem:[#allocation7 + $0x304] sm:$0xf] }
 0x19e   : > { %v1567_v57 = vpop.f32.mrf.mxu2  ;;  %v1471_v8 = vpop.f32.mrf.mxu0  ;;  %v3784_v26 = vor.u32 %v4074_v54, %v3781_v55 }
 0x19f   : > { %v1568_v20 = vadd.f32 %v1567_v57, %v1519_v34  ;;  %v1616_v36 = vpop.f32.mrf.mxu3  ;;  %v1520_v19 = vpop.f32.mrf.mxu1  ;;  %v1472_v44 = vadd.f32 %v1471_v8, %v4731_v56  ;;  %v4058_v34 = vld [vmem:[#allocation7 + $0x284] sm:$0xf] }
 0x1a0   : > { %1937 = vmatpush.bf16.msrb.mxu2 %v3784_v26  ;;  %v3720_v23 = vor.u32 %v4058_v34, %v3717_v21 }
 0x1a1   : > { %v1617_v43 = vadd.f32 %v1616_v36, %v1568_v20  ;;  %v1521_v38 = vadd.f32 %v1520_v19, %v1472_v44 }
 0x1a2   : > { %1888 = vmatpush.bf16.msrb.mxu1 %v3720_v23 }
 0x1a3   : > { %2050 = vst [vmem:[%s4796_s23 + $0x80] sm:$0xff] %v1617_v43  ;;  %v2074_v29 = vadd.f32 %v2073_v59, %v1617_v43  ;;  %v2139_v3 = vmul.f32 %v1617_v43, %v1617_v43 }
 0x1a5   : > { %v2162_v17 = vadd.f32 %v2161_v24, %v2139_v3 }
 0x1a6   : > { %v1569_v13 = vpop.f32.mrf.mxu2  ;;  %v1474_v63 = vpop.f32.mrf.mxu0 }
 0x1a7   : > { %v1570_v33 = vadd.f32 %v1569_v13, %v1521_v38  ;;  %v1618_v25 = vpop.f32.mrf.mxu3  ;;  %v1523_v14 = vpop.f32.mrf.mxu1  ;;  %v1475_v56 = vadd.f32 %v1474_v63, %v4737_v40  ;;  %v3653_v40 = vld [vmem:[#allocation7 + $0x208] sm:$0xf0] }
 0x1a8   : > { %v3656_v28 = vor.u32 %v4042_v58, %v3653_v40 }
 0x1a9   : > { %v1619_v49 = vadd.f32 %v1618_v25, %v1570_v33  ;;  %1669 = vmatmul.bf16.gmra.mxu0 %v4545_v9  ;;  %v1524_v1 = vadd.f32 %v1523_v14, %v1475_v56  ;;  %v3845_v9 = vld [vmem:[#allocation7 + $0x388] sm:$0xf0]  ;;  %v5879_v25 = vld [vmem:[#allocation11_spill] sm:$0xff]  ;;  %v5882_v56 = vld [vmem:[#allocation14_spill] sm:$0xff] }
 0x1aa   : > { %1718 = vmatmul.bf16.gmra.mxu1 %v4547_v10  ;;  %v3848_v10 = vor.u32 %v4090_v52, %v3845_v9  ;;  %1839 = vmatpush.bf16.msrb.mxu0 %v3656_v28 }
 0x1ab   : > { %2052 = vst [vmem:[%s4796_s23 + $0x90] sm:$0xff] %v1619_v49  ;;  %v2075_v15 = vadd.f32 %v2074_v29, %v1619_v49  ;;  %v2141_v16 = vmul.f32 %v1619_v49, %v1619_v49  ;;  %1767 = vmatmul.bf16.gmra.mxu2 %v4549_v11  ;;  %v5881_v49 = vld [vmem:[#allocation13_spill] sm:$0xff] }
 0x1ac   : > { %1816 = vmatmul.bf16.gmra.mxu3 %v4551_v12 }
 0x1ad   : > { %v2163_v50 = vadd.f32 %v2162_v17, %v2141_v16  ;;  %1986 = vmatpush.bf16.msrb.mxu3 %v3848_v10 }
 0x1ae   : > { %v1572_v51 = vpop.f32.mrf.mxu2  ;;  %v1476_v27 = vpop.f32.mrf.mxu0 }
 0x1af   : > { %v1573_v53 = vadd.f32 %v1572_v51, %v1524_v1  ;;  %v1621_v35 = vpop.f32.mrf.mxu3  ;;  %v1525_v4 = vpop.f32.mrf.mxu1  ;;  %v1477_v12 = vadd.f32 %v1476_v27, %v4755_v31 }
 0x1b1   : > { %v1622_v11 = vadd.f32 %v1621_v35, %v1573_v53  ;;  %v1526_v24 = vadd.f32 %v1525_v4, %v1477_v12  ;;  %v5883_v12 = vld [vmem:[#allocation15_spill] sm:$0xff] }
 0x1b3   : > { %2054 = vst [vmem:[%s4796_s23 + $0xa0] sm:$0xff] %v1622_v11  ;;  %v2076_v5 = vadd.f32 %v2075_v15, %v1622_v11  ;;  %v2143_v59 = vmul.f32 %v1622_v11, %v1622_v11 }
 0x1b5   : > { %v2164_v62 = vadd.f32 %v2163_v50, %v2143_v59 }
 0x1b6   : > { %v1574_v61 = vpop.f32.mrf.mxu2  ;;  %v1479_v60 = vpop.f32.mrf.mxu0 }
 0x1b7   : > { %v1575_v57 = vadd.f32 %v1574_v61, %v1526_v24  ;;  %v1623_v32 = vpop.f32.mrf.mxu3  ;;  %v1528_v18 = vpop.f32.mrf.mxu1  ;;  %v1480_v31 = vadd.f32 %v1479_v60, %v4761_v30  ;;  %v5886_v24 = vld [vmem:[#allocation18_spill] sm:$0xff] }
 0x1b9   : > { %v1624_v41 = vadd.f32 %v1623_v32, %v1575_v57  ;;  %1674 = vmatmul.bf16.gmra.mxu0 %v4565_v45  ;;  %v1529_v7 = vadd.f32 %v1528_v18, %v1480_v31 }
 0x1ba   : > { %1723 = vmatmul.bf16.gmra.mxu1 %v4567_v46 }
 0x1bb   : > { %2056 = vst [vmem:[%s4796_s23 + $0xb0] sm:$0xff] %v1624_v41  ;;  %v2077_v20 = vadd.f32 %v2076_v5, %v1624_v41  ;;  %v2145_v36 = vmul.f32 %v1624_v41, %v1624_v41  ;;  %1772 = vmatmul.bf16.gmra.mxu2 %v4569_v47 }
 0x1bc   : > { %1821 = vmatmul.bf16.gmra.mxu3 %v4571_v48 }
 0x1bd   : > { %v2165_v8 = vadd.f32 %v2164_v62, %v2145_v36  ;;  %v5884_v62 = vld [vmem:[#allocation16_spill] sm:$0xff] }
 0x1be   : > { %v1577_v42 = vpop.f32.mrf.mxu2  ;;  %v1481_v44 = vpop.f32.mrf.mxu0 }
 0x1bf   : > { %v1578_v19 = vadd.f32 %v1577_v42, %v1529_v7  ;;  %v1626_v43 = vpop.f32.mrf.mxu3  ;;  %v1530_v29 = vpop.f32.mrf.mxu1  ;;  %v1482_v45 = vadd.f32 %v1481_v44, %v4779_v22  ;;  %v5880_v22 = vld [vmem:[#allocation12_spill] sm:$0xff]  ;;  %v5889_v44 = vld [vmem:[#allocation21_spill] sm:$0xff] }
 0x1c1   : > { %v1627_v30 = vadd.f32 %v1626_v43, %v1578_v19  ;;  %v1531_v46 = vadd.f32 %v1530_v29, %v1482_v45  ;;  %v5887_v19 = vld [vmem:[#allocation19_spill] sm:$0xff]  ;;  %v5888_v43 = vld [vmem:[#allocation20_spill] sm:$0xff]  ;;  %v5890_v29 = vld [vmem:[#allocation22_spill] sm:$0xff] }
 0x1c3   : > { %2058 = vst [vmem:[%s4796_s23 + $0xc0] sm:$0xff] %v1627_v30  ;;  %v2078_v3 = vadd.f32 %v2077_v20, %v1627_v30  ;;  %v2147_v17 = vmul.f32 %v1627_v30, %v1627_v30 }
 0x1c5   : > { %v2166_v38 = vadd.f32 %v2165_v8, %v2147_v17 }
 0x1c6   : > { %v1579_v0 = vpop.f32.mrf.mxu2  ;;  %v1484_v48 = vpop.f32.mrf.mxu0 }
 0x1c7   : > { %v1580_v47 = vadd.f32 %v1579_v0, %v1531_v46  ;;  %v1628_v37 = vpop.f32.mrf.mxu3  ;;  %v1533_v13 = vpop.f32.mrf.mxu1  ;;  %v1485_v33 = vadd.f32 %v1484_v48, %v4785_v39 }
 0x1c9   : > { %v1629_v2 = vadd.f32 %v1628_v37, %v1580_v47  ;;  %1679 = vmatmul.bf16.gmra.mxu0 %v5879_v25  ;;  %v1534_v16 = vadd.f32 %v1533_v13, %v1485_v33 }
 0x1ca   : > { %1728 = vmatmul.bf16.gmra.mxu1 %v5880_v22  ;;  %v5893_v22 = vld [vmem:[#allocation25_spill] sm:$0xff] }
 0x1cb   : > { %2060 = vst [vmem:[%s4796_s23 + $0xd0] sm:$0xff] %v1629_v2  ;;  %v2079_v63 = vadd.f32 %v2078_v3, %v1629_v2  ;;  %v2149_v14 = vmul.f32 %v1629_v2, %v1629_v2  ;;  %1777 = vmatmul.bf16.gmra.mxu2 %v5881_v49  ;;  %v5894_v49 = vld [vmem:[#allocation26_spill] sm:$0xff] }
 0x1cc   : > { %1826 = vmatmul.bf16.gmra.mxu3 %v5882_v56 }
 0x1cd   : > { %v2167_v15 = vadd.f32 %v2166_v38, %v2149_v14  ;;  %v5892_v14 = vld [vmem:[#allocation24_spill] sm:$0xff] }
 0x1ce   : > { %v1582_v50 = vpop.f32.mrf.mxu2  ;;  %v1486_v55 = vpop.f32.mrf.mxu0 }
 0x1cf   : > { %v1583_v1 = vadd.f32 %v1582_v50, %v1534_v16  ;;  %v1631_v54 = vpop.f32.mrf.mxu3  ;;  %v1535_v58 = vpop.f32.mrf.mxu1  ;;  %v1487_v51 = vadd.f32 %v1486_v55, %v4788_v6  ;;  %v5885_v6 = vld [vmem:[#allocation17_spill] sm:$0xff] }
 0x1d1   : > { %v1632_v39 = vadd.f32 %v1631_v54, %v1583_v1  ;;  %v1536_v9 = vadd.f32 %v1535_v58, %v1487_v51 }
 0x1d3   : > { %2062 = vst [vmem:[%s4796_s23 + $0xe0] sm:$0xff] %v1632_v39  ;;  %v2080_v26 = vadd.f32 %v2079_v63, %v1632_v39  ;;  %v2151_v40 = vmul.f32 %v1632_v39, %v1632_v39  ;;  %v5891_v63 = vld [vmem:[#allocation23_spill] sm:$0xff] }
 0x1d5   : > { %v2168_v52 = vadd.f32 %v2167_v15, %v2151_v40 }
 0x1d6   : > { %v1584_v53 = vpop.f32.mrf.mxu2  ;;  %v1645_v28 = vpop.f32.mrf.mxu0 }
 0x1d7   : > { %v1585_v35 = vadd.f32 %v1584_v53, %v1536_v9  ;;  %v1633_v27 = vpop.f32.mrf.mxu3  ;;  %v1694_v10 = vpop.f32.mrf.mxu1  ;;  %v5895_v53 = vld [vmem:[#allocation27_spill] sm:$0xff] }
 0x1d8   : > { %v1695_v11 = vadd.f32 %v1694_v10, %v1645_v28  ;;  %v5898_v28 = vld [vmem:[#allocation30_spill] sm:$0xff] }
 0x1d9   : > { %v1634_v4 = vadd.f32 %v1633_v27, %v1585_v35  ;;  %1840 = vmatmul.bf16.vlgmr.msrb.gmra.mxu0 %v5883_v12  ;;  %v5896_v35 = vld [vmem:[#allocation28_spill] sm:$0xff]  ;;  %v5897_v27 = vld [vmem:[#allocation29_spill] sm:$0xff] }
 0x1da   : > { %1889 = vmatmul.bf16.vlgmr.msrb.gmra.mxu1 %v5884_v62 }
 0x1db   : > { %2064 = vst [vmem:[%s4796_s23 + $0xf0] sm:$0xff] %v1634_v4  ;;  %v4857_v5 = vadd.f32 %v2080_v26, %v1634_v4  ;;  %v2153_v59 = vmul.f32 %v1634_v4, %v1634_v4  ;;  %1938 = vmatmul.bf16.vlgmr.msrb.gmra.mxu2 %v5885_v6 }
 0x1dc   : > { %1987 = vmatmul.bf16.vlgmr.msrb.gmra.mxu3 %v5886_v24 }
 0x1dd   : > { %v4862_v34 = vadd.f32 %v2168_v52, %v2153_v59 }
 0x1de   : > { %v1743_v21 = vpop.f32.mrf.mxu2  ;;  %v1647_v57 = vpop.f32.mrf.mxu0 }
 0x1df   : > { %v1744_v61 = vadd.f32 %v1743_v21, %v1695_v11  ;;  %v1792_v23 = vpop.f32.mrf.mxu3  ;;  %v1696_v32 = vpop.f32.mrf.mxu1 }
 0x1e0   : > { %v1697_v18 = vadd.f32 %v1696_v32, %v1647_v57 }
 0x1e1   : > { %v4864_v60 = vadd.f32 %v1792_v23, %v1744_v61 }
 0x1e6   : > { %v1745_v41 = vpop.f32.mrf.mxu2  ;;  %v1650_v36 = vpop.f32.mrf.mxu0 }
 0x1e7   : > { %v1746_v31 = vadd.f32 %v1745_v41, %v1697_v18  ;;  %v1794_v20 = vpop.f32.mrf.mxu3  ;;  %v1699_v8 = vpop.f32.mrf.mxu1  ;;  %v5899_v41 = vld [vmem:[#allocation31_spill] sm:$0xff] }
 0x1e8   : > { %v1700_v42 = vadd.f32 %v1699_v8, %v1650_v36  ;;  %v5902_v36 = vld [vmem:[#allocation34_spill] sm:$0xff] }
 0x1e9   : > { %v4866_v7 = vadd.f32 %v1794_v20, %v1746_v31  ;;  %1845 = vmatmul.bf16.gmra.mxu0 %v5887_v19  ;;  %v5900_v31 = vld [vmem:[#allocation32_spill] sm:$0xff]  ;;  %v5901_v20 = vld [vmem:[#allocation33_spill] sm:$0xff] }
 0x1ea   : > { %1894 = vmatmul.bf16.gmra.mxu1 %v5888_v43 }
 0x1eb   : > { %1943 = vmatmul.bf16.gmra.mxu2 %v5889_v44 }
 0x1ec   : > { %1992 = vmatmul.bf16.gmra.mxu3 %v5890_v29 }
 0x1ee   : > { %v1748_v30 = vpop.f32.mrf.mxu2  ;;  %v1652_v17 = vpop.f32.mrf.mxu0 }
 0x1ef   : > { %v1749_v45 = vadd.f32 %v1748_v30, %v1700_v42  ;;  %v1797_v3 = vpop.f32.mrf.mxu3  ;;  %v1701_v38 = vpop.f32.mrf.mxu1 }
 0x1f0   : > { %v1702_v0 = vadd.f32 %v1701_v38, %v1652_v17 }
 0x1f1   : > { %v4872_v46 = vadd.f32 %v1797_v3, %v1749_v45 }
 0x1f6   : > { %v1750_v47 = vpop.f32.mrf.mxu2  ;;  %v1655_v13 = vpop.f32.mrf.mxu0 }
 0x1f7   : > { %v1751_v37 = vadd.f32 %v1750_v47, %v1702_v0  ;;  %v1799_v48 = vpop.f32.mrf.mxu3  ;;  %v1704_v2 = vpop.f32.mrf.mxu1 }
 0x1f8   : > { %v1705_v25 = vadd.f32 %v1704_v2, %v1655_v13  ;;  %v5904_v13 = vld [vmem:[#allocation36_spill] sm:$0xff]  ;;  %v5905_v2 = vld [vmem:[#allocation37_spill] sm:$0xff] }
 0x1f9   : > { %v4874_v33 = vadd.f32 %v1799_v48, %v1751_v37  ;;  %1850 = vmatmul.bf16.gmra.mxu0 %v5891_v63  ;;  %v5903_v48 = vld [vmem:[#allocation35_spill] sm:$0xff] }
 0x1fa   : > { %1899 = vmatmul.bf16.gmra.mxu1 %v5892_v14 }
 0x1fb   : > { %1948 = vmatmul.bf16.gmra.mxu2 %v5893_v22 }
 0x1fc   : > { %1997 = vmatmul.bf16.gmra.mxu3 %v5894_v49 }
 0x1fe   : > { %v1753_v56 = vpop.f32.mrf.mxu2  ;;  %v1657_v50 = vpop.f32.mrf.mxu0 }
 0x1ff   : > { %v1754_v15 = vadd.f32 %v1753_v56, %v1705_v25  ;;  %v1802_v16 = vpop.f32.mrf.mxu3  ;;  %v1706_v1 = vpop.f32.mrf.mxu1  ;;  %v5906_v25 = vld [vmem:[#allocation38_spill] sm:$0xff] }
 0x200   : > { %v1707_v55 = vadd.f32 %v1706_v1, %v1657_v50 }
 0x201   : > { %v4880_v54 = vadd.f32 %v1802_v16, %v1754_v15 }
 0x206   : > { %v1755_v58 = vpop.f32.mrf.mxu2  ;;  %v1660_v26 = vpop.f32.mrf.mxu0 }
 0x207   : > { %v1756_v39 = vadd.f32 %v1755_v58, %v1707_v55  ;;  %v1804_v51 = vpop.f32.mrf.mxu3  ;;  %v1709_v40 = vpop.f32.mrf.mxu1 }
 0x208   : > { %v1710_v9 = vadd.f32 %v1709_v40, %v1660_v26  ;;  %v5907_v40 = vld [vmem:[#allocation39_spill] sm:$0xff] }
 0x209   : > { %v4882_v52 = vadd.f32 %v1804_v51, %v1756_v39  ;;  %1855 = vmatmul.bf16.gmra.mxu0 %v5895_v53  ;;  %v5909_v53 = vld [vmem:[#allocation41_spill] sm:$0xff] }
 0x20a   : > { %1904 = vmatmul.bf16.gmra.mxu1 %v5896_v35  ;;  %v5910_v35 = vld [vmem:[#allocation42_spill] sm:$0xff] }
 0x20b   : > { %1953 = vmatmul.bf16.gmra.mxu2 %v5897_v27 }
 0x20c   : > { %2002 = vmatmul.bf16.gmra.mxu3 %v5898_v28 }
 0x20e   : > { %v1758_v10 = vpop.f32.mrf.mxu2  ;;  %v1662_v12 = vpop.f32.mrf.mxu0 }
 0x20f   : > { %v1759_v4 = vadd.f32 %v1758_v10, %v1710_v9  ;;  %v1807_v11 = vpop.f32.mrf.mxu3  ;;  %v1711_v59 = vpop.f32.mrf.mxu1  ;;  %v5908_v9 = vld [vmem:[#allocation40_spill] sm:$0xff] }
 0x210   : > { %v1712_v6 = vadd.f32 %v1711_v59, %v1662_v12 }
 0x211   : > { %v4888_v62 = vadd.f32 %v1807_v11, %v1759_v4 }
 0x216   : > { %v1760_v24 = vpop.f32.mrf.mxu2  ;;  %v1665_v23 = vpop.f32.mrf.mxu0 }
 0x217   : > { %v1761_v21 = vadd.f32 %v1760_v24, %v1712_v6  ;;  %v1809_v61 = vpop.f32.mrf.mxu3  ;;  %v1714_v57 = vpop.f32.mrf.mxu1 }
 0x218   : > { %v1715_v18 = vadd.f32 %v1714_v57, %v1665_v23 }
 0x219   : > { %v4890_v32 = vadd.f32 %v1809_v61, %v1761_v21  ;;  %1860 = vmatmul.bf16.gmra.mxu0 %v5899_v41  ;;  %v5911_v41 = vld [vmem:[#allocation43_spill] sm:$0xff] }
 0x21a   : > { %1909 = vmatmul.bf16.gmra.mxu1 %v5900_v31  ;;  %v5912_v31 = vld [vmem:[#allocation44_spill] sm:$0xff] }
 0x21b   : > { %1958 = vmatmul.bf16.gmra.mxu2 %v5901_v20  ;;  %v5913_v20 = vld [vmem:[#allocation45_spill] sm:$0xff] }
 0x21c   : > { %2007 = vmatmul.bf16.gmra.mxu3 %v5902_v36  ;;  %v5914_v36 = vld [vmem:[#allocation46_spill] sm:$0xff] }
 0x21e   : > { %v1763_v8 = vpop.f32.mrf.mxu2  ;;  %v1667_v43 = vpop.f32.mrf.mxu0 }
 0x21f   : > { %v1764_v42 = vadd.f32 %v1763_v8, %v1715_v18  ;;  %v1812_v19 = vpop.f32.mrf.mxu3  ;;  %v1716_v44 = vpop.f32.mrf.mxu1 }
 0x220   : > { %v1717_v30 = vadd.f32 %v1716_v44, %v1667_v43 }
 0x221   : > { %v4896_v29 = vadd.f32 %v1812_v19, %v1764_v42 }
 0x226   : > { %v1765_v45 = vpop.f32.mrf.mxu2  ;;  %v1670_v38 = vpop.f32.mrf.mxu0 }
 0x227   : > { %v1766_v3 = vadd.f32 %v1765_v45, %v1717_v30  ;;  %v1814_v17 = vpop.f32.mrf.mxu3  ;;  %v1719_v0 = vpop.f32.mrf.mxu1 }
 0x228   : > { %v1720_v37 = vadd.f32 %v1719_v0, %v1670_v38 }
 0x229   : > { %v4898_v47 = vadd.f32 %v1814_v17, %v1766_v3  ;;  %1865 = vmatmul.bf16.gmra.mxu0 %v5903_v48 }
 0x22a   : > { %1914 = vmatmul.bf16.gmra.mxu1 %v5904_v13 }
 0x22b   : > { %1963 = vmatmul.bf16.gmra.mxu2 %v5905_v2 }
 0x22c   : > { %2012 = vmatmul.bf16.gmra.mxu3 %v5906_v25 }
 0x22e   : > { %v1768_v63 = vpop.f32.mrf.mxu2  ;;  %v1672_v49 = vpop.f32.mrf.mxu0 }
 0x22f   : > { %v1769_v14 = vadd.f32 %v1768_v63, %v1720_v37  ;;  %v1817_v22 = vpop.f32.mrf.mxu3  ;;  %v1721_v56 = vpop.f32.mrf.mxu1 }
 0x230   : > { %v1722_v16 = vadd.f32 %v1721_v56, %v1672_v49 }
 0x231   : > { %v4904_v15 = vadd.f32 %v1817_v22, %v1769_v14 }
 0x236   : > { %v1770_v50 = vpop.f32.mrf.mxu2  ;;  %v1675_v58 = vpop.f32.mrf.mxu0 }
 0x237   : > { %v1771_v1 = vadd.f32 %v1770_v50, %v1722_v16  ;;  %v1819_v55 = vpop.f32.mrf.mxu3  ;;  %v1724_v39 = vpop.f32.mrf.mxu1 }
 0x238   : > { %v1725_v26 = vadd.f32 %v1724_v39, %v1675_v58 }
 0x239   : > { %v4906_v51 = vadd.f32 %v1819_v55, %v1771_v1  ;;  %1870 = vmatmul.bf16.gmra.mxu0 %v5907_v40 }
 0x23a   : > { %1919 = vmatmul.bf16.gmra.mxu1 %v5908_v9 }
 0x23b   : > { %1968 = vmatmul.bf16.gmra.mxu2 %v5909_v53 }
 0x23c   : > { %2017 = vmatmul.bf16.gmra.mxu3 %v5910_v35 }
 0x23e   : > { %v1773_v27 = vpop.f32.mrf.mxu2  ;;  %v1677_v4 = vpop.f32.mrf.mxu0 }
 0x23f   : > { %v1774_v28 = vadd.f32 %v1773_v27, %v1725_v26  ;;  %v1822_v10 = vpop.f32.mrf.mxu3  ;;  %v1726_v11 = vpop.f32.mrf.mxu1 }
 0x240   : > { %v1727_v59 = vadd.f32 %v1726_v11, %v1677_v4 }
 0x241   : > { %v4912_v12 = vadd.f32 %v1822_v10, %v1774_v28 }
 0x246   : > { %v1775_v6 = vpop.f32.mrf.mxu2  ;;  %v1680_v61 = vpop.f32.mrf.mxu0 }
 0x247   : > { %v1776_v24 = vadd.f32 %v1775_v6, %v1727_v59  ;;  %v1824_v21 = vpop.f32.mrf.mxu3  ;;  %v1729_v23 = vpop.f32.mrf.mxu1 }
 0x248   : > { %v1730_v18 = vadd.f32 %v1729_v23, %v1680_v61 }
 0x249   : > { %v4914_v57 = vadd.f32 %v1824_v21, %v1776_v24  ;;  %1875 = vmatmul.bf16.gmra.mxu0 %v5911_v41 }
 0x24a   : > { %1924 = vmatmul.bf16.gmra.mxu1 %v5912_v31 }
 0x24b   : > { %1973 = vmatmul.bf16.gmra.mxu2 %v5913_v20 }
 0x24c   : > { %2022 = vmatmul.bf16.gmra.mxu3 %v5914_v36 }
 0x24e   : > { %v1778_v8 = vpop.f32.mrf.mxu2  ;;  %v1682_v43 = vpop.f32.mrf.mxu0 }
 0x24f   : > { %v1779_v42 = vadd.f32 %v1778_v8, %v1730_v18  ;;  %v1827_v19 = vpop.f32.mrf.mxu3  ;;  %v1731_v44 = vpop.f32.mrf.mxu1 }
 0x250   : > { %v1732_v45 = vadd.f32 %v1731_v44, %v1682_v43 }
 0x251   : > { %v4920_v30 = vadd.f32 %v1827_v19, %v1779_v42 }
 0x256   : > { %v1780_v3 = vpop.f32.mrf.mxu2  ;;  %v1841_v0 = vpop.f32.mrf.mxu0 }
 0x257   : > { %v1781_v17 = vadd.f32 %v1780_v3, %v1732_v45  ;;  %v1829_v38 = vpop.f32.mrf.mxu3  ;;  %v1890_v37 = vpop.f32.mrf.mxu1  ;;  %v1842_v13 = vadd.f32 %v1841_v0, %v4864_v60 }
 0x259   : > { %v4922_v48 = vadd.f32 %v1829_v38, %v1781_v17  ;;  %v1891_v2 = vadd.f32 %v1890_v37, %v1842_v13 }
 0x25e   : > { %v1939_v25 = vpop.f32.mrf.mxu2  ;;  %v1843_v22 = vpop.f32.mrf.mxu0 }
 0x25f   : > { %v1940_v63 = vadd.f32 %v1939_v25, %v1891_v2  ;;  %v1988_v14 = vpop.f32.mrf.mxu3  ;;  %v1892_v49 = vpop.f32.mrf.mxu1  ;;  %v1844_v16 = vadd.f32 %v1843_v22, %v4866_v7 }
 0x261   : > { %v1989_v56 = vadd.f32 %v1988_v14, %v1940_v63  ;;  %v1893_v50 = vadd.f32 %v1892_v49, %v1844_v16 }
 0x263   : > { %2035 = vst [vmem:[%s4796_s23 + $0x8] sm:$0xff] %v1989_v56  ;;  %v2124_v9 = vmul.f32 %v1989_v56, %v1989_v56 }
 0x266   : > { %v1941_v1 = vpop.f32.mrf.mxu2  ;;  %v1846_v39 = vpop.f32.mrf.mxu0 }
 0x267   : > { %v1942_v55 = vadd.f32 %v1941_v1, %v1893_v50  ;;  %v1990_v58 = vpop.f32.mrf.mxu3  ;;  %v1895_v26 = vpop.f32.mrf.mxu1  ;;  %v1847_v60 = vadd.f32 %v1846_v39, %v4872_v46 }
 0x269   : > { %v1991_v40 = vadd.f32 %v1990_v58, %v1942_v55  ;;  %v1896_v28 = vadd.f32 %v1895_v26, %v1847_v60 }
 0x26b   : > { %2037 = vst [vmem:[%s4796_s23 + $0x18] sm:$0xff] %v1991_v40  ;;  %v2088_v53 = vadd.f32 %v1991_v40, %v1989_v56  ;;  %v2126_v35 = vmul.f32 %v1991_v40, %v1991_v40 }
 0x26d   : > { %v2176_v27 = vadd.f32 %v2126_v35, %v2124_v9 }
 0x26e   : > { %v1944_v10 = vpop.f32.mrf.mxu2  ;;  %v1848_v11 = vpop.f32.mrf.mxu0 }
 0x26f   : > { %v1945_v4 = vadd.f32 %v1944_v10, %v1896_v28  ;;  %v1993_v7 = vpop.f32.mrf.mxu3  ;;  %v1897_v59 = vpop.f32.mrf.mxu1  ;;  %v1849_v24 = vadd.f32 %v1848_v11, %v4874_v33 }
 0x271   : > { %v1994_v6 = vadd.f32 %v1993_v7, %v1945_v4  ;;  %v1898_v46 = vadd.f32 %v1897_v59, %v1849_v24 }
 0x273   : > { %2039 = vst [vmem:[%s4796_s23 + $0x28] sm:$0xff] %v1994_v6  ;;  %v2089_v21 = vadd.f32 %v2088_v53, %v1994_v6  ;;  %v2128_v61 = vmul.f32 %v1994_v6, %v1994_v6 }
 0x275   : > { %v2177_v23 = vadd.f32 %v2176_v27, %v2128_v61 }
 0x276   : > { %v1946_v18 = vpop.f32.mrf.mxu2  ;;  %v1851_v20 = vpop.f32.mrf.mxu0 }
 0x277   : > { %v1947_v41 = vadd.f32 %v1946_v18, %v1898_v46  ;;  %v1995_v31 = vpop.f32.mrf.mxu3  ;;  %v1900_v36 = vpop.f32.mrf.mxu1  ;;  %v1852_v42 = vadd.f32 %v1851_v20, %v4880_v54 }
 0x279   : > { %v1996_v8 = vadd.f32 %v1995_v31, %v1947_v41  ;;  %v1901_v45 = vadd.f32 %v1900_v36, %v1852_v42 }
 0x27b   : > { %2041 = vst [vmem:[%s4796_s23 + $0x38] sm:$0xff] %v1996_v8  ;;  %v2090_v19 = vadd.f32 %v2089_v21, %v1996_v8  ;;  %v2130_v43 = vmul.f32 %v1996_v8, %v1996_v8 }
 0x27d   : > { %v2178_v44 = vadd.f32 %v2177_v23, %v2130_v43 }
 0x27e   : > { %v1949_v33 = vpop.f32.mrf.mxu2  ;;  %v1853_v38 = vpop.f32.mrf.mxu0 }
 0x27f   : > { %v1950_v3 = vadd.f32 %v1949_v33, %v1901_v45  ;;  %v1998_v17 = vpop.f32.mrf.mxu3  ;;  %v1902_v0 = vpop.f32.mrf.mxu1  ;;  %v1854_v13 = vadd.f32 %v1853_v38, %v4882_v52 }
 0x281   : > { %v1999_v37 = vadd.f32 %v1998_v17, %v1950_v3  ;;  %v1903_v14 = vadd.f32 %v1902_v0, %v1854_v13 }
 0x283   : > { %2043 = vst [vmem:[%s4796_s23 + $0x48] sm:$0xff] %v1999_v37  ;;  %v2091_v2 = vadd.f32 %v2090_v19, %v1999_v37  ;;  %v2132_v25 = vmul.f32 %v1999_v37, %v1999_v37 }
 0x285   : > { %v2179_v63 = vadd.f32 %v2178_v44, %v2132_v25 }
 0x286   : > { %v1951_v54 = vpop.f32.mrf.mxu2  ;;  %v1856_v56 = vpop.f32.mrf.mxu0 }
 0x287   : > { %v1952_v22 = vadd.f32 %v1951_v54, %v1903_v14  ;;  %v2000_v49 = vpop.f32.mrf.mxu3  ;;  %v1905_v16 = vpop.f32.mrf.mxu1  ;;  %v1857_v1 = vadd.f32 %v1856_v56, %v4888_v62 }
 0x289   : > { %v2001_v50 = vadd.f32 %v2000_v49, %v1952_v22  ;;  %v1906_v26 = vadd.f32 %v1905_v16, %v1857_v1 }
 0x28b   : > { %2045 = vst [vmem:[%s4796_s23 + $0x58] sm:$0xff] %v2001_v50  ;;  %v2092_v55 = vadd.f32 %v2091_v2, %v2001_v50  ;;  %v2134_v58 = vmul.f32 %v2001_v50, %v2001_v50 }
 0x28d   : > { %v2180_v39 = vadd.f32 %v2179_v63, %v2134_v58 }
 0x28e   : > { %v1954_v52 = vpop.f32.mrf.mxu2  ;;  %v1858_v9 = vpop.f32.mrf.mxu0 }
 0x28f   : > { %v1955_v40 = vadd.f32 %v1954_v52, %v1906_v26  ;;  %v2003_v60 = vpop.f32.mrf.mxu3  ;;  %v1907_v53 = vpop.f32.mrf.mxu1  ;;  %v1859_v27 = vadd.f32 %v1858_v9, %v4890_v32 }
 0x291   : > { %v2004_v35 = vadd.f32 %v2003_v60, %v1955_v40  ;;  %v1908_v7 = vadd.f32 %v1907_v53, %v1859_v27 }
 0x293   : > { %2047 = vst [vmem:[%s4796_s23 + $0x68] sm:$0xff] %v2004_v35  ;;  %v2093_v28 = vadd.f32 %v2092_v55, %v2004_v35  ;;  %v2136_v10 = vmul.f32 %v2004_v35, %v2004_v35 }
 0x295   : > { %v2181_v4 = vadd.f32 %v2180_v39, %v2136_v10 }
 0x296   : > { %v1956_v62 = vpop.f32.mrf.mxu2  ;;  %v1861_v6 = vpop.f32.mrf.mxu0 }
 0x297   : > { %v1957_v11 = vadd.f32 %v1956_v62, %v1908_v7  ;;  %v2005_v59 = vpop.f32.mrf.mxu3  ;;  %v1910_v24 = vpop.f32.mrf.mxu1  ;;  %v1862_v61 = vadd.f32 %v1861_v6, %v4896_v29 }
 0x299   : > { %v2006_v21 = vadd.f32 %v2005_v59, %v1957_v11  ;;  %v1911_v41 = vadd.f32 %v1910_v24, %v1862_v61 }
 0x29b   : > { %2049 = vst [vmem:[%s4796_s23 + $0x78] sm:$0xff] %v2006_v21  ;;  %v2094_v23 = vadd.f32 %v2093_v28, %v2006_v21  ;;  %v2138_v46 = vmul.f32 %v2006_v21, %v2006_v21 }
 0x29d   : > { %v2182_v18 = vadd.f32 %v2181_v4, %v2138_v46 }
 0x29e   : > { %v1959_v32 = vpop.f32.mrf.mxu2  ;;  %v1863_v36 = vpop.f32.mrf.mxu0 }
 0x29f   : > { %v1960_v31 = vadd.f32 %v1959_v32, %v1911_v41  ;;  %v2008_v20 = vpop.f32.mrf.mxu3  ;;  %v1912_v8 = vpop.f32.mrf.mxu1  ;;  %v1864_v19 = vadd.f32 %v1863_v36, %v4898_v47 }
 0x2a1   : > { %v2009_v42 = vadd.f32 %v2008_v20, %v1960_v31  ;;  %v1913_v33 = vadd.f32 %v1912_v8, %v1864_v19 }
 0x2a3   : > { %2051 = vst [vmem:[%s4796_s23 + $0x88] sm:$0xff] %v2009_v42  ;;  %v2095_v43 = vadd.f32 %v2094_v23, %v2009_v42  ;;  %v2140_v44 = vmul.f32 %v2009_v42, %v2009_v42 }
 0x2a5   : > { %v2183_v45 = vadd.f32 %v2182_v18, %v2140_v44 }
 0x2a6   : > { %v1961_v29 = vpop.f32.mrf.mxu2  ;;  %v1866_v38 = vpop.f32.mrf.mxu0 }
 0x2a7   : > { %v1962_v3 = vadd.f32 %v1961_v29, %v1913_v33  ;;  %v2010_v17 = vpop.f32.mrf.mxu3  ;;  %v1915_v0 = vpop.f32.mrf.mxu1  ;;  %v1867_v13 = vadd.f32 %v1866_v38, %v4904_v15 }
 0x2a9   : > { %v2011_v37 = vadd.f32 %v2010_v17, %v1962_v3  ;;  %v1916_v14 = vadd.f32 %v1915_v0, %v1867_v13 }
 0x2ab   : > { %2053 = vst [vmem:[%s4796_s23 + $0x98] sm:$0xff] %v2011_v37  ;;  %v2096_v2 = vadd.f32 %v2095_v43, %v2011_v37  ;;  %v2142_v25 = vmul.f32 %v2011_v37, %v2011_v37 }
 0x2ad   : > { %v2184_v63 = vadd.f32 %v2183_v45, %v2142_v25 }
 0x2ae   : > { %v1964_v47 = vpop.f32.mrf.mxu2  ;;  %v1868_v49 = vpop.f32.mrf.mxu0 }
 0x2af   : > { %v1965_v54 = vadd.f32 %v1964_v47, %v1916_v14  ;;  %v2013_v22 = vpop.f32.mrf.mxu3  ;;  %v1917_v56 = vpop.f32.mrf.mxu1  ;;  %v1869_v50 = vadd.f32 %v1868_v49, %v4906_v51 }
 0x2b1   : > { %v2014_v16 = vadd.f32 %v2013_v22, %v1965_v54  ;;  %v1918_v39 = vadd.f32 %v1917_v56, %v1869_v50 }
 0x2b3   : > { %2055 = vst [vmem:[%s4796_s23 + $0xa8] sm:$0xff] %v2014_v16  ;;  %v2097_v1 = vadd.f32 %v2096_v2, %v2014_v16  ;;  %v2144_v55 = vmul.f32 %v2014_v16, %v2014_v16  ;;  %v2170_v2 = vrot.slane %v4862_v34, 4 }
 0x2b5   : > { %v2185_v58 = vadd.f32 %v2184_v63, %v2144_v55  ;;  %v2171_v54 = vadd.f32 %v2170_v2, %v4862_v34 }
 0x2b6   : > { %v1966_v15 = vpop.f32.mrf.mxu2  ;;  %v1871_v40 = vpop.f32.mrf.mxu0 }
 0x2b7   : > { %v1967_v26 = vadd.f32 %v1966_v15, %v1918_v39  ;;  %v2015_v52 = vpop.f32.mrf.mxu3  ;;  %v1920_v60 = vpop.f32.mrf.mxu1  ;;  %v1872_v53 = vadd.f32 %v1871_v40, %v4912_v12  ;;  %v2172_v50 = vrot.slane %v2171_v54, 2 }
 0x2b9   : > { %v2016_v9 = vadd.f32 %v2015_v52, %v1967_v26  ;;  %v1921_v10 = vadd.f32 %v1920_v60, %v1872_v53  ;;  %v2173_v26 = vadd.f32 %v2172_v50, %v2171_v54 }
 0x2bb   : > { %2057 = vst [vmem:[%s4796_s23 + $0xb8] sm:$0xff] %v2016_v9  ;;  %v2098_v35 = vadd.f32 %v2097_v1, %v2016_v9  ;;  %v2146_v27 = vmul.f32 %v2016_v9, %v2016_v9  ;;  %v2174_v53 = vrot.slane %v2173_v26, 1 }
 0x2bd   : > { %v2186_v28 = vadd.f32 %v2185_v58, %v2146_v27 }
 0x2be   : > { %v1969_v51 = vpop.f32.mrf.mxu2  ;;  %v1873_v62 = vpop.f32.mrf.mxu0 }
 0x2bf   : > { %v1970_v4 = vadd.f32 %v1969_v51, %v1921_v10  ;;  %v2018_v7 = vpop.f32.mrf.mxu3  ;;  %v1922_v11 = vpop.f32.mrf.mxu1  ;;  %v1874_v6 = vadd.f32 %v1873_v62, %v4914_v57  ;;  %v2066_v10 = vld [vmem:[#allocation3] ss:$2 sm:$0x3] }
 0x2c1   : > { %v2019_v59 = vadd.f32 %v2018_v7, %v1970_v4  ;;  %v1923_v23 = vadd.f32 %v1922_v11, %v1874_v6  ;;  %v2175_v7 = vadd.f32 %v2174_v53, %v2173_v26  ;;  %v2122_v11 = vld [vmem:[#allocation3 + $0x1] ss:$2 sm:$0x3] }
 0x2c3   : > { %2059 = vst [vmem:[%s4796_s23 + $0xc8] sm:$0xff] %v2019_v59  ;;  %v2099_v24 = vadd.f32 %v2098_v35, %v2019_v59  ;;  %v2148_v21 = vmul.f32 %v2019_v59, %v2019_v59  ;;  %v2116_v35 = vlaneseq }
 0x2c5   : > { %v2187_v61 = vadd.f32 %v2186_v28, %v2148_v21  ;;  %vm2118_vm1 = vcmp.lt.s32.totalorder %v2116_v35, 256 }
 0x2c6   : > { %v1971_v12 = vpop.f32.mrf.mxu2  ;;  %v1876_v41 = vpop.f32.mrf.mxu0 }
 0x2c7   : > { %v1972_v46 = vadd.f32 %v1971_v12, %v1923_v23  ;;  %v2020_v18 = vpop.f32.mrf.mxu3  ;;  %v1877_v31 = vadd.f32 %v1876_v41, %v4920_v30  ;;  %v1925_v20 = vpop.f32.mrf.mxu1  ;;  %v2082_v30 = vrot.slane %v4857_v5, 4 }
 0x2c9   : > { %v2021_v32 = vadd.f32 %v2020_v18, %v1972_v46  ;;  %v1926_v19 = vadd.f32 %v1925_v20, %v1877_v31  ;;  %v2083_v14 = vadd.f32 %v2082_v30, %v4857_v5 }
 0x2cb   : > { %2061 = vst [vmem:[%s4796_s23 + $0xd8] sm:$0xff] %v2021_v32  ;;  %v2100_v36 = vadd.f32 %v2099_v24, %v2021_v32  ;;  %v2150_v8 = vmul.f32 %v2021_v32, %v2021_v32  ;;  %v2084_v49 = vrot.slane %v2083_v14, 2 }
 0x2cd   : > { %v2188_v42 = vadd.f32 %v2187_v61, %v2150_v8  ;;  %v2085_v58 = vadd.f32 %v2084_v49, %v2083_v14 }
 0x2ce   : > { %v1974_v57 = vpop.f32.mrf.mxu2  ;;  %v1878_v45 = vpop.f32.mrf.mxu0 }
 0x2cf   : > { %v1975_v43 = vadd.f32 %v1974_v57, %v1926_v19  ;;  %v2023_v44 = vpop.f32.mrf.mxu3  ;;  %v1879_v29 = vadd.f32 %v1878_v45, %v4922_v48  ;;  %v1927_v38 = vpop.f32.mrf.mxu1  ;;  %v2086_v60 = vrot.slane %v2085_v58, 1 }
 0x2d1   : > { %v2024_v33 = vadd.f32 %v2023_v44, %v1975_v43  ;;  %v1928_v37 = vadd.f32 %v1927_v38, %v1879_v29  ;;  %v2087_v28 = vadd.f32 %v2086_v60, %v2085_v58 }
 0x2d3   : > { %2063 = vst [vmem:[%s4796_s23 + $0xe8] sm:$0xff] %v2024_v33  ;;  %v2101_v3 = vadd.f32 %v2100_v36, %v2024_v33  ;;  %v2152_v17 = vmul.f32 %v2024_v33, %v2024_v33 }
 0x2d5   : > { %v2189_v0 = vadd.f32 %v2188_v42, %v2152_v17 }
 0x2d6   : > { %v1976_v13 = vpop.f32.mrf.mxu2 }
 0x2d7   : > { %v1977_v25 = vadd.f32 %v1976_v13, %v1928_v37  ;;  %v2025_v63 = vpop.f32.mrf.mxu3 }
 0x2d9   : > { %v2026_v47 = vadd.f32 %v2025_v63, %v1977_v25 }
 0x2db   : > { %2065 = vst [vmem:[%s4796_s23 + $0xf8] sm:$0xff] %v2026_v47  ;;  %v2102_v48 = vadd.f32 %v2101_v3, %v2026_v47  ;;  %v2154_v22 = vmul.f32 %v2026_v47, %v2026_v47 }
 0x2dd   : > { %v2103_v56 = vrot.slane %v2102_v48, 4  ;;  %v2190_v16 = vadd.f32 %v2189_v0, %v2154_v22 }
 0x2df   : > { %v2104_v1 = vadd.f32 %v2103_v56, %v2102_v48  ;;  %v2191_v55 = vrot.slane %v2190_v16, 4 }
 0x2e1   : > { %v2105_v39 = vrot.slane %v2104_v1, 2  ;;  %v2192_v15 = vadd.f32 %v2191_v55, %v2190_v16 }
 0x2e3   : > { %v2106_v52 = vadd.f32 %v2105_v39, %v2104_v1  ;;  %v2193_v40 = vrot.slane %v2192_v15, 2 }
 0x2e5   : > { %v2107_v5 = vrot.slane %v2106_v52, 1  ;;  %v2194_v9 = vadd.f32 %v2193_v40, %v2192_v15 }
 0x2e7   : > { %v2108_v34 = vadd.f32 %v2107_v5, %v2106_v52  ;;  %v2195_v27 = vrot.slane %v2194_v9, 1 }
 0x2e9   : > { %v2111_v51 = vrot.slane %v2108_v34, 7  ;;  %v2196_v4 = vadd.f32 %v2195_v27, %v2194_v9 }
 0x2eb   : > { %v2113_v62 = vsel %vm2112_vm0, %v2087_v28, %v2111_v51  ;;  %v2199_v59 = vrot.slane %v2196_v4, 7 }
 0x2ec   : > { %v2115_v6 = vadd.f32 %v2113_v62, %v2066_v10  ;;  %2207 = sbr.rel (%p3908_p1) target bundleno = 1338 (0x53a), region = 60 }
 0x2ed   : > { %v2200_v24 = vsel %vm2112_vm0, %v2175_v7, %v2199_v59 }
 0x2ee   : > { %2120 = vst.msk [vmem:[#allocation3] ss:$2 sm:$0x3] %vm2118_vm1, %v2115_v6  ;;  %v2202_v21 = vadd.f32 %v2200_v24, %v2122_v11 }
 0x2f0   : > { %2203 = vst.msk [vmem:[#allocation3 + $0x1] ss:$2 sm:$0x3] %vm2118_vm1, %v2202_v21 }
 0x2f1   : > { %v4114_v61 = vld [vmem:[%s5800_s3 + $0x38] sm:$0xff]  ;;  %v4113_v12 = vld [vmem:[%s5800_s3 + $0x30] sm:$0xff]  ;;  %v4112_v41 = vld [vmem:[%s5800_s3 + $0x28] sm:$0xff]  ;;  %vm2836_vm5 = vcmask 523264   ;;  %vm3297_vm10 = vcmask 7168  }
 0x2f2   : > { %v4122_v23 = vld [vmem:[%s5800_s3 + $0x78] sm:$0xff]  ;;  %2658 = vmatpush.bf16.msra.mxu0 %v4114_v61  ;;  %v4121_v46 = vld [vmem:[%s5800_s3 + $0x70] sm:$0xff]  ;;  %4123 = vmatpush.bf16.msra.mxu2 %v4114_v61  ;;  %v4120_v32 = vld [vmem:[%s5800_s3 + $0x68] sm:$0xff] }
 0x2f3   : > { %2747 = vmatpush.bf16.msra.mxu1 %v4122_v23  ;;  %4131 = vmatpush.bf16.msra.mxu3 %v4122_v23  ;;  %v4111_v42 = vld [vmem:[%s5800_s3 + $0x20] sm:$0xff]  ;;  %v4110_v44 = vld [vmem:[%s5800_s3 + $0x18] sm:$0xff]  ;;  %v4109_v29 = vld [vmem:[%s5800_s3 + $0x10] sm:$0xff] }
 0x2f4   : > { %v4119_v19 = vld [vmem:[%s5800_s3 + $0x60] sm:$0xff]  ;;  %v4118_v45 = vld [vmem:[%s5800_s3 + $0x58] sm:$0xff]  ;;  %v4117_v3 = vld [vmem:[%s5800_s3 + $0x50] sm:$0xff] }
 0x2f5   : > { %v2208_v18 = vld [vmem:[#allocation3] ss:$2 sm:$0x3]  ;;  %v4108_v38 = vld [vmem:[%s5800_s3 + $0x8] sm:$0xff]  ;;  %v2234_v56 = vld [vmem:[#allocation2 + $0x10] sm:$0xff] }
 0x2f6   : > { %2659 = vmatpush.bf16.msra.mxu0 %v4113_v12  ;;  %v2209_v31 = vmul.f32 0.00390625, %v2208_v18  ;;  %4124 = vmatpush.bf16.msra.mxu2 %v4113_v12  ;;  %v4116_v30 = vld [vmem:[%s5800_s3 + $0x48] sm:$0xff]  ;;  %v4107_v13 = vld [vmem:[%s5800_s3] sm:$0xff]  ;;  %v2235_v55 = vld [vmem:[#allocation2 + $0x18] sm:$0xff] }
 0x2f7   : > { %2748 = vmatpush.bf16.msra.mxu1 %v4121_v46  ;;  %v2210_v20 = vld [vmem:[#allocation3 + $0x1] ss:$2 sm:$0x3]  ;;  %4132 = vmatpush.bf16.msra.mxu3 %v4121_v46  ;;  %v2226_v47 = vld [vmem:[%s5799_s2] ss:$2 sm:$0x3] }
 0x2f8   : > { %v2211_v36 = vmul.f32 0.00390625, %v2210_v20  ;;  %v2212_v8 = vmul.f32 %v2209_v31, %v2209_v31  ;;  %v4115_v2 = vld [vmem:[%s5800_s3 + $0x40] sm:$0xff]  ;;  %v2233_v16 = vld [vmem:[#allocation2 + $0x8] sm:$0xff]  ;;  %v2266_v60 = vld [vmem:[#allocation2 + $0x110] sm:$0xff] }
 0x2f9   : > { %v2232_v22 = vld [vmem:[#allocation2] sm:$0xff]  ;;  %v2265_v34 = vld [vmem:[#allocation2 + $0x108] sm:$0xff]  ;;  %v2267_v35 = vld [vmem:[#allocation2 + $0x118] sm:$0xff] }
 0x2fa   : > { %2660 = vmatpush.bf16.msra.mxu0 %v4112_v41  ;;  %v2213_v57 = vsub.f32 %v2211_v36, %v2212_v8  ;;  %4125 = vmatpush.bf16.msra.mxu2 %v4112_v41  ;;  %v3909_v49 = vld [vmem:[%s5799_s2 + $0x1] ss:$2 sm:$0x3]  ;;  %v2238_v23 = vld [vmem:[#allocation2 + $0x30] sm:$0xff]  ;;  %v2237_v12 = vld [vmem:[#allocation2 + $0x28] sm:$0xff] }
 0x2fb   : > { %2749 = vmatpush.bf16.msra.mxu1 %v4120_v32  ;;  %4133 = vmatpush.bf16.msra.mxu3 %v4120_v32  ;;  %v2264_v40 = vld [vmem:[#allocation2 + $0x100] sm:$0xff]  ;;  %v2239_v46 = vld [vmem:[#allocation2 + $0x38] sm:$0xff] }
 0x2fc   : > { %v2214_v43 = vmax.f32 %v2213_v57, 0.0  ;;  %v2236_v61 = vld [vmem:[#allocation2 + $0x20] sm:$0xff] }
 0x2fe   : > { %2661 = vmatpush.bf16.msra.mxu0 %v4111_v42  ;;  %v2215_v33 = vadd.f32 1e-05, %v2214_v43  ;;  %4126 = vmatpush.bf16.msra.mxu2 %v4111_v42 }
 0x2ff   : > { %2750 = vmatpush.bf16.msra.mxu1 %v4119_v19  ;;  %4134 = vmatpush.bf16.msra.mxu3 %v4119_v19 }
 0x300   : > { %4196 = vrsqrt.f32 %v2215_v33  ;;  %vm2222_vm2 = vweird.f32 %v2215_v33 }
 0x302   : > { %2662 = vmatpush.bf16.msra.mxu0 %v4110_v44  ;;  %4127 = vmatpush.bf16.msra.mxu2 %v4110_v44 }
 0x303   : > { %2751 = vmatpush.bf16.msra.mxu1 %v4118_v45  ;;  %4135 = vmatpush.bf16.msra.mxu3 %v4118_v45 }
 0x306   : > { %v4197_v17 = vpop.eup %4196  ;;  %2663 = vmatpush.bf16.msra.mxu0 %v4109_v29  ;;  %4128 = vmatpush.bf16.msra.mxu2 %v4109_v29  ;;  %v2268_v29 = vld [vmem:[#allocation2 + $0x120] sm:$0xff] }
 0x307   : > { %2752 = vmatpush.bf16.msra.mxu1 %v4117_v3  ;;  %v2217_v0 = vmul.f32 %v4197_v17, %v2215_v33  ;;  %4136 = vmatpush.bf16.msra.mxu3 %v4117_v3  ;;  %vm2223_vm3 = vweird.f32 %v4197_v17  ;;  %v2270_v3 = vld [vmem:[#allocation2 + $0x130] sm:$0xff] }
 0x308   : > { %vm2224_vm4 = vmor %vm2222_vm2, %vm2223_vm3 }
 0x309   : > { %v2218_v37 = vmul.f32 %v4197_v17, %v2217_v0 }
 0x30a   : > { %2664 = vmatpush.bf16.msra.mxu0 %v4108_v38  ;;  %4129 = vmatpush.bf16.msra.mxu2 %v4108_v38  ;;  %v2269_v38 = vld [vmem:[#allocation2 + $0x128] sm:$0xff] }
 0x30b   : > { %2753 = vmatpush.bf16.msra.mxu1 %v4116_v30  ;;  %v2219_v25 = vmul.f32 0.5, %v2218_v37  ;;  %4137 = vmatpush.bf16.msra.mxu3 %v4116_v30  ;;  %v2271_v30 = vld [vmem:[#allocation2 + $0x138] sm:$0xff] }
 0x30d   : > { %v2220_v63 = vsub.f32 1.5, %v2219_v25 }
 0x30e   : > { %2665 = vmatpush.bf16.msra.mxu0 %v4107_v13  ;;  %4130 = vmatpush.bf16.msra.mxu2 %v4107_v13 }
 0x30f   : > { %2754 = vmatpush.bf16.msra.mxu1 %v4115_v2  ;;  %v2221_v14 = vmul.f32 %v4197_v17, %v2220_v63  ;;  %4138 = vmatpush.bf16.msra.mxu3 %v4115_v2 }
 0x311   : > { %v2225_v54 = vsel %vm2224_vm4, %v4197_v17, %v2221_v14 }
 0x312   : > { %v2227_v48 = vmul.f32 %v2226_v47, %v2225_v54 }
 0x314   : > { %v2230_v50 = vmul.f32 %v2227_v48, %v2209_v31  ;;  %v5015_v1 = vperm.slane %v2227_v48, 0  ;;  %v5017_v58 = vperm.slane %v2227_v48, 1 }
 0x316   : > { %v2231_v39 = vsub.f32 %v3909_v49, %v2230_v50  ;;  %v2301_v15 = vmul.f32 %v5015_v1, %v2232_v22  ;;  %v2303_v26 = vmul.f32 %v5015_v1, %v2234_v56  ;;  %v2302_v52 = vmul.f32 %v5017_v58, %v2233_v16 }
 0x317   : > { %v2304_v5 = vmul.f32 %v5017_v58, %v2235_v55  ;;  %v2333_v27 = vmul.f32 %v5015_v1, %v2264_v40  ;;  %v2335_v28 = vmul.f32 %v5015_v1, %v2266_v60  ;;  %v2334_v62 = vmul.f32 %v5017_v58, %v2265_v34  ;;  %v2242_v40 = vld [vmem:[#allocation2 + $0x50] sm:$0xff]  ;;  %v2241_v34 = vld [vmem:[#allocation2 + $0x48] sm:$0xff] }
 0x318   : > { %v5023_v9 = vperm.slane %v2231_v39, 0  ;;  %v5025_v53 = vperm.slane %v2231_v39, 1  ;;  %v2336_v11 = vmul.f32 %v5017_v58, %v2267_v35  ;;  %v2305_v20 = vmul.f32 %v5015_v1, %v2236_v61  ;;  %v2243_v35 = vld [vmem:[#allocation2 + $0x58] sm:$0xff] }
 0x319   : > { %v2307_v36 = vmul.f32 %v5015_v1, %v2238_v23  ;;  %v2306_v19 = vmul.f32 %v5017_v58, %v2237_v12  ;;  %v2308_v57 = vmul.f32 %v5017_v58, %v2239_v46  ;;  %v2337_v63 = vmul.f32 %v5015_v1, %v2268_v29  ;;  %v2244_v29 = vld [vmem:[#allocation2 + $0x60] sm:$0xff] }
 0x31a   : > { %v2370_v10 = vadd.f32 %v5023_v9, %v2301_v15  ;;  %v2372_v51 = vadd.f32 %v5023_v9, %v2303_v26  ;;  %v2371_v4 = vadd.f32 %v5025_v53, %v2302_v52  ;;  %v2373_v7 = vadd.f32 %v5025_v53, %v2304_v5  ;;  %v2240_v52 = vld [vmem:[#allocation2 + $0x40] sm:$0xff] }
 0x31b   : > { %v2402_v32 = vadd.f32 %v5023_v9, %v2333_v27  ;;  %v2404_v31 = vadd.f32 %v5023_v9, %v2335_v28  ;;  %v2403_v8 = vadd.f32 %v5025_v53, %v2334_v62  ;;  %v2405_v42 = vadd.f32 %v5025_v53, %v2336_v11 }
 0x31c   : > { %v2434_v59 = vmax.f32 %v2370_v10, 0.0  ;;  %v2436_v6 = vmax.f32 %v2372_v51, 0.0  ;;  %v2435_v24 = vmax.f32 %v2371_v4, 0.0  ;;  %v2437_v21 = vmax.f32 %v2373_v7, 0.0 }
 0x31d   : > { %v2466_v43 = vmax.f32 %v2402_v32, 0.0  ;;  %v2468_v44 = vmax.f32 %v2404_v31, 0.0  ;;  %v2467_v45 = vmax.f32 %v2403_v8, 0.0  ;;  %v2469_v33 = vmax.f32 %v2405_v42, 0.0 }
 0x31e   : > { %v2498_v18 = vpack.c.bf16 %v2436_v6, %v2434_v59  ;;  %v2499_v41 = vpack.c.bf16 %v2437_v21, %v2435_v24  ;;  %v2374_v0 = vadd.f32 %v5023_v9, %v2305_v20  ;;  %v2376_v37 = vadd.f32 %v5023_v9, %v2307_v36  ;;  %v2272_v59 = vld [vmem:[#allocation2 + $0x140] sm:$0xff]  ;;  %v2274_v6 = vld [vmem:[#allocation2 + $0x150] sm:$0xff]  ;;  %v2273_v24 = vld [vmem:[#allocation2 + $0x148] sm:$0xff] }
 0x31f   : > { %v2514_v17 = vpack.c.bf16 %v2468_v44, %v2466_v43  ;;  %v2515_v13 = vpack.c.bf16 %v2469_v33, %v2467_v45  ;;  %v2375_v2 = vadd.f32 %v5025_v53, %v2306_v19  ;;  %v2377_v25 = vadd.f32 %v5025_v53, %v2308_v57  ;;  %v2275_v21 = vld [vmem:[#allocation2 + $0x158] sm:$0xff] }
 0x320   : > { %2666 = vmatmul.bf16.vlgmr.msra.gmra.mxu0 %v2498_v18  ;;  %2755 = vmatmul.bf16.vlgmr.msra.gmra.mxu1 %v2499_v41  ;;  %v2339_v14 = vmul.f32 %v5015_v1, %v2270_v3  ;;  %v2338_v47 = vmul.f32 %v5017_v58, %v2269_v38  ;;  %v2340_v54 = vmul.f32 %v5017_v58, %v2271_v30  ;;  %v2438_v48 = vmax.f32 %v2374_v0, 0.0  ;;  %v2246_v3 = vld [vmem:[#allocation2 + $0x70] sm:$0xff]  ;;  %v2245_v30 = vld [vmem:[#allocation2 + $0x68] sm:$0xff]  ;;  %v2247_v0 = vld [vmem:[#allocation2 + $0x78] sm:$0xff] }
 0x321   : > { %2706 = vmatmul.bf16.vlgmr.msra.gmra.mxu2 %v2514_v17  ;;  %2795 = vmatmul.bf16.vlgmr.msra.gmra.mxu3 %v2515_v13  ;;  %v2440_v22 = vmax.f32 %v2376_v37, 0.0  ;;  %v2439_v49 = vmax.f32 %v2375_v2, 0.0  ;;  %v2441_v56 = vmax.f32 %v2377_v25, 0.0  ;;  %v2406_v16 = vadd.f32 %v5023_v9, %v2337_v63 }
 0x322   : > { %v2408_v50 = vadd.f32 %v5023_v9, %v2339_v14  ;;  %v2407_v55 = vadd.f32 %v5025_v53, %v2338_v47  ;;  %v2409_v39 = vadd.f32 %v5025_v53, %v2340_v54  ;;  %v2309_v10 = vmul.f32 %v5015_v1, %v2240_v52 }
 0x323   : > { %v2500_v15 = vpack.c.bf16 %v2440_v22, %v2438_v48  ;;  %v2501_v26 = vpack.c.bf16 %v2441_v56, %v2439_v49  ;;  %v2470_v60 = vmax.f32 %v2406_v16, 0.0  ;;  %v2311_v51 = vmul.f32 %v5015_v1, %v2242_v40  ;;  %v2276_v48 = vld [vmem:[#allocation2 + $0x160] sm:$0xff]  ;;  %v2278_v22 = vld [vmem:[#allocation2 + $0x170] sm:$0xff]  ;;  %v2277_v49 = vld [vmem:[#allocation2 + $0x168] sm:$0xff] }
 0x324   : > { %v2472_v5 = vmax.f32 %v2408_v50, 0.0  ;;  %v2471_v27 = vmax.f32 %v2407_v55, 0.0  ;;  %v2473_v28 = vmax.f32 %v2409_v39, 0.0  ;;  %v2310_v4 = vmul.f32 %v5017_v58, %v2241_v34  ;;  %v2279_v56 = vld [vmem:[#allocation2 + $0x178] sm:$0xff] }
 0x325   : > { %v2312_v7 = vmul.f32 %v5017_v58, %v2243_v35  ;;  %v2378_v61 = vadd.f32 %v5023_v9, %v2309_v10  ;;  %v2380_v23 = vadd.f32 %v5023_v9, %v2311_v51  ;;  %v2341_v18 = vmul.f32 %v5015_v1, %v2272_v59 }
 0x326   : > { %v2516_v62 = vpack.c.bf16 %v2472_v5, %v2470_v60  ;;  %v2517_v11 = vpack.c.bf16 %v2473_v28, %v2471_v27  ;;  %v2379_v12 = vadd.f32 %v5025_v53, %v2310_v4  ;;  %v2343_v41 = vmul.f32 %v5015_v1, %v2274_v6 }
 0x327   : > { %v2381_v46 = vadd.f32 %v5025_v53, %v2312_v7  ;;  %v2342_v32 = vmul.f32 %v5017_v58, %v2273_v24  ;;  %v2344_v31 = vmul.f32 %v5017_v58, %v2275_v21  ;;  %v2442_v20 = vmax.f32 %v2378_v61, 0.0  ;;  %v2249_v24 = vld [vmem:[#allocation2 + $0x88] sm:$0xff]  ;;  %v2251_v21 = vld [vmem:[#allocation2 + $0x98] sm:$0xff] }
 0x328   : > { %v2444_v36 = vmax.f32 %v2380_v23, 0.0  ;;  %v2443_v8 = vmax.f32 %v2379_v12, 0.0  ;;  %v2410_v19 = vadd.f32 %v5023_v9, %v2341_v18  ;;  %v2412_v57 = vadd.f32 %v5023_v9, %v2343_v41 }
 0x329   : > { %v2445_v42 = vmax.f32 %v2381_v46, 0.0  ;;  %v2411_v43 = vadd.f32 %v5025_v53, %v2342_v32  ;;  %v2413_v44 = vadd.f32 %v5025_v53, %v2344_v31  ;;  %v2313_v2 = vmul.f32 %v5015_v1, %v2244_v29 }
 0x32a   : > { %v2502_v45 = vpack.c.bf16 %v2444_v36, %v2442_v20  ;;  %v2474_v17 = vmax.f32 %v2410_v19, 0.0  ;;  %v2476_v38 = vmax.f32 %v2412_v57, 0.0  ;;  %v2315_v25 = vmul.f32 %v5015_v1, %v2246_v3  ;;  %v2280_v20 = vld [vmem:[#allocation2 + $0x180] sm:$0xff]  ;;  %v2282_v36 = vld [vmem:[#allocation2 + $0x190] sm:$0xff] }
 0x32b   : > { %v2503_v33 = vpack.c.bf16 %v2445_v42, %v2443_v8  ;;  %v2475_v37 = vmax.f32 %v2411_v43, 0.0  ;;  %v2477_v13 = vmax.f32 %v2413_v44, 0.0  ;;  %v2314_v63 = vmul.f32 %v5017_v58, %v2245_v30  ;;  %v2281_v8 = vld [vmem:[#allocation2 + $0x188] sm:$0xff]  ;;  %v2283_v42 = vld [vmem:[#allocation2 + $0x198] sm:$0xff] }
 0x32c   : > { %v2316_v14 = vmul.f32 %v5017_v58, %v2247_v0  ;;  %v2518_v47 = vpack.c.bf16 %v2476_v38, %v2474_v17  ;;  %v2382_v16 = vadd.f32 %v5023_v9, %v2313_v2  ;;  %v2384_v50 = vadd.f32 %v5023_v9, %v2315_v25 }
 0x32d   : > { %v2519_v54 = vpack.c.bf16 %v2477_v13, %v2475_v37  ;;  %v2383_v55 = vadd.f32 %v5025_v53, %v2314_v63  ;;  %v2346_v52 = vmul.f32 %v5017_v58, %v2277_v49  ;;  %v2348_v40 = vmul.f32 %v5017_v58, %v2279_v56  ;;  %v2253_v49 = vld [vmem:[#allocation2 + $0xa8] sm:$0xff]  ;;  %v2255_v56 = vld [vmem:[#allocation2 + $0xb8] sm:$0xff] }
 0x32e   : > { %v2385_v39 = vadd.f32 %v5025_v53, %v2316_v14  ;;  %v2446_v60 = vmax.f32 %v2382_v16, 0.0  ;;  %v2448_v5 = vmax.f32 %v2384_v50, 0.0  ;;  %v2318_v18 = vmul.f32 %v5017_v58, %v2249_v24 }
 0x32f   : > { %v2447_v34 = vmax.f32 %v2383_v55, 0.0  ;;  %v2415_v10 = vadd.f32 %v5025_v53, %v2346_v52  ;;  %v2417_v51 = vadd.f32 %v5025_v53, %v2348_v40  ;;  %v2320_v41 = vmul.f32 %v5017_v58, %v2251_v21 }
 0x330   : > { %2671 = vmatmul.bf16.gmra.mxu0 %v2500_v15  ;;  %2760 = vmatmul.bf16.gmra.mxu1 %v2501_v26  ;;  %v2345_v15 = vmul.f32 %v5015_v1, %v2276_v48  ;;  %v2347_v26 = vmul.f32 %v5015_v1, %v2278_v22  ;;  %v2449_v35 = vmax.f32 %v2385_v39, 0.0  ;;  %v2504_v4 = vpack.c.bf16 %v2448_v5, %v2446_v60  ;;  %v2284_v60 = vld [vmem:[#allocation2 + $0x1a0] sm:$0xff]  ;;  %v2286_v5 = vld [vmem:[#allocation2 + $0x1b0] sm:$0xff] }
 0x331   : > { %2711 = vmatmul.bf16.gmra.mxu2 %v2516_v62  ;;  %2800 = vmatmul.bf16.gmra.mxu3 %v2517_v11  ;;  %v2248_v62 = vld [vmem:[#allocation2 + $0x80] sm:$0xff]  ;;  %v2250_v11 = vld [vmem:[#allocation2 + $0x90] sm:$0xff]  ;;  %v2479_v61 = vmax.f32 %v2415_v10, 0.0  ;;  %v2481_v23 = vmax.f32 %v2417_v51, 0.0  ;;  %v2387_v43 = vadd.f32 %v5025_v53, %v2318_v18  ;;  %v2389_v44 = vadd.f32 %v5025_v53, %v2320_v41 }
 0x332   : > { %v2414_v27 = vadd.f32 %v5023_v9, %v2345_v15  ;;  %v2416_v28 = vadd.f32 %v5023_v9, %v2347_v26  ;;  %v2505_v7 = vpack.c.bf16 %v2449_v35, %v2447_v34  ;;  %v2317_v12 = vmul.f32 %v5015_v1, %v2248_v62  ;;  %v2285_v34 = vld [vmem:[#allocation2 + $0x1a8] sm:$0xff]  ;;  %v2287_v35 = vld [vmem:[#allocation2 + $0x1b8] sm:$0xff] }
 0x333   : > { %v2319_v46 = vmul.f32 %v5015_v1, %v2250_v11  ;;  %v2521_v31 = vpack.c.bf16 %v2481_v23, %v2479_v61  ;;  %v2350_v29 = vmul.f32 %v5017_v58, %v2281_v8  ;;  %v2352_v3 = vmul.f32 %v5017_v58, %v2283_v42  ;;  %v2257_v8 = vld [vmem:[#allocation2 + $0xc8] sm:$0xff]  ;;  %v2259_v42 = vld [vmem:[#allocation2 + $0xd8] sm:$0xff] }
 0x334   : > { %v2478_v59 = vmax.f32 %v2414_v27, 0.0  ;;  %v2480_v6 = vmax.f32 %v2416_v28, 0.0  ;;  %v2386_v19 = vadd.f32 %v5023_v9, %v2317_v12  ;;  %v2451_v30 = vmax.f32 %v2387_v43, 0.0 }
 0x335   : > { %v2388_v57 = vadd.f32 %v5023_v9, %v2319_v46  ;;  %v2453_v0 = vmax.f32 %v2389_v44, 0.0  ;;  %v2419_v2 = vadd.f32 %v5025_v53, %v2350_v29  ;;  %v2421_v25 = vadd.f32 %v5025_v53, %v2352_v3 }
 0x336   : > { %v2520_v32 = vpack.c.bf16 %v2480_v6, %v2478_v59  ;;  %v2450_v17 = vmax.f32 %v2386_v19, 0.0  ;;  %v2322_v15 = vmul.f32 %v5017_v58, %v2253_v49  ;;  %v2324_v26 = vmul.f32 %v5017_v58, %v2255_v56 }
 0x337   : > { %v2452_v38 = vmax.f32 %v2388_v57, 0.0  ;;  %v2507_v14 = vpack.c.bf16 %v2453_v0, %v2451_v30  ;;  %v2483_v16 = vmax.f32 %v2419_v2, 0.0  ;;  %v2485_v50 = vmax.f32 %v2421_v25, 0.0  ;;  %v2289_v30 = vld [vmem:[#allocation2 + $0x1c8] sm:$0xff]  ;;  %v2291_v0 = vld [vmem:[#allocation2 + $0x1d8] sm:$0xff] }
 0x338   : > { %v2391_v10 = vadd.f32 %v5025_v53, %v2322_v15  ;;  %v2393_v51 = vadd.f32 %v5025_v53, %v2324_v26  ;;  %v2354_v62 = vmul.f32 %v5017_v58, %v2285_v34  ;;  %v2356_v11 = vmul.f32 %v5017_v58, %v2287_v35  ;;  %v2261_v34 = vld [vmem:[#allocation2 + $0xe8] sm:$0xff]  ;;  %v2263_v35 = vld [vmem:[#allocation2 + $0xf8] sm:$0xff] }
 0x339   : > { %v2506_v63 = vpack.c.bf16 %v2452_v38, %v2450_v17  ;;  %v2523_v40 = vpack.c.bf16 %v2485_v50, %v2483_v16  ;;  %v2288_v17 = vld [vmem:[#allocation2 + $0x1c0] sm:$0xff]  ;;  %v2290_v38 = vld [vmem:[#allocation2 + $0x1d0] sm:$0xff] }
 0x33a   : > { %v2455_v24 = vmax.f32 %v2391_v10, 0.0  ;;  %v2457_v21 = vmax.f32 %v2393_v51, 0.0  ;;  %v2423_v12 = vadd.f32 %v5025_v53, %v2354_v62  ;;  %v2425_v46 = vadd.f32 %v5025_v53, %v2356_v11 }
 0x33c   : > { %v2509_v41 = vpack.c.bf16 %v2457_v21, %v2455_v24  ;;  %v2487_v19 = vmax.f32 %v2423_v12, 0.0  ;;  %v2489_v57 = vmax.f32 %v2425_v46, 0.0  ;;  %v2293_v24 = vld [vmem:[#allocation2 + $0x1e8] sm:$0xff]  ;;  %v2295_v21 = vld [vmem:[#allocation2 + $0x1f8] sm:$0xff] }
 0x33e   : > { %v2525_v3 = vpack.c.bf16 %v2489_v57, %v2487_v19 }
 0x340   : > { %2676 = vmatmul.bf16.gmra.mxu0 %v2502_v45  ;;  %2765 = vmatmul.bf16.gmra.mxu1 %v2503_v33  ;;  %v2349_v45 = vmul.f32 %v5015_v1, %v2280_v20  ;;  %v2351_v33 = vmul.f32 %v5015_v1, %v2282_v36 }
 0x341   : > { %2716 = vmatmul.bf16.gmra.mxu2 %v2518_v47  ;;  %2805 = vmatmul.bf16.gmra.mxu3 %v2519_v54  ;;  %v2252_v47 = vld [vmem:[#allocation2 + $0xa0] sm:$0xff]  ;;  %v2254_v54 = vld [vmem:[#allocation2 + $0xb0] sm:$0xff] }
 0x342   : > { %v2418_v37 = vadd.f32 %v5023_v9, %v2349_v45  ;;  %v2420_v13 = vadd.f32 %v5023_v9, %v2351_v33  ;;  %v2321_v55 = vmul.f32 %v5015_v1, %v2252_v47  ;;  %v2323_v39 = vmul.f32 %v5015_v1, %v2254_v54 }
 0x343   : > { %v2326_v45 = vmul.f32 %v5017_v58, %v2257_v8  ;;  %v2328_v33 = vmul.f32 %v5017_v58, %v2259_v42  ;;  %v2358_v47 = vmul.f32 %v5017_v58, %v2289_v30  ;;  %v2360_v54 = vmul.f32 %v5017_v58, %v2291_v0 }
 0x344   : > { %v2482_v48 = vmax.f32 %v2418_v37, 0.0  ;;  %v2484_v22 = vmax.f32 %v2420_v13, 0.0  ;;  %v2390_v27 = vadd.f32 %v5023_v9, %v2321_v55  ;;  %v2392_v28 = vadd.f32 %v5023_v9, %v2323_v39 }
 0x345   : > { %v2395_v2 = vadd.f32 %v5025_v53, %v2326_v45  ;;  %v2397_v25 = vadd.f32 %v5025_v53, %v2328_v33  ;;  %v2427_v55 = vadd.f32 %v5025_v53, %v2358_v47  ;;  %v2429_v39 = vadd.f32 %v5025_v53, %v2360_v54 }
 0x346   : > { %v2522_v52 = vpack.c.bf16 %v2484_v22, %v2482_v48  ;;  %v2454_v59 = vmax.f32 %v2390_v27, 0.0  ;;  %v2456_v6 = vmax.f32 %v2392_v28, 0.0 }
 0x347   : > { %v2459_v49 = vmax.f32 %v2395_v2, 0.0  ;;  %v2461_v56 = vmax.f32 %v2397_v25, 0.0  ;;  %v2491_v27 = vmax.f32 %v2427_v55, 0.0  ;;  %v2493_v28 = vmax.f32 %v2429_v39, 0.0 }
 0x348   : > { %v2508_v18 = vpack.c.bf16 %v2456_v6, %v2454_v59  ;;  %v2292_v59 = vld [vmem:[#allocation2 + $0x1e0] sm:$0xff]  ;;  %v2294_v6 = vld [vmem:[#allocation2 + $0x1f0] sm:$0xff] }
 0x349   : > { %v2511_v26 = vpack.c.bf16 %v2461_v56, %v2459_v49  ;;  %v2527_v11 = vpack.c.bf16 %v2493_v28, %v2491_v27 }
 0x350   : > { %2681 = vmatmul.bf16.gmra.mxu0 %v2504_v4  ;;  %2770 = vmatmul.bf16.gmra.mxu1 %v2505_v7  ;;  %v2353_v4 = vmul.f32 %v5015_v1, %v2284_v60  ;;  %v2355_v7 = vmul.f32 %v5015_v1, %v2286_v5 }
 0x351   : > { %2721 = vmatmul.bf16.gmra.mxu2 %v2520_v32  ;;  %2810 = vmatmul.bf16.gmra.mxu3 %v2521_v31  ;;  %v2256_v32 = vld [vmem:[#allocation2 + $0xc0] sm:$0xff]  ;;  %v2258_v31 = vld [vmem:[#allocation2 + $0xd0] sm:$0xff] }
 0x352   : > { %v2422_v61 = vadd.f32 %v5023_v9, %v2353_v4  ;;  %v2424_v23 = vadd.f32 %v5023_v9, %v2355_v7  ;;  %v2325_v43 = vmul.f32 %v5015_v1, %v2256_v32  ;;  %v2327_v44 = vmul.f32 %v5015_v1, %v2258_v31 }
 0x353   : > { %v2330_v4 = vmul.f32 %v5017_v58, %v2261_v34  ;;  %v2332_v7 = vmul.f32 %v5017_v58, %v2263_v35  ;;  %v2362_v32 = vmul.f32 %v5017_v58, %v2293_v24  ;;  %v2364_v31 = vmul.f32 %v5017_v58, %v2295_v21 }
 0x354   : > { %v2486_v20 = vmax.f32 %v2422_v61, 0.0  ;;  %v2488_v36 = vmax.f32 %v2424_v23, 0.0  ;;  %v2394_v37 = vadd.f32 %v5023_v9, %v2325_v43  ;;  %v2396_v13 = vadd.f32 %v5023_v9, %v2327_v44 }
 0x355   : > { %v2399_v12 = vadd.f32 %v5025_v53, %v2330_v4  ;;  %v2401_v46 = vadd.f32 %v5025_v53, %v2332_v7  ;;  %v2431_v43 = vadd.f32 %v5025_v53, %v2362_v32  ;;  %v2433_v44 = vadd.f32 %v5025_v53, %v2364_v31 }
 0x356   : > { %v2524_v29 = vpack.c.bf16 %v2488_v36, %v2486_v20  ;;  %v2458_v48 = vmax.f32 %v2394_v37, 0.0  ;;  %v2460_v22 = vmax.f32 %v2396_v13, 0.0 }
 0x357   : > { %v2463_v8 = vmax.f32 %v2399_v12, 0.0  ;;  %v2465_v42 = vmax.f32 %v2401_v46, 0.0 }
 0x358   : > { %v2510_v15 = vpack.c.bf16 %v2460_v22, %v2458_v48 }
 0x359   : > { %v2513_v33 = vpack.c.bf16 %v2465_v42, %v2463_v8 }
 0x360   : > { %2686 = vmatmul.bf16.gmra.mxu0 %v2506_v63  ;;  %2775 = vmatmul.bf16.gmra.mxu1 %v2507_v14  ;;  %v2357_v63 = vmul.f32 %v5015_v1, %v2288_v17  ;;  %v2359_v14 = vmul.f32 %v5015_v1, %v2290_v38  ;;  %v2497_v17 = vmax.f32 %v2433_v44, 0.0 }
 0x361   : > { %2726 = vmatmul.bf16.gmra.mxu2 %v2522_v52  ;;  %2815 = vmatmul.bf16.gmra.mxu3 %v2523_v40  ;;  %v2260_v52 = vld [vmem:[#allocation2 + $0xe0] sm:$0xff]  ;;  %v2262_v40 = vld [vmem:[#allocation2 + $0xf0] sm:$0xff] }
 0x362   : > { %v2426_v16 = vadd.f32 %v5023_v9, %v2357_v63  ;;  %v2428_v50 = vadd.f32 %v5023_v9, %v2359_v14  ;;  %v2329_v10 = vmul.f32 %v5015_v1, %v2260_v52  ;;  %v2331_v51 = vmul.f32 %v5015_v1, %v2262_v40 }
 0x364   : > { %v2490_v60 = vmax.f32 %v2426_v16, 0.0  ;;  %v2492_v5 = vmax.f32 %v2428_v50, 0.0  ;;  %v2398_v61 = vadd.f32 %v5023_v9, %v2329_v10  ;;  %v2400_v23 = vadd.f32 %v5023_v9, %v2331_v51 }
 0x366   : > { %v2526_v62 = vpack.c.bf16 %v2492_v5, %v2490_v60  ;;  %v2462_v20 = vmax.f32 %v2398_v61, 0.0  ;;  %v2464_v36 = vmax.f32 %v2400_v23, 0.0 }
 0x368   : > { %v2512_v45 = vpack.c.bf16 %v2464_v36, %v2462_v20 }
 0x370   : > { %2691 = vmatmul.bf16.gmra.mxu0 %v2508_v18  ;;  %2780 = vmatmul.bf16.gmra.mxu1 %v2509_v41  ;;  %v2361_v18 = vmul.f32 %v5015_v1, %v2292_v59  ;;  %v2363_v41 = vmul.f32 %v5015_v1, %v2294_v6 }
 0x371   : > { %2731 = vmatmul.bf16.gmra.mxu2 %v2524_v29  ;;  %2820 = vmatmul.bf16.gmra.mxu3 %v2525_v3  ;;  %v2495_v3 = vmax.f32 %v2431_v43, 0.0 }
 0x372   : > { %v2430_v19 = vadd.f32 %v5023_v9, %v2361_v18  ;;  %v2432_v57 = vadd.f32 %v5023_v9, %v2363_v41 }
 0x373   : > { %v2529_v38 = vpack.c.bf16 %v2497_v17, %v2495_v3 }
 0x374   : > { %v2494_v1 = vmax.f32 %v2430_v19, 0.0  ;;  %v2496_v29 = vmax.f32 %v2432_v57, 0.0 }
 0x376   : > { %v2528_v58 = vpack.c.bf16 %v2496_v29, %v2494_v1 }
 0x380   : > { %2696 = vmatmul.bf16.gmra.mxu0 %v2510_v15  ;;  %2785 = vmatmul.bf16.gmra.mxu1 %v2511_v26 }
 0x381   : > { %2736 = vmatmul.bf16.gmra.mxu2 %v2526_v62  ;;  %2825 = vmatmul.bf16.gmra.mxu3 %v2527_v11 }
 0x390   : > { %2701 = vmatmul.bf16.gmra.mxu0 %v2512_v45  ;;  %2790 = vmatmul.bf16.gmra.mxu1 %v2513_v33 }
 0x391   : > { %2741 = vmatmul.bf16.gmra.mxu2 %v2528_v58  ;;  %2830 = vmatmul.bf16.gmra.mxu3 %v2529_v38 }
 0x39d   : > { %v2667_v30 = vpop.f32.mrf.mxu0  ;;  %v2756_v0 = vpop.f32.mrf.mxu1 }
 0x39e   : > { %v5151_v37 = vadd.f32 %v2756_v0, %v2667_v30 }
 0x3a0   : > { %v2914_v44 = vmul.f32 %v5151_v37, %v5151_v37  ;;  %v2837_v1 = vsel %vm2836_vm5, %v5151_v37, 0.0 }
 0x3a2   : > { %v2946_v0 = vsel %vm2836_vm5, %v2914_v44, 0.0 }
 0x3a4   : > { %v2707_v53 = vpop.f32.mrf.mxu2  ;;  %v2796_v25 = vpop.f32.mrf.mxu3 }
 0x3a5   : > { %v2669_v9 = vpop.f32.mrf.mxu0  ;;  %v2758_v13 = vpop.f32.mrf.mxu1  ;;  %v5155_v63 = vadd.f32 %v2796_v25, %v2707_v53 }
 0x3a6   : > { %v5153_v2 = vadd.f32 %v2758_v13, %v2669_v9 }
 0x3a8   : > { %v2915_v43 = vmul.f32 %v5153_v2, %v5153_v2  ;;  %v2838_v45 = vsel %vm2836_vm5, %v5153_v2, 0.0 }
 0x3a9   : > { %v2839_v9 = vadd.f32 %v2838_v45, %v2837_v1 }
 0x3aa   : > { %v2947_v29 = vsel %vm2836_vm5, %v2915_v43, 0.0 }
 0x3ac   : > { %v2709_v48 = vpop.f32.mrf.mxu2  ;;  %v2798_v22 = vpop.f32.mrf.mxu3 }
 0x3ad   : > { %v2672_v14 = vpop.f32.mrf.mxu0  ;;  %v2761_v47 = vpop.f32.mrf.mxu1  ;;  %v5159_v49 = vadd.f32 %v2798_v22, %v2709_v48  ;;  %v2948_v22 = vadd.f32 %v2947_v29, %v2946_v0 }
 0x3ae   : > { %v5157_v54 = vadd.f32 %v2761_v47, %v2672_v14 }
 0x3b0   : > { %v2916_v33 = vmul.f32 %v5157_v54, %v5157_v54  ;;  %v2840_v3 = vsel %vm2836_vm5, %v5157_v54, 0.0 }
 0x3b2   : > { %v2949_v25 = vsel %vm2836_vm5, %v2916_v33, 0.0 }
 0x3b4   : > { %v2712_v55 = vpop.f32.mrf.mxu2  ;;  %v2801_v39 = vpop.f32.mrf.mxu3 }
 0x3b5   : > { %v2674_v56 = vpop.f32.mrf.mxu0  ;;  %v2763_v16 = vpop.f32.mrf.mxu1  ;;  %v5163_v15 = vadd.f32 %v2801_v39, %v2712_v55 }
 0x3b6   : > { %v5161_v50 = vadd.f32 %v2763_v16, %v2674_v56  ;;  %v2841_v56 = vadd.f32 %v2840_v3, %v2839_v9 }
 0x3b8   : > { %v2917_v17 = vmul.f32 %v5161_v50, %v5161_v50  ;;  %v2842_v14 = vsel %vm2836_vm5, %v5161_v50, 0.0 }
 0x3ba   : > { %v2951_v16 = vsel %vm2836_vm5, %v2917_v17, 0.0 }
 0x3bc   : > { %v2714_v60 = vpop.f32.mrf.mxu2  ;;  %v2803_v5 = vpop.f32.mrf.mxu3 }
 0x3bd   : > { %v2677_v26 = vpop.f32.mrf.mxu0  ;;  %v2766_v52 = vpop.f32.mrf.mxu1  ;;  %v5167_v34 = vadd.f32 %v2803_v5, %v2714_v60  ;;  %v2843_v60 = vadd.f32 %v2842_v14, %v2841_v56 }
 0x3be   : > { %v5165_v40 = vadd.f32 %v2766_v52, %v2677_v26  ;;  %v2950_v52 = vadd.f32 %v2949_v25, %v2948_v22 }
 0x3c0   : > { %v2918_v47 = vmul.f32 %v5165_v40, %v5165_v40  ;;  %v2844_v55 = vsel %vm2836_vm5, %v5165_v40, 0.0 }
 0x3c2   : > { %v2953_v5 = vsel %vm2836_vm5, %v2918_v47, 0.0 }
 0x3c4   : > { %v2717_v28 = vpop.f32.mrf.mxu2  ;;  %v2806_v10 = vpop.f32.mrf.mxu3 }
 0x3c5   : > { %v2679_v35 = vpop.f32.mrf.mxu0  ;;  %v2768_v27 = vpop.f32.mrf.mxu1  ;;  %v5169_v51 = vadd.f32 %v2806_v10, %v2717_v28  ;;  %v2952_v10 = vadd.f32 %v2951_v16, %v2950_v52 }
 0x3c6   : > { %v5206_v58 = vadd.f32 %v2768_v27, %v2679_v35 }
 0x3c7   : > { %v2954_v44 = vadd.f32 %v2953_v5, %v2952_v10 }
 0x3c8   : > { %v2919_v39 = vmul.f32 %v5206_v58, %v5206_v58  ;;  %v2846_v35 = vsel %vm2836_vm5, %v5206_v58, 0.0 }
 0x3cc   : > { %v5171_v62 = vpop.f32.mrf.mxu2  ;;  %v5173_v11 = vpop.f32.mrf.mxu3 }
 0x3cd   : > { %v2682_v4 = vpop.f32.mrf.mxu0  ;;  %v2771_v7 = vpop.f32.mrf.mxu1 }
 0x3ce   : > { %v5218_v48 = vadd.f32 %v2771_v7, %v2682_v4  ;;  %v2845_v4 = vadd.f32 %v2844_v55, %v2843_v60  ;;  %v2955_v7 = vsel %vm2836_vm5, %v2919_v39, 0.0 }
 0x3cf   : > { %v2956_v17 = vadd.f32 %v2955_v7, %v2954_v44 }
 0x3d0   : > { %v2920_v27 = vmul.f32 %v5218_v48, %v5218_v48  ;;  %v2847_v45 = vadd.f32 %v2846_v35, %v2845_v4 }
 0x3d2   : > { %v2957_v29 = vsel %vm2836_vm5, %v2920_v27, 0.0 }
 0x3d3   : > { %v2958_v22 = vadd.f32 %v2957_v29, %v2956_v17 }
 0x3d4   : > { %v5175_v24 = vpop.f32.mrf.mxu2  ;;  %v5177_v21 = vpop.f32.mrf.mxu3 }
 0x3d5   : > { %v2684_v59 = vpop.f32.mrf.mxu0  ;;  %v2773_v6 = vpop.f32.mrf.mxu1 }
 0x3d6   : > { %v5225_v26 = vadd.f32 %v2773_v6, %v2684_v59  ;;  %v2848_v59 = vsel %vm2836_vm5, %v5218_v48, 0.0 }
 0x3d7   : > { %v2849_v0 = vadd.f32 %v2848_v59, %v2847_v45 }
 0x3d8   : > { %v2921_v6 = vmul.f32 %v5225_v26, %v5225_v26 }
 0x3dc   : > { %v5179_v12 = vpop.f32.mrf.mxu2  ;;  %v5181_v46 = vpop.f32.mrf.mxu3 }
 0x3dd   : > { %v2687_v61 = vpop.f32.mrf.mxu0  ;;  %v2776_v23 = vpop.f32.mrf.mxu1 }
 0x3de   : > { %v5232_v28 = vadd.f32 %v2776_v23, %v2687_v61  ;;  %v2850_v61 = vsel %vm2836_vm5, %v5225_v26, 0.0 }
 0x3df   : > { %v2851_v56 = vadd.f32 %v2850_v61, %v2849_v0 }
 0x3e0   : > { %v2922_v23 = vmul.f32 %v5232_v28, %v5232_v28  ;;  %v2852_v25 = vsel %vm2836_vm5, %v5232_v28, 0.0 }
 0x3e1   : > { %v2853_v52 = vadd.f32 %v2852_v25, %v2851_v56 }
 0x3e4   : > { %v5183_v32 = vpop.f32.mrf.mxu2  ;;  %v5185_v31 = vpop.f32.mrf.mxu3 }
 0x3e5   : > { %v2689_v18 = vpop.f32.mrf.mxu0  ;;  %v2778_v41 = vpop.f32.mrf.mxu1 }
 0x3e6   : > { %v5239_v43 = vadd.f32 %v2778_v41, %v2689_v18  ;;  %v2959_v41 = vsel %vm2836_vm5, %v2921_v6, 0.0 }
 0x3e7   : > { %v2960_v39 = vadd.f32 %v2959_v41, %v2958_v22 }
 0x3e8   : > { %v2923_v14 = vmul.f32 %v5239_v43, %v5239_v43 }
 0x3ea   : > { %v2963_v60 = vsel %vm2836_vm5, %v2923_v14, 0.0 }
 0x3ec   : > { %v5187_v8 = vpop.f32.mrf.mxu2  ;;  %v5189_v42 = vpop.f32.mrf.mxu3 }
 0x3ed   : > { %v2692_v20 = vpop.f32.mrf.mxu0  ;;  %v2781_v36 = vpop.f32.mrf.mxu1 }
 0x3ee   : > { %v5246_v3 = vadd.f32 %v2781_v36, %v2692_v20  ;;  %v2961_v20 = vsel %vm2836_vm5, %v2922_v23, 0.0  ;;  %v2854_v36 = vsel %vm2836_vm5, %v5239_v43, 0.0 }
 0x3ef   : > { %v2962_v35 = vadd.f32 %v2961_v20, %v2960_v39  ;;  %v2855_v27 = vadd.f32 %v2854_v36, %v2853_v52 }
 0x3f0   : > { %v2924_v16 = vmul.f32 %v5246_v3, %v5246_v3 }
 0x3f1   : > { %v2964_v6 = vadd.f32 %v2963_v60, %v2962_v35 }
 0x3f2   : > { %v2965_v7 = vsel %vm2836_vm5, %v2924_v16, 0.0 }
 0x3f3   : > { %v2966_v29 = vadd.f32 %v2965_v7, %v2964_v6  ;;  %v2931_v6 = vmul.f32 %v5159_v49, %v5159_v49 }
 0x3f4   : > { %v5208_v38 = vpop.f32.mrf.mxu2  ;;  %v5210_v30 = vpop.f32.mrf.mxu3 }
 0x3f5   : > { %v2694_v19 = vpop.f32.mrf.mxu0  ;;  %v2783_v57 = vpop.f32.mrf.mxu1 }
 0x3f6   : > { %v5257_v47 = vadd.f32 %v2783_v57, %v2694_v19  ;;  %v2856_v19 = vsel %vm2836_vm5, %v5246_v3, 0.0 }
 0x3f7   : > { %v2857_v44 = vadd.f32 %v2856_v19, %v2855_v27  ;;  %v2930_v27 = vmul.f32 %v5155_v63, %v5155_v63 }
 0x3f8   : > { %v2925_v57 = vmul.f32 %v5257_v47, %v5257_v47 }
 0x3fa   : > { %v2967_v45 = vsel %vm2836_vm5, %v2925_v57, 0.0 }
 0x3fb   : > { %v2968_v14 = vadd.f32 %v2967_v45, %v2966_v29 }
 0x3fc   : > { %v5248_v9 = vpop.f32.mrf.mxu2  ;;  %v5250_v18 = vpop.f32.mrf.mxu3 }
 0x3fd   : > { %v2697_v13 = vpop.f32.mrf.mxu0  ;;  %v2786_v53 = vpop.f32.mrf.mxu1 }
 0x3fe   : > { %v5264_v55 = vadd.f32 %v2786_v53, %v2697_v13  ;;  %v2858_v13 = vsel %vm2836_vm5, %v5257_v47, 0.0 }
 0x3ff   : > { %v2859_v61 = vadd.f32 %v2858_v13, %v2857_v44 }
 0x400   : > { %v2926_v53 = vmul.f32 %v5264_v55, %v5264_v55 }
 0x402   : > { %v2969_v0 = vsel %vm2836_vm5, %v2926_v53, 0.0  ;;  %v2868_v53 = vsel %vm2836_vm5, %v5155_v63, 0.0 }
 0x403   : > { %v2970_v36 = vadd.f32 %v2969_v0, %v2968_v14  ;;  %v2870_v0 = vsel %vm2836_vm5, %v5159_v49, 0.0 }
 0x404   : > { %v5285_v23 = vpop.f32.mrf.mxu2  ;;  %v5287_v17 = vpop.f32.mrf.mxu3 }
 0x405   : > { %v2699_v33 = vpop.f32.mrf.mxu0  ;;  %v2788_v1 = vpop.f32.mrf.mxu1 }
 0x406   : > { %v5271_v5 = vadd.f32 %v2788_v1, %v2699_v33  ;;  %v2860_v33 = vsel %vm2836_vm5, %v5264_v55, 0.0 }
 0x407   : > { %v2861_v22 = vadd.f32 %v2860_v33, %v2859_v61  ;;  %v2977_v61 = vsel %vm2836_vm5, %v2930_v27, 0.0 }
 0x408   : > { %v2927_v1 = vmul.f32 %v5271_v5, %v5271_v5  ;;  %v2862_v41 = vsel %vm2836_vm5, %v5271_v5, 0.0 }
 0x409   : > { %v2863_v16 = vadd.f32 %v2862_v41, %v2861_v22  ;;  %v2932_v41 = vmul.f32 %v5163_v15, %v5163_v15  ;;  %v2979_v22 = vsel %vm2836_vm5, %v2931_v6, 0.0 }
 0x40a   : > { %v2971_v56 = vsel %vm2836_vm5, %v2927_v1, 0.0 }
 0x40b   : > { %v2972_v57 = vadd.f32 %v2971_v56, %v2970_v36  ;;  %v2872_v56 = vsel %vm2836_vm5, %v5163_v15, 0.0  ;;  %v5323_v36 = vadd.f32 %v5173_v11, %v5171_v62  ;;  %v2876_v62 = vsel %vm2836_vm5, %v5169_v51, 0.0 }
 0x40c   : > { %v2739_v1 = vpop.f32.mrf.mxu2  ;;  %v2828_v29 = vpop.f32.mrf.mxu3 }
 0x40d   : > { %v2702_v10 = vpop.f32.mrf.mxu0  ;;  %v2791_v4 = vpop.f32.mrf.mxu1  ;;  %v2935_v11 = vmul.f32 %v5323_v36, %v5323_v36  ;;  %v2878_v6 = vsel %vm2836_vm5, %v5323_v36, 0.0 }
 0x40e   : > { %v5278_v59 = vadd.f32 %v2791_v4, %v2702_v10 }
 0x410   : > { %v2928_v25 = vmul.f32 %v5278_v59, %v5278_v59  ;;  %v2864_v20 = vsel %vm2836_vm5, %v5278_v59, 0.0 }
 0x411   : > { %v2865_v35 = vadd.f32 %v2864_v20, %v2863_v16  ;;  %v2933_v20 = vmul.f32 %v5167_v34, %v5167_v34  ;;  %v5327_v16 = vadd.f32 %v5177_v21, %v5175_v24  ;;  %v5341_v24 = vadd.f32 %v5181_v46, %v5179_v12 }
 0x412   : > { %v2973_v60 = vsel %vm2836_vm5, %v2928_v25, 0.0  ;;  %v2987_v12 = vsel %vm2836_vm5, %v2935_v11, 0.0 }
 0x413   : > { %v2974_v7 = vadd.f32 %v2973_v60, %v2972_v57  ;;  %v2981_v60 = vsel %vm2836_vm5, %v2932_v41, 0.0  ;;  %v2874_v57 = vsel %vm2836_vm5, %v5167_v34, 0.0  ;;  %v2936_v21 = vmul.f32 %v5327_v16, %v5327_v16 }
 0x414   : > { %v2880_v46 = vsel %vm2836_vm5, %v5327_v16, 0.0  ;;  %v2937_v41 = vmul.f32 %v5341_v24, %v5341_v24 }
 0x415   : > { %v2704_v39 = vpop.f32.mrf.mxu0  ;;  %v2793_v52 = vpop.f32.mrf.mxu1 }
 0x416   : > { %v5298_v19 = vadd.f32 %v2793_v52, %v2704_v39 }
 0x418   : > { %v2866_v10 = vsel %vm2836_vm5, %v5298_v19, 0.0  ;;  %v2929_v4 = vmul.f32 %v5298_v19, %v5298_v19 }
 0x419   : > { %v2867_v13 = vadd.f32 %v2866_v10, %v2865_v35  ;;  %v2934_v35 = vmul.f32 %v5169_v51, %v5169_v51 }
 0x41a   : > { %v2975_v44 = vsel %vm2836_vm5, %v2929_v4, 0.0  ;;  %v2983_v4 = vsel %vm2836_vm5, %v2933_v20, 0.0  ;;  %v5368_v20 = vadd.f32 %v5210_v30, %v5208_v38 }
 0x41b   : > { %v2869_v45 = vadd.f32 %v2868_v53, %v2867_v13  ;;  %v2976_v33 = vadd.f32 %v2975_v44, %v2974_v7  ;;  %v2985_v53 = vsel %vm2836_vm5, %v2934_v35, 0.0  ;;  %v5350_v44 = vadd.f32 %v5185_v31, %v5183_v32 }
 0x41d   : > { %v2871_v25 = vadd.f32 %v2870_v0, %v2869_v45  ;;  %v2978_v14 = vadd.f32 %v2977_v61, %v2976_v33  ;;  %v2742_v61 = vpop.f32.mrf.mxu2  ;;  %v2831_v0 = vpop.f32.mrf.mxu3 }
 0x41f   : > { %v2873_v39 = vadd.f32 %v2872_v56, %v2871_v25  ;;  %v2980_v52 = vadd.f32 %v2979_v22, %v2978_v14  ;;  %v5359_v25 = vadd.f32 %v5189_v42, %v5187_v8  ;;  %v2989_v14 = vsel %vm2836_vm5, %v2936_v21, 0.0 }
 0x420   : > { %v2882_v22 = vsel %vm2836_vm5, %v5341_v24, 0.0  ;;  %v2938_v56 = vmul.f32 %v5350_v44, %v5350_v44  ;;  %v2884_v8 = vsel %vm2836_vm5, %v5350_v44, 0.0 }
 0x421   : > { %v2875_v27 = vadd.f32 %v2874_v57, %v2873_v39  ;;  %v2982_v10 = vadd.f32 %v2981_v60, %v2980_v52  ;;  %v2991_v60 = vsel %vm2836_vm5, %v2937_v41, 0.0  ;;  %v2939_v42 = vmul.f32 %v5359_v25, %v5359_v25 }
 0x422   : > { %v5377_v57 = vadd.f32 %v5250_v18, %v5248_v9  ;;  %v2993_v38 = vsel %vm2836_vm5, %v2938_v56, 0.0  ;;  %v2886_v30 = vsel %vm2836_vm5, %v5359_v25, 0.0  ;;  %v2888_v18 = vsel %vm2836_vm5, %v5368_v20, 0.0 }
 0x423   : > { %v2877_v7 = vadd.f32 %v2876_v62, %v2875_v27  ;;  %v2984_v13 = vadd.f32 %v2983_v4, %v2982_v10  ;;  %v4308_v10 = vmov 256.0   ;;  %v2940_v4 = vmul.f32 %v5368_v20, %v5368_v20 }
 0x424   : > { %4198 = vrcp.f32 %v4308_v10  ;;  %v5386_v62 = vadd.f32 %v5287_v17, %v5285_v23  ;;  %v2995_v9 = vsel %vm2836_vm5, %v2939_v42, 0.0  ;;  %v2890_v23 = vsel %vm2836_vm5, %v5377_v57, 0.0 }
 0x425   : > { %v2879_v45 = vadd.f32 %v2878_v6, %v2877_v7  ;;  %v2986_v33 = vadd.f32 %v2985_v53, %v2984_v13  ;;  %v2941_v7 = vmul.f32 %v5377_v57, %v5377_v57  ;;  %v5393_v13 = vadd.f32 %v2828_v29, %v2739_v1 }
 0x426   : > { %v2942_v17 = vmul.f32 %v5386_v62, %v5386_v62  ;;  %v2892_v29 = vsel %vm2836_vm5, %v5386_v62, 0.0 }
 0x427   : > { %v2988_v32 = vadd.f32 %v2987_v12, %v2986_v33  ;;  %v2881_v31 = vadd.f32 %v2880_v46, %v2879_v45  ;;  %v2744_v45 = vpop.f32.mrf.mxu2  ;;  %v2833_v33 = vpop.f32.mrf.mxu3  ;;  %v2997_v12 = vsel %vm2836_vm5, %v2940_v4, 0.0  ;;  %v5400_v46 = vadd.f32 %v2831_v0, %v2742_v61 }
 0x428   : > { %v2999_v1 = vsel %vm2836_vm5, %v2941_v7, 0.0  ;;  %v2894_v61 = vsel %vm2836_vm5, %v5393_v13, 0.0 }
 0x429   : > { %v2883_v39 = vadd.f32 %v2882_v22, %v2881_v31  ;;  %v2990_v52 = vadd.f32 %v2989_v14, %v2988_v32  ;;  %v2943_v31 = vmul.f32 %v5393_v13, %v5393_v13  ;;  %v5407_v22 = vadd.f32 %v2833_v33, %v2744_v45 }
 0x42a   : > { %v4199_v41 = vpop.eup %4198  ;;  %v2944_v0 = vmul.f32 %v5400_v46, %v5400_v46 }
 0x42b   : > { %v2885_v35 = vadd.f32 %v2884_v8, %v2883_v39  ;;  %v2992_v27 = vadd.f32 %v2991_v60, %v2990_v52  ;;  %v3001_v52 = vsel %vm2836_vm5, %v2942_v17, 0.0  ;;  %v2907_v60 = vmul.f32 256.0, %v4199_v41 }
 0x42c   : > { %v2945_v10 = vmul.f32 %v5407_v22, %v5407_v22  ;;  %v3005_v4 = vsel %vm2836_vm5, %v2944_v0, 0.0  ;;  %vm2911_vm6 = vweird.f32 %v4199_v41 }
 0x42d   : > { %v2887_v11 = vadd.f32 %v2886_v30, %v2885_v35  ;;  %v2994_v21 = vadd.f32 %v2993_v38, %v2992_v27  ;;  %v3003_v35 = vsel %vm2836_vm5, %v2943_v31, 0.0  ;;  %v2896_v27 = vsel %vm2836_vm5, %v5400_v46, 0.0 }
 0x42e   : > { %v3007_v7 = vsel %vm2836_vm5, %v2945_v10, 0.0 }
 0x42f   : > { %v2889_v53 = vadd.f32 %v2888_v18, %v2887_v11  ;;  %v2996_v6 = vadd.f32 %v2995_v9, %v2994_v21  ;;  %v2898_v11 = vsel %vm2836_vm5, %v5407_v22, 0.0  ;;  %v2908_v21 = vsub.f32 1.0, %v2907_v60 }
 0x431   : > { %v2891_v14 = vadd.f32 %v2890_v23, %v2889_v53  ;;  %v2998_v32 = vadd.f32 %v2997_v12, %v2996_v6  ;;  %v2909_v45 = vmul.f32 %v4199_v41, %v2908_v21 }
 0x433   : > { %v2893_v56 = vadd.f32 %v2892_v29, %v2891_v14  ;;  %v3000_v39 = vadd.f32 %v2999_v1, %v2998_v32  ;;  %v2910_v14 = vadd.f32 %v4199_v41, %v2909_v45 }
 0x435   : > { %v3002_v8 = vadd.f32 %v3001_v52, %v3000_v39  ;;  %v2895_v42 = vadd.f32 %v2894_v61, %v2893_v56  ;;  %v2912_v56 = vsel %vm2911_vm6, %v4199_v41, %v2910_v14  ;;  %v3030_v41 = vld [vmem:[%s5801_s4] sm:$0x1] }
 0x437   : > { %v3004_v38 = vadd.f32 %v3003_v35, %v3002_v8  ;;  %v2897_v30 = vadd.f32 %v2896_v27, %v2895_v42 }
 0x439   : > { %v3006_v9 = vadd.f32 %v3005_v4, %v3004_v38  ;;  %v2899_v18 = vadd.f32 %v2898_v11, %v2897_v30 }
 0x43b   : > { %v2900_v53 = vrot.slane %v2899_v18, 4  ;;  %v3008_v6 = vadd.f32 %v3007_v7, %v3006_v9  ;;  %v3032_v7 = vld [vmem:[%s5801_s4 + $0x1] sm:$0x1] }
 0x43d   : > { %v2901_v33 = vadd.f32 %v2900_v53, %v2899_v18  ;;  %v3009_v12 = vrot.slane %v3008_v6, 4 }
 0x43f   : > { %v2902_v23 = vrot.slane %v2901_v33, 2  ;;  %v3010_v17 = vadd.f32 %v3009_v12, %v3008_v6 }
 0x441   : > { %v2903_v32 = vadd.f32 %v2902_v23, %v2901_v33  ;;  %v3011_v1 = vrot.slane %v3010_v17, 2 }
 0x443   : > { %v2904_v29 = vrot.slane %v2903_v32, 1  ;;  %v3012_v31 = vadd.f32 %v3011_v1, %v3010_v17 }
 0x445   : > { %v2905_v39 = vadd.f32 %v2904_v29, %v2903_v32  ;;  %v3013_v52 = vrot.slane %v3012_v31, 1  ;;  %v5447_v29 = vld [vmem:[%s5801_s4 + $0x2] ss:$0 sm:$0xff] }
 0x447   : > { %v2913_v61 = vmul.f32 %v2912_v56, %v2905_v39  ;;  %v3014_v0 = vadd.f32 %v3013_v52, %v3012_v31 }
 0x449   : > { %v3015_v60 = vmul.f32 %v3014_v0, %v2912_v56  ;;  %v3016_v8 = vmul.f32 %v2913_v61, %v2913_v61 }
 0x44b   : > { %v3017_v42 = vsub.f32 %v3015_v60, %v3016_v8 }
 0x44d   : > { %v3018_v35 = vmax.f32 %v3017_v42, 0.0 }
 0x44f   : > { %v3019_v27 = vadd.f32 1e-05, %v3018_v35 }
 0x451   : > { %4200 = vrsqrt.f32 %v3019_v27  ;;  %vm3026_vm8 = vweird.f32 %v3019_v27 }
 0x457   : > { %v4201_v10 = vpop.eup %4200 }
 0x458   : > { %v3021_v38 = vmul.f32 %v4201_v10, %v3019_v27  ;;  %vm3027_vm7 = vweird.f32 %v4201_v10 }
 0x459   : > { %vm3028_vm9 = vmor %vm3026_vm8, %vm3027_vm7 }
 0x45a   : > { %v3022_v30 = vmul.f32 %v4201_v10, %v3021_v38 }
 0x45c   : > { %v3023_v4 = vmul.f32 0.5, %v3022_v30 }
 0x45e   : > { %v3024_v11 = vsub.f32 1.5, %v3023_v4 }
 0x460   : > { %v3025_v21 = vmul.f32 %v4201_v10, %v3024_v11 }
 0x462   : > { %v3029_v9 = vsel %vm3028_vm9, %v4201_v10, %v3025_v21 }
 0x463   : > { %v3031_v18 = vmul.f32 %v3030_v41, %v3029_v9 }
 0x465   : > { %v3033_v53 = vmul.f32 %v3031_v18, %v2913_v61  ;;  %v5429_v45 = vperm.slane %v3031_v18, 0 }
 0x467   : > { %v3034_v6 = vsub.f32 %v3032_v7, %v3033_v53  ;;  %v3038_v12 = vmul.f32 %v5429_v45, %v5157_v54  ;;  %v3040_v23 = vmul.f32 %v5429_v45, %v5165_v40  ;;  %v3036_v17 = vmul.f32 %v5429_v45, %v5151_v37 }
 0x468   : > { %v3039_v14 = vmul.f32 %v5429_v45, %v5161_v50  ;;  %v3041_v32 = vmul.f32 %v5429_v45, %v5206_v58  ;;  %v3037_v40 = vmul.f32 %v5429_v45, %v5153_v2  ;;  %v3043_v38 = vmul.f32 %v5429_v45, %v5225_v26 }
 0x469   : > { %v5431_v33 = vperm.slane %v3034_v6, 0  ;;  %v3044_v30 = vmul.f32 %v5429_v45, %v5232_v28  ;;  %v3042_v4 = vmul.f32 %v5429_v45, %v5218_v48  ;;  %v3045_v26 = vmul.f32 %v5429_v45, %v5239_v43 }
 0x46a   : > { %v3046_v28 = vmul.f32 %v5429_v45, %v5246_v3  ;;  %v3047_v48 = vmul.f32 %v5429_v45, %v5257_v47  ;;  %v3049_v47 = vmul.f32 %v5429_v45, %v5271_v5 }
 0x46b   : > { %v3073_v1 = vadd.f32 %v5431_v33, %v3040_v23  ;;  %v3071_v54 = vadd.f32 %v5431_v33, %v3038_v12  ;;  %v3069_v37 = vadd.f32 %v5431_v33, %v3036_v17  ;;  %v3074_v50 = vadd.f32 %v5431_v33, %v3041_v32 }
 0x46c   : > { %v3072_v58 = vadd.f32 %v5431_v33, %v3039_v14  ;;  %v3070_v52 = vadd.f32 %v5431_v33, %v3037_v40  ;;  %v3077_v41 = vadd.f32 %v5431_v33, %v3044_v30  ;;  %v3076_v9 = vadd.f32 %v5431_v33, %v3043_v38 }
 0x46d   : > { %v3105_v31 = vmax.f32 %v3073_v1, 0.0  ;;  %v3103_v56 = vmax.f32 %v3071_v54, 0.0  ;;  %v3101_v39 = vmax.f32 %v3069_v37, 0.0  ;;  %v3106_v42 = vmax.f32 %v3074_v50, 0.0 }
 0x46e   : > { %v3104_v35 = vmax.f32 %v3072_v58, 0.0  ;;  %v3102_v10 = vmax.f32 %v3070_v52, 0.0  ;;  %v3075_v7 = vadd.f32 %v5431_v33, %v3042_v4  ;;  %v3109_v12 = vmax.f32 %v3077_v41, 0.0 }
 0x46f   : > { %v3139_v61 = vmul.f32 %v5447_v29, %v3105_v31  ;;  %v3137_v0 = vmul.f32 %v5447_v29, %v3103_v56  ;;  %v3135_v60 = vmul.f32 %v5447_v29, %v3101_v39  ;;  %v3140_v11 = vmul.f32 %v5447_v29, %v3106_v42 }
 0x470   : > { %v3138_v21 = vmul.f32 %v5447_v29, %v3104_v35  ;;  %v3136_v18 = vmul.f32 %v5447_v29, %v3102_v10  ;;  %v3108_v23 = vmax.f32 %v3076_v9, 0.0  ;;  %v3107_v14 = vmax.f32 %v3075_v7, 0.0 }
 0x471   : > { %v3179_v8 = vsel %vm2836_vm5, %v3139_v61, 0.0  ;;  %v3173_v2 = vsel %vm2836_vm5, %v3137_v0, 0.0  ;;  %v3167_v27 = vsel %vm2836_vm5, %v3135_v60, 0.0  ;;  %v3182_v53 = vsel %vm2836_vm5, %v3140_v11, 0.0 }
 0x472   : > { %3180 = vadd.xlane.f32.xlu2 %v3179_v8  ;;  %3174 = vadd.xlane.f32.xlu1 %v3173_v2  ;;  %v3176_v6 = vsel %vm2836_vm5, %v3138_v21, 0.0  ;;  %v3170_v17 = vsel %vm2836_vm5, %v3136_v18, 0.0  ;;  %v3080_v32 = vadd.f32 %v5431_v33, %v3047_v48  ;;  %v3079_v43 = vadd.f32 %v5431_v33, %v3046_v28 }
 0x473   : > { %3168 = vadd.xlane.f32.xlu0 %v3167_v27  ;;  %v3078_v3 = vadd.f32 %v5431_v33, %v3045_v26  ;;  %v3050_v1 = vmul.f32 %v5429_v45, %v5278_v59  ;;  %v3067_v54 = vmul.f32 %v5429_v45, %v5407_v22  ;;  %v3048_v40 = vmul.f32 %v5429_v45, %v5264_v55 }
 0x474   : > { %v3143_v37 = vmul.f32 %v5447_v29, %v3109_v12  ;;  %v3142_v31 = vmul.f32 %v5447_v29, %v3108_v23  ;;  %v3141_v56 = vmul.f32 %v5447_v29, %v3107_v14  ;;  %v3112_v50 = vmax.f32 %v3080_v32, 0.0 }
 0x475   : > { %v3083_v58 = vadd.f32 %v5431_v33, %v3050_v1  ;;  %v3082_v5 = vadd.f32 %v5431_v33, %v3049_v47  ;;  %v3060_v59 = vmul.f32 %v5429_v45, %v5350_v44  ;;  %v3061_v22 = vmul.f32 %v5429_v45, %v5359_v25 }
 0x476   : > { %v3111_v39 = vmax.f32 %v3079_v43, 0.0  ;;  %v3110_v52 = vmax.f32 %v3078_v3, 0.0  ;;  %v3062_v55 = vmul.f32 %v5429_v45, %v5368_v20  ;;  %v3063_v61 = vmul.f32 %v5429_v45, %v5377_v57 }
 0x477   : > { %v3064_v0 = vmul.f32 %v5429_v45, %v5386_v62  ;;  %v3065_v60 = vmul.f32 %v5429_v45, %v5393_v13  ;;  %v3066_v44 = vmul.f32 %v5429_v45, %v5400_v46  ;;  %v3191_v8 = vsel %vm2836_vm5, %v3143_v37, 0.0 }
 0x478   : > { %v3188_v25 = vsel %vm2836_vm5, %v3142_v31, 0.0  ;;  %v3081_v2 = vadd.f32 %v5431_v33, %v3048_v40  ;;  %v3185_v20 = vsel %vm2836_vm5, %v3141_v56, 0.0  ;;  %v3146_v57 = vmul.f32 %v5447_v29, %v3112_v50 }
 0x479   : > { %v3115_v42 = vmax.f32 %v3083_v58, 0.0  ;;  %v3114_v62 = vmax.f32 %v3082_v5, 0.0  ;;  %v3145_v13 = vmul.f32 %v5447_v29, %v3111_v39  ;;  %v3144_v35 = vmul.f32 %v5447_v29, %v3110_v52 }
 0x47a   : > { %3183 = vadd.xlane.f32.xlu2 %v3182_v53  ;;  %3177 = vadd.xlane.f32.xlu1 %v3176_v6  ;;  %v3095_v46 = vadd.f32 %v5431_v33, %v3062_v55  ;;  %v3094_v27 = vadd.f32 %v5431_v33, %v3061_v22  ;;  %v3093_v10 = vadd.f32 %v5431_v33, %v3060_v59  ;;  %v3200_v43 = vsel %vm2836_vm5, %v3146_v57, 0.0 }
 0x47b   : > { %3171 = vadd.xlane.f32.xlu0 %v3170_v17  ;;  %v3098_v38 = vadd.f32 %v5431_v33, %v3065_v60  ;;  %v3097_v30 = vadd.f32 %v5431_v33, %v3064_v0  ;;  %v3096_v4 = vadd.f32 %v5431_v33, %v3063_v61  ;;  %v3100_v41 = vadd.f32 %v5431_v33, %v3067_v54 }
 0x47c   : > { %v3127_v11 = vmax.f32 %v3095_v46, 0.0  ;;  %v3126_v21 = vmax.f32 %v3094_v27, 0.0  ;;  %v3099_v9 = vadd.f32 %v5431_v33, %v3066_v44  ;;  %v3125_v18 = vmax.f32 %v3093_v10, 0.0 }
 0x47d   : > { %v3130_v7 = vmax.f32 %v3098_v38, 0.0  ;;  %v3129_v26 = vmax.f32 %v3097_v30, 0.0  ;;  %v3128_v28 = vmax.f32 %v3096_v4, 0.0  ;;  %v3132_v6 = vmax.f32 %v3100_v41, 0.0 }
 0x47e   : > { %v5529_v48 = vmul.f32 %v5447_v29, %v3127_v11  ;;  %v5532_v53 = vmul.f32 %v5447_v29, %v3126_v21  ;;  %v3131_v12 = vmax.f32 %v3099_v9, 0.0  ;;  %v5535_v23 = vmul.f32 %v5447_v29, %v3125_v18 }
 0x47f   : > { %v5538_v17 = vmul.f32 %v5447_v29, %v3130_v7  ;;  %v5541_v14 = vmul.f32 %v5447_v29, %v3129_v26  ;;  %v5544_v32 = vmul.f32 %v5447_v29, %v3128_v28  ;;  %v3197_v3 = vsel %vm2836_vm5, %v3145_v13, 0.0 }
 0x480   : > { %v5549_v47 = vmul.f32 %v5447_v29, %v3132_v6  ;;  %v5552_v1 = vmul.f32 %v5447_v29, %v3131_v12  ;;  %v3194_v54 = vsel %vm2836_vm5, %v3144_v35, 0.0  ;;  %v3113_v40 = vmax.f32 %v3081_v2, 0.0 }
 0x481   : > { %v3052_v37 = vmul.f32 %v5429_v45, %v5155_v63  ;;  %v3053_v31 = vmul.f32 %v5429_v45, %v5159_v49  ;;  %v3051_v56 = vmul.f32 %v5429_v45, %v5298_v19  ;;  %v3149_v50 = vmul.f32 %v5447_v29, %v3115_v42 }
 0x482   : > { %3192 = vadd.xlane.f32.xlu2 %v3191_v8  ;;  %3189 = vadd.xlane.f32.xlu1 %v3188_v25  ;;  %v3148_v58 = vmul.f32 %v5447_v29, %v3114_v62  ;;  %v3147_v22 = vmul.f32 %v5447_v29, %v3113_v40  ;;  %v3055_v0 = vmul.f32 %v5429_v45, %v5167_v34  ;;  %v3251_v40 = vsel %vm2836_vm5, %v5541_v14, 0.0 }
 0x483   : > { %3186 = vadd.xlane.f32.xlu0 %v3185_v20  ;;  %v3086_v5 = vadd.f32 %v5431_v33, %v3053_v31  ;;  %v3085_v59 = vadd.f32 %v5431_v33, %v3052_v37  ;;  %v3084_v39 = vadd.f32 %v5431_v33, %v3051_v56  ;;  %v3209_v63 = vsel %vm2836_vm5, %v3149_v50, 0.0 }
 0x484   : > { %v3206_v49 = vsel %vm2836_vm5, %v3148_v58, 0.0  ;;  %v3203_v19 = vsel %vm2836_vm5, %v3147_v22, 0.0  ;;  %v3056_v60 = vmul.f32 %v5429_v45, %v5169_v51  ;;  %v3054_v44 = vmul.f32 %v5429_v45, %v5163_v15 }
 0x485   : > { %v3118_v52 = vmax.f32 %v3086_v5, 0.0  ;;  %v3117_v55 = vmax.f32 %v3085_v59, 0.0  ;;  %v3116_v61 = vmax.f32 %v3084_v39, 0.0  ;;  %v3088_v20 = vadd.f32 %v5431_v33, %v3055_v0 }
 0x486   : > { %v3089_v2 = vadd.f32 %v5431_v33, %v3056_v60  ;;  %v3087_v42 = vadd.f32 %v5431_v33, %v3054_v44  ;;  %v3058_v46 = vmul.f32 %v5429_v45, %v5327_v16  ;;  %v3059_v27 = vmul.f32 %v5429_v45, %v5341_v24 }
 0x487   : > { %v3152_v8 = vmul.f32 %v5447_v29, %v3118_v52  ;;  %v3151_v25 = vmul.f32 %v5447_v29, %v3117_v55  ;;  %v3150_v57 = vmul.f32 %v5447_v29, %v3116_v61  ;;  %v3120_v13 = vmax.f32 %v3088_v20, 0.0 }
 0x488   : > { %v3121_v62 = vmax.f32 %v3089_v2, 0.0  ;;  %v3119_v35 = vmax.f32 %v3087_v42, 0.0  ;;  %v3057_v10 = vmul.f32 %v5429_v45, %v5323_v36  ;;  %v3092_v4 = vadd.f32 %v5431_v33, %v3059_v27 }
 0x489   : > { %v3218_v34 = vsel %vm2836_vm5, %v3152_v8, 0.0  ;;  %v3215_v51 = vsel %vm2836_vm5, %v3151_v25, 0.0  ;;  %v3212_v15 = vsel %vm2836_vm5, %v3150_v57, 0.0  ;;  %v3154_v30 = vmul.f32 %v5447_v29, %v3120_v13 }
 0x48a   : > { %3201 = vadd.xlane.f32.xlu2 %v3200_v43  ;;  %3198 = vadd.xlane.f32.xlu1 %v3197_v3  ;;  %v3155_v38 = vmul.f32 %v5447_v29, %v3121_v62  ;;  %v3091_v11 = vadd.f32 %v5431_v33, %v3058_v46  ;;  %v3153_v21 = vmul.f32 %v5447_v29, %v3119_v35  ;;  %v3124_v9 = vmax.f32 %v3092_v4, 0.0 }
 0x48b   : > { %3195 = vadd.xlane.f32.xlu0 %v3194_v54  ;;  %v3090_v41 = vadd.f32 %v5431_v33, %v3057_v10  ;;  %v3224_v24 = vsel %vm2836_vm5, %v3154_v30, 0.0  ;;  %v3245_v43 = vsel %vm2836_vm5, %v5529_v48, 0.0  ;;  %v3242_v3 = vsel %vm2836_vm5, %v5532_v53, 0.0 }
 0x48c   : > { %v3227_v16 = vsel %vm2836_vm5, %v3155_v38, 0.0  ;;  %v3123_v18 = vmax.f32 %v3091_v11, 0.0  ;;  %v3221_v36 = vsel %vm2836_vm5, %v3153_v21, 0.0  ;;  %v3158_v7 = vmul.f32 %v5447_v29, %v3124_v9 }
 0x48d   : > { %v3122_v45 = vmax.f32 %v3090_v41, 0.0  ;;  %v3254_v54 = vsel %vm2836_vm5, %v5538_v17, 0.0  ;;  %v3248_v48 = vsel %vm2836_vm5, %v5544_v32, 0.0  ;;  %v3260_v53 = vsel %vm2836_vm5, %v5549_v47, 0.0 }
 0x48e   : > { %v3157_v26 = vmul.f32 %v5447_v29, %v3123_v18  ;;  %v3236_v33 = vsel %vm2836_vm5, %v3158_v7, 0.0  ;;  %v5622_v37 = vstv %s3263_s28 }
 0x48f   : > { %v3156_v28 = vmul.f32 %v5447_v29, %v3122_v45  ;;  %v3239_v29 = vsel %vm2836_vm5, %v5535_v23, 0.0  ;;  %v3257_v23 = vsel %vm2836_vm5, %v5552_v1, 0.0 }
 0x490   : > { %v3233_v6 = vsel %vm2836_vm5, %v3157_v26, 0.0 }
 0x491   : > { %v3230_v12 = vsel %vm2836_vm5, %v3156_v28, 0.0 }
 0x492   : > { %3210 = vadd.xlane.f32.xlu2 %v3209_v63  ;;  %3207 = vadd.xlane.f32.xlu1 %v3206_v49 }
 0x493   : > { %3204 = vadd.xlane.f32.xlu0 %v3203_v19 }
 0x49a   : > { %3219 = vadd.xlane.f32.xlu2 %v3218_v34  ;;  %3216 = vadd.xlane.f32.xlu1 %v3215_v51 }
 0x49b   : > { %3213 = vadd.xlane.f32.xlu0 %v3212_v15 }
 0x4a2   : > { %3228 = vadd.xlane.f32.xlu2 %v3227_v16  ;;  %3225 = vadd.xlane.f32.xlu1 %v3224_v24 }
 0x4a3   : > { %3222 = vadd.xlane.f32.xlu0 %v3221_v36 }
 0x4aa   : > { %3237 = vadd.xlane.f32.xlu2 %v3236_v33  ;;  %3234 = vadd.xlane.f32.xlu1 %v3233_v6 }
 0x4ab   : > { %3231 = vadd.xlane.f32.xlu0 %v3230_v12 }
 0x4b2   : > { %3246 = vadd.xlane.f32.xlu2 %v3245_v43  ;;  %3243 = vadd.xlane.f32.xlu1 %v3242_v3 }
 0x4b3   : > { %3240 = vadd.xlane.f32.xlu0 %v3239_v29 }
 0x4ba   : > { %3255 = vadd.xlane.f32.xlu2 %v3254_v54  ;;  %3252 = vadd.xlane.f32.xlu1 %v3251_v40 }
 0x4bb   : > { %3249 = vadd.xlane.f32.xlu0 %v3248_v48 }
 0x4c2   : > { %3261 = vadd.xlane.f32.xlu1 %v3260_v53 }
 0x4c3   : > { %3258 = vadd.xlane.f32.xlu0 %v3257_v23 }
 0x4e5   : > { %v3181_v17 = vpop.xlane.xlu2 %3180  ;;  %v3175_v14 = vpop.xlane.xlu1 %3174 }
 0x4e6   : > { %v3269_v31 = vadd.f32 %v5622_v37, %v3181_v17  ;;  %v3267_v56 = vadd.f32 %v5622_v37, %v3175_v14  ;;  %v3169_v32 = vpop.xlane.xlu0 %3168 }
 0x4e7   : > { %v3265_v50 = vadd.f32 %v5622_v37, %v3169_v32 }
 0x4e8   : > { %3302 = vst.msk [vmem:[%s5803_s6 + $0x20] sm:$0xff] %vm3297_vm10, %v3269_v31 }
 0x4e9   : > { %3300 = vst.msk [vmem:[%s5803_s6 + $0x10] sm:$0xff] %vm3297_vm10, %v3267_v56 }
 0x4ea   : > { %3298 = vst.msk [vmem:[%s5803_s6] sm:$0xff] %vm3297_vm10, %v3265_v50 }
 0x4ed   : > { %v3184_v47 = vpop.xlane.xlu2 %3183  ;;  %v3178_v1 = vpop.xlane.xlu1 %3177 }
 0x4ee   : > { %v3270_v58 = vadd.f32 %v5622_v37, %v3184_v47  ;;  %v3268_v5 = vadd.f32 %v5622_v37, %v3178_v1  ;;  %v3172_v59 = vpop.xlane.xlu0 %3171 }
 0x4ef   : > { %v3266_v22 = vadd.f32 %v5622_v37, %v3172_v59 }
 0x4f0   : > { %3303 = vst.msk [vmem:[%s5803_s6 + $0x28] sm:$0xff] %vm3297_vm10, %v3270_v58 }
 0x4f1   : > { %3301 = vst.msk [vmem:[%s5803_s6 + $0x18] sm:$0xff] %vm3297_vm10, %v3268_v5 }
 0x4f2   : > { %3299 = vst.msk [vmem:[%s5803_s6 + $0x8] sm:$0xff] %vm3297_vm10, %v3266_v22 }
 0x4f5   : > { %v3193_v39 = vpop.xlane.xlu2 %3192  ;;  %v3190_v63 = vpop.xlane.xlu1 %3189 }
 0x4f6   : > { %v3273_v49 = vadd.f32 %v5622_v37, %v3193_v39  ;;  %v3272_v52 = vadd.f32 %v5622_v37, %v3190_v63  ;;  %v3187_v55 = vpop.xlane.xlu0 %3186 }
 0x4f7   : > { %v3271_v19 = vadd.f32 %v5622_v37, %v3187_v55 }
 0x4f8   : > { %3306 = vst.msk [vmem:[%s5803_s6 + $0x40] sm:$0xff] %vm3297_vm10, %v3273_v49 }
 0x4f9   : > { %3305 = vst.msk [vmem:[%s5803_s6 + $0x38] sm:$0xff] %vm3297_vm10, %v3272_v52 }
 0x4fa   : > { %3304 = vst.msk [vmem:[%s5803_s6 + $0x30] sm:$0xff] %vm3297_vm10, %v3271_v19 }
 0x4fd   : > { %v3202_v61 = vpop.xlane.xlu2 %3201  ;;  %v3199_v0 = vpop.xlane.xlu1 %3198 }
 0x4fe   : > { %v3276_v60 = vadd.f32 %v5622_v37, %v3202_v61  ;;  %v3275_v44 = vadd.f32 %v5622_v37, %v3199_v0  ;;  %v3196_v8 = vpop.xlane.xlu0 %3195 }
 0x4ff   : > { %v3274_v25 = vadd.f32 %v5622_v37, %v3196_v8 }
 0x500   : > { %3309 = vst.msk [vmem:[%s5803_s6 + $0x58] sm:$0xff] %vm3297_vm10, %v3276_v60 }
 0x501   : > { %3308 = vst.msk [vmem:[%s5803_s6 + $0x50] sm:$0xff] %vm3297_vm10, %v3275_v44 }
 0x502   : > { %3307 = vst.msk [vmem:[%s5803_s6 + $0x48] sm:$0xff] %vm3297_vm10, %v3274_v25 }
 0x505   : > { %v3211_v2 = vpop.xlane.xlu2 %3210  ;;  %v3208_v20 = vpop.xlane.xlu1 %3207 }
 0x506   : > { %v3279_v57 = vadd.f32 %v5622_v37, %v3211_v2  ;;  %v3278_v42 = vadd.f32 %v5622_v37, %v3208_v20  ;;  %v3205_v34 = vpop.xlane.xlu0 %3204 }
 0x507   : > { %v3277_v51 = vadd.f32 %v5622_v37, %v3205_v34 }
 0x508   : > { %3312 = vst.msk [vmem:[%s5803_s6 + $0x70] sm:$0xff] %vm3297_vm10, %v3279_v57 }
 0x509   : > { %3311 = vst.msk [vmem:[%s5803_s6 + $0x68] sm:$0xff] %vm3297_vm10, %v3278_v42 }
 0x50a   : > { %3310 = vst.msk [vmem:[%s5803_s6 + $0x60] sm:$0xff] %vm3297_vm10, %v3277_v51 }
 0x50d   : > { %v3220_v62 = vpop.xlane.xlu2 %3219  ;;  %v3217_v13 = vpop.xlane.xlu1 %3216 }
 0x50e   : > { %v3282_v15 = vadd.f32 %v5622_v37, %v3220_v62  ;;  %v3281_v35 = vadd.f32 %v5622_v37, %v3217_v13  ;;  %v3214_v46 = vpop.xlane.xlu0 %3213 }
 0x50f   : > { %v3280_v27 = vadd.f32 %v5622_v37, %v3214_v46 }
 0x510   : > { %3315 = vst.msk [vmem:[%s5803_s6 + $0x88] sm:$0xff] %vm3297_vm10, %v3282_v15 }
 0x511   : > { %3314 = vst.msk [vmem:[%s5803_s6 + $0x80] sm:$0xff] %vm3297_vm10, %v3281_v35 }
 0x512   : > { %3313 = vst.msk [vmem:[%s5803_s6 + $0x78] sm:$0xff] %vm3297_vm10, %v3280_v27 }
 0x515   : > { %v3229_v10 = vpop.xlane.xlu2 %3228  ;;  %v3226_v38 = vpop.xlane.xlu1 %3225 }
 0x516   : > { %v3285_v30 = vadd.f32 %v5622_v37, %v3229_v10  ;;  %v3284_v4 = vadd.f32 %v5622_v37, %v3226_v38  ;;  %v3223_v11 = vpop.xlane.xlu0 %3222 }
 0x517   : > { %v3283_v21 = vadd.f32 %v5622_v37, %v3223_v11 }
 0x518   : > { %3318 = vst.msk [vmem:[%s5803_s6 + $0xa0] sm:$0xff] %vm3297_vm10, %v3285_v30 }
 0x519   : > { %3317 = vst.msk [vmem:[%s5803_s6 + $0x98] sm:$0xff] %vm3297_vm10, %v3284_v4 }
 0x51a   : > { %3316 = vst.msk [vmem:[%s5803_s6 + $0x90] sm:$0xff] %vm3297_vm10, %v3283_v21 }
 0x51d   : > { %v3238_v41 = vpop.xlane.xlu2 %3237  ;;  %v3235_v16 = vpop.xlane.xlu1 %3234 }
 0x51e   : > { %v3288_v24 = vadd.f32 %v5622_v37, %v3238_v41  ;;  %v3287_v9 = vadd.f32 %v5622_v37, %v3235_v16  ;;  %v3232_v18 = vpop.xlane.xlu0 %3231 }
 0x51f   : > { %v3286_v36 = vadd.f32 %v5622_v37, %v3232_v18 }
 0x520   : > { %3321 = vst.msk [vmem:[%s5803_s6 + $0xb8] sm:$0xff] %vm3297_vm10, %v3288_v24 }
 0x521   : > { %3320 = vst.msk [vmem:[%s5803_s6 + $0xb0] sm:$0xff] %vm3297_vm10, %v3287_v9 }
 0x522   : > { %3319 = vst.msk [vmem:[%s5803_s6 + $0xa8] sm:$0xff] %vm3297_vm10, %v3286_v36 }
 0x525   : > { %v3247_v45 = vpop.xlane.xlu2 %3246  ;;  %v3244_v7 = vpop.xlane.xlu1 %3243 }
 0x526   : > { %v3291_v26 = vadd.f32 %v5622_v37, %v3247_v45  ;;  %v3290_v28 = vadd.f32 %v5622_v37, %v3244_v7  ;;  %v3241_v33 = vpop.xlane.xlu0 %3240 }
 0x527   : > { %v3289_v6 = vadd.f32 %v5622_v37, %v3241_v33 }
 0x528   : > { %3324 = vst.msk [vmem:[%s5803_s6 + $0xd0] sm:$0xff] %vm3297_vm10, %v3291_v26 }
 0x529   : > { %3323 = vst.msk [vmem:[%s5803_s6 + $0xc8] sm:$0xff] %vm3297_vm10, %v3290_v28 }
 0x52a   : > { %3322 = vst.msk [vmem:[%s5803_s6 + $0xc0] sm:$0xff] %vm3297_vm10, %v3289_v6 }
 0x52d   : > { %v3256_v12 = vpop.xlane.xlu2 %3255  ;;  %v3253_v43 = vpop.xlane.xlu1 %3252 }
 0x52e   : > { %v3294_v3 = vadd.f32 %v5622_v37, %v3256_v12  ;;  %v3293_v29 = vadd.f32 %v5622_v37, %v3253_v43  ;;  %v3250_v54 = vpop.xlane.xlu0 %3249 }
 0x52f   : > { %v3292_v40 = vadd.f32 %v5622_v37, %v3250_v54 }
 0x530   : > { %3327 = vst.msk [vmem:[%s5803_s6 + $0xe8] sm:$0xff] %vm3297_vm10, %v3294_v3 }
 0x531   : > { %3326 = vst.msk [vmem:[%s5803_s6 + $0xe0] sm:$0xff] %vm3297_vm10, %v3293_v29 }
 0x532   : > { %3325 = vst.msk [vmem:[%s5803_s6 + $0xd8] sm:$0xff] %vm3297_vm10, %v3292_v40 }
 0x535   : > { %v3262_v48 = vpop.xlane.xlu1 %3261 }
 0x536   : > { %v3296_v53 = vadd.f32 %v5622_v37, %v3262_v48  ;;  %v3259_v23 = vpop.xlane.xlu0 %3258 }
 0x537   : > { %v3295_v17 = vadd.f32 %v5622_v37, %v3259_v23 }
 0x538   : > { %3329 = vst.msk [vmem:[%s5803_s6 + $0xf8] sm:$0xff] %vm3297_vm10, %v3296_v53 }
 0x539   : > { %3328 = vst.msk [vmem:[%s5803_s6 + $0xf0] sm:$0xff] %vm3297_vm10, %v3295_v17 }
 0x53a PF: > { %p18_p4 = scmp.ge.s32.totalorder %s4391_s10, 4   ;;  %s5915_s23 = smov %s4292_s24 }
 0x53b   : > { %s5916_s24 = smov %s4296_s25  ;;  %s5917_s25 = smov %s4401_s15 }
 0x53c   : > { %s5918_s26 = smov %s4391_s10  ;;  %20 = sbr.rel (!%p18_p4) target bundleno = 6 (0x6), region = 95 }
 0x541   :  { %3341 = vsyncpa [#allocation6], 1 }
 0x542   :  { %3343 = vsyncpa [#allocation6 + $0x1], 1 }
 0x543   :  { %3344 = vsyncpa [#allocation8], 1 }

</bundles_post_ra>
